<compile_context>
chip_gen: v7x
topology: tpu7x:2x2x1
jax: 0.10.0
libtpu: 0.0.40
codegen_flags: <defaults>
</compile_context>

<pallas_src>
import functools

import jax
import jax.numpy as jnp
from jax import lax
from jax.experimental import pallas as pl
from jax.experimental.pallas import tpu as pltpu


def _input_conv_kernel(xp_ref, w1_ref, b1_ref, w2_ref, b2_ref, o_ref, mid_ref,
                       *, Nb, H, W, Cin, Cp, Cout):
    """Nb images per grid step (NHWC, channels on the 128-lane axis).

    xp_ref : (Nb, H+2, W+2, Cin)  f32   zero-padded input tile
    w1_ref : (3, 3, Cin, Cp)      bf16  conv1 weights (HWIO), BN1 scale folded, Cmid->Cp padded
    b1_ref : (1, Cp)              f32   BN1 bias (zero in padded channels)
    w2_ref : (9*Cp, Cout)         bf16  conv2 weights in im2col K order (dy, dx, c)
    b2_ref : (1, Cout)            f32   BN2 bias
    o_ref  : (Nb, H, W, Cout)     f32
    mid_ref: (Nb, H+2, W+2, Cp)   f32   VMEM scratch: padded intermediate activation
    """
    M = Nb * H * W
    x = xp_ref[...]
    w1 = w1_ref[...]

    # ---- conv1 (+ folded BN1 scale): 9 per-tap MXU dots, bf16 operands, f32 accumulation.
    # Kept per-tap on purpose: per-tap K is only Cin, so an im2col fuse would need either
    # an unaligned width-Cin lane concat or ~10x K zero-padding; conv1 is a small MAC share.
    acc1 = jnp.zeros((M, Cp), jnp.float32)
    for dy in range(3):
        for dx in range(3):
            win = x[:, dy:dy + H, dx:dx + W, :].reshape(M, Cin)
            acc1 = acc1 + jnp.dot(win.astype(jnp.bfloat16), w1[dy, dx],
                                  preferred_element_type=jnp.float32)
    y = jnp.maximum(acc1 + b1_ref[...], 0.0)              # (M, Cp); padded channels stay 0

    # ---- padded intermediate: zero only the 1-px halo ring (re-zeroed every step so the
    # batch axis is safe under "parallel" sharding), then overwrite the interior.
    mid_ref[:, 0:1, :, :] = jnp.zeros((Nb, 1, W + 2, Cp), jnp.float32)
    mid_ref[:, H + 1:H + 2, :, :] = jnp.zeros((Nb, 1, W + 2, Cp), jnp.float32)
    mid_ref[:, :, 0:1, :] = jnp.zeros((Nb, H + 2, 1, Cp), jnp.float32)
    mid_ref[:, :, W + 1:W + 2, :] = jnp.zeros((Nb, H + 2, 1, Cp), jnp.float32)
    mid_ref[:, pl.ds(1, H), pl.ds(1, W), :] = y.reshape(Nb, H, W, Cp)
    m = mid_ref[...]                                       # (Nb, H+2, W+2, Cp)

    # ---- conv2 (+ folded BN2 scale): ONE fused im2col MXU dot, K = 9*Cp.
    # Each concat piece is Cp (a multiple of 64) lanes wide, so all lane offsets in the
    # concatenation are 64-aligned.
    cols = [m[:, dy:dy + H, dx:dx + W, :] for dy in range(3) for dx in range(3)]
    patches = jnp.concatenate(cols, axis=-1)               # (Nb, H, W, 9*Cp)
    patches = patches.reshape(M, 9 * Cp).astype(jnp.bfloat16)
    z = jnp.dot(patches, w2_ref[...], preferred_element_type=jnp.float32)   # (M, Cout)
    z = jnp.maximum(z + b2_ref[...], 0.0)
    # TODO(synk): switch to a lane-dense (Nb, H, W*Cout) store once the merge-minor
    #             reshape / 32-wide lane concat is confirmed to lower cleanly.
    o_ref[...] = z.reshape(Nb, H, W, Cout).astype(o_ref.dtype)


def _images_per_step(N):
    """Largest divisor of N that keeps >= 2 grid steps (feeds both v7x TensorCores)."""
    for nb in range(N // 2, 0, -1):
        if N % nb == 0:
            return nb
    return N      # N == 1


def input_conv(x_nchw, w1_grouped, bn1, w2_oihw, bn2, num_in_frames,
               eps=1e-5, images_per_step=None):
    """Pallas implementation of inputConv.forward (inference-mode BatchNorm).

    x_nchw     : (N, Cin, H, W), Cin = num_in_frames * channels_per_frame
    w1_grouped : (Cmid, Cin // groups, 3, 3) grouped conv weights (PyTorch layout),
                 Cmid = num_in_frames * 30, groups = num_in_frames
    w2_oihw    : (Cout, Cmid, 3, 3)
    bn1, bn2   : (gamma, beta, running_mean, running_var)
    """
    N, Cin, H, W = x_nchw.shape
    G = num_in_frames
    Cmid = w1_grouped.shape[0]
    Cout = w2_oihw.shape[0]
    cpg, opg = Cin // G, Cmid // G
    Cp = ((Cmid + 63) // 64) * 64      # pad so each conv2 im2col piece is 64-lane aligned

    g1, be1, m1, v1 = bn1
    g2, be2, m2, v2 = bn2
    s1 = (g1 / jnp.sqrt(v1 + eps)).astype(jnp.float32)
    b1 = (be1 - m1 * s1).astype(jnp.float32)
    s2 = (g2 / jnp.sqrt(v2 + eps)).astype(jnp.float32)
    b2 = (be2 - m2 * s2).reshape(1, Cout).astype(jnp.float32)

    # Grouped conv1 -> equivalent block-diagonal dense weight (exact; zeros kill
    # cross-group terms).  Wasted MXU MACs are negligible at this K.
    w1_full = jnp.zeros((Cmid, Cin, 3, 3), jnp.float32)
    for g in range(G):
        w1_full = w1_full.at[g * opg:(g + 1) * opg, g * cpg:(g + 1) * cpg].set(
            w1_grouped[g * opg:(g + 1) * opg].astype(jnp.float32))

    # OIHW -> HWIO, fold BN scale into the output-channel axis, pad Cmid -> Cp, cast bf16.
    w1_hwio = jnp.transpose(w1_full, (2, 3, 1, 0)) * s1[None, None, None, :]
    w1 = jnp.pad(w1_hwio, ((0, 0), (0, 0), (0, 0), (0, Cp - Cmid))).astype(jnp.bfloat16)
    b1p = jnp.pad(b1, (0, Cp - Cmid)).reshape(1, Cp).astype(jnp.float32)   # pad bias = 0

    w2_hwio = jnp.transpose(w2_oihw.astype(jnp.float32), (2, 3, 1, 0)) * s2[None, None, None, :]
    w2_hwio = jnp.pad(w2_hwio, ((0, 0), (0, 0), (0, Cp - Cmid), (0, 0)))
    # (3, 3, Cp, Cout) -> (9*Cp, Cout): row order (dy, dx, c) matches the in-kernel concat.
    w2 = w2_hwio.reshape(9 * Cp, Cout).astype(jnp.bfloat16)

    # NCHW -> NHWC (+ 1-px spatial zero pad; fuses with the layout transpose).
    x_nhwc = jnp.transpose(x_nchw, (0, 2, 3, 1)).astype(jnp.float32)
    xp = jnp.pad(x_nhwc, ((0, 0), (1, 1), (1, 1), (0, 0)))

    nb = _images_per_step(N) if images_per_step is None else images_per_step
    assert N % nb == 0, (N, nb)

    kernel = functools.partial(_input_conv_kernel,
                               Nb=nb, H=H, W=W, Cin=Cin, Cp=Cp, Cout=Cout)

    out_nhwc = pl.pallas_call(
        kernel,
        out_shape=jax.ShapeDtypeStruct((N, H, W, Cout), jnp.float32),
        grid_spec=pltpu.PrefetchScalarGridSpec(
            num_scalar_prefetch=0,
            grid=(N // nb,),
            in_specs=[
                pl.BlockSpec((nb, H + 2, W + 2, Cin), lambda n: (n, 0, 0, 0)),
                pl.BlockSpec((3, 3, Cin, Cp), lambda n: (0, 0, 0, 0)),
                pl.BlockSpec((1, Cp), lambda n: (0, 0)),
                pl.BlockSpec((9 * Cp, Cout), lambda n: (0, 0)),
                pl.BlockSpec((1, Cout), lambda n: (0, 0)),
            ],
            out_specs=pl.BlockSpec((nb, H, W, Cout), lambda n: (n, 0, 0, 0)),
            scratch_shapes=[pltpu.VMEM((nb, H + 2, W + 2, Cp), jnp.float32)],
        ),
        compiler_params=pltpu.CompilerParams(
            dimension_semantics=("parallel",),
            # v5e's scoped-VMEM default is only 16 MiB; be explicit (still well under
            # v7x's 64 MiB physical).  Re-derive when adding row-strip tiling.
            vmem_limit_bytes=32 * 1024 * 1024),
    )(xp, w1, b1p, w2, b2)

    return jnp.transpose(out_nhwc, (0, 3, 1, 2))   # back to NCHW


def _reference(x, w1_grouped, bn1, w2, bn2, groups, eps=1e-5, mxu_bf16=False):
    """Pure-JAX reference (NCHW), mirrors the PyTorch module in eval mode.

    mxu_bf16=True reproduces the kernel's operand quantization (BN scale folded into
    the weights, bf16 MXU inputs, f32 accumulation) for an apples-to-apples check.
    """
    g1, be1, m1, v1 = bn1
    g2, be2, m2, v2 = bn2
    s1 = g1 / jnp.sqrt(v1 + eps)
    b1 = be1 - m1 * s1
    s2 = g2 / jnp.sqrt(v2 + eps)
    b2 = be2 - m2 * s2

    def conv(a, w, g, prec=None):
        return lax.conv_general_dilated(
            a, w, window_strides=(1, 1), padding=((1, 1), (1, 1)),
            dimension_numbers=("NCHW", "OIHW", "NCHW"),
            feature_group_count=g, precision=prec,
            preferred_element_type=jnp.float32)

    if mxu_bf16:
        w1s = (w1_grouped * s1[:, None, None, None]).astype(jnp.bfloat16)
        w2s = (w2 * s2[:, None, None, None]).astype(jnp.bfloat16)
        y = jnp.maximum(conv(x.astype(jnp.bfloat16), w1s, groups)
                        + b1[None, :, None, None], 0.0)
        return jnp.maximum(conv(y.astype(jnp.bfloat16), w2s, 1)
                           + b2[None, :, None, None], 0.0)

    y = conv(x, w1_grouped, groups, lax.Precision.HIGHEST)
    y = jnp.maximum(y * s1[None, :, None, None] + b1[None, :, None, None], 0.0)
    z = conv(y, w2, 1, lax.Precision.HIGHEST)
    return jnp.maximum(z * s2[None, :, None, None] + b2[None, :, None, None], 0.0)


if __name__ == "__main__":
    # Shapes consistent with inputConv: num_in_frames=2, channels_per_frame=3,
    # out_channel=32 -> Cin=6, Cmid=60, Cout=32; batch=2, spatial 16x16.
    num_in_frames, channels_per_frame, out_channel = 2, 3, 32
    N, H, W = 2, 16, 16
    Cin = num_in_frames * channels_per_frame
    Cmid = num_in_frames * 30
    Cout = out_channel

    key = jax.random.PRNGKey(0)
    ks = jax.random.split(key, 11)

    x = jax.random.normal(ks[0], (N, Cin, H, W), jnp.float32)
    w1 = 0.15 * jax.random.normal(ks[1], (Cmid, Cin // num_in_frames, 3, 3), jnp.float32)
    w2 = 0.15 * jax.random.normal(ks[2], (Cout, Cmid, 3, 3), jnp.float32)
    bn1 = (1.0 + 0.1 * jax.random.normal(ks[3], (Cmid,), jnp.float32),
           0.1 * jax.random.normal(ks[4], (Cmid,), jnp.float32),
           0.05 * jax.random.normal(ks[5], (Cmid,), jnp.float32),
           0.5 + jax.random.uniform(ks[6], (Cmid,), jnp.float32))
    bn2 = (1.0 + 0.1 * jax.random.normal(ks[7], (Cout,), jnp.float32),
           0.1 * jax.random.normal(ks[8], (Cout,), jnp.float32),
           0.05 * jax.random.normal(ks[9], (Cout,), jnp.float32),
           0.5 + jax.random.uniform(ks[10], (Cout,), jnp.float32))

    out = input_conv(x, w1, bn1, w2, bn2, num_in_frames)
    out = jax.block_until_ready(out)
    assert out.shape == (N, Cout, H, W), out.shape

    # Tight check against a reference using the same bf16-operand / f32-accumulate math.
    ref_bf16 = _reference(x, w1, bn1, w2, bn2, num_in_frames, mxu_bf16=True)
    err_bf16 = float(jnp.max(jnp.abs(out - ref_bf16)))
    assert jnp.allclose(out, ref_bf16, rtol=5e-3, atol=5e-3), \
        f"bf16-matched max abs err = {err_bf16}"

    # Sanity check against the exact f32 module math (bf16 MXU operand tolerance).
    ref_f32 = _reference(x, w1, bn1, w2, bn2, num_in_frames, mxu_bf16=False)
    err_f32 = float(jnp.max(jnp.abs(out - ref_f32)))
    assert jnp.allclose(out, ref_f32, rtol=1e-1, atol=1e-1), \
        f"f32 max abs err = {err_f32}"

    print("KERNEL_OK")
</pallas_src>

<mosaic_0001>
module attributes {stable_mosaic.version = 11 : i64} {
  func.func @_input_conv_kernel(%arg0: i32, %arg1: memref<1x18x18x6xf32, #tpu.memory_space<vmem>>, %arg2: memref<3x3x6x64xbf16, #tpu.memory_space<vmem>>, %arg3: memref<1x64xf32, #tpu.memory_space<vmem>>, %arg4: memref<576x32xbf16, #tpu.memory_space<vmem>>, %arg5: memref<1x32xf32, #tpu.memory_space<vmem>>, %arg6: memref<1x16x16x32xf32, #tpu.memory_space<vmem>>, %arg7: memref<1x18x18x64xf32, #tpu.memory_space<vmem>>) attributes {dimension_semantics = [#tpu.dimension_semantics<parallel>], iteration_bounds = array<i64: 2>, scalar_prefetch = 0 : i64, scratch_operands = 1 : i64, tpu.core_type = #tpu.core_type<tc>, window_params = [{transform_indices = @transform_0, window_bounds = array<i64: 1, 18, 18, 6>}, {pipeline_mode = #tpu.pipeline_mode<synchronous>, transform_indices = @transform_1, window_bounds = array<i64: 3, 3, 6, 64>}, {pipeline_mode = #tpu.pipeline_mode<synchronous>, transform_indices = @transform_2, window_bounds = array<i64: 1, 64>}, {pipeline_mode = #tpu.pipeline_mode<synchronous>, transform_indices = @transform_3, window_bounds = array<i64: 576, 32>}, {pipeline_mode = #tpu.pipeline_mode<synchronous>, transform_indices = @transform_4, window_bounds = array<i64: 1, 32>}, {transform_indices = @transform_5, window_bounds = array<i64: 1, 16, 16, 32>}]} {
    %c0 = arith.constant 0 : index
    %c0_0 = arith.constant 0 : index
    %c0_1 = arith.constant 0 : index
    %c0_2 = arith.constant 0 : index
    %0 = vector.load %arg1[%c0, %c0_0, %c0_1, %c0_2] : memref<1x18x18x6xf32, #tpu.memory_space<vmem>>, vector<1x18x18x6xf32>
    %c0_3 = arith.constant 0 : index
    %c0_4 = arith.constant 0 : index
    %c0_5 = arith.constant 0 : index
    %c0_6 = arith.constant 0 : index
    %1 = vector.load %arg2[%c0_3, %c0_4, %c0_5, %c0_6] : memref<3x3x6x64xbf16, #tpu.memory_space<vmem>>, vector<3x3x6x64xbf16>
    %cst = arith.constant 0.000000e+00 : f32
    %2 = vector.broadcast %cst : f32 to vector<256x64xf32>
    %3 = vector.extract_strided_slice %0 {offsets = [0, 0, 0, 0], sizes = [1, 16, 16, 6], strides = [1, 1, 1, 1]} : vector<1x18x18x6xf32> to vector<1x16x16x6xf32>
    %4 = vector.shape_cast %3 : vector<1x16x16x6xf32> to vector<256x6xf32>
    %5 = arith.truncf %4 : vector<256x6xf32> to vector<256x6xbf16>
    %6 = vector.extract_strided_slice %1 {offsets = [0, 0, 0, 0], sizes = [1, 1, 6, 64], strides = [1, 1, 1, 1]} : vector<3x3x6x64xbf16> to vector<1x1x6x64xbf16>
    %7 = vector.shape_cast %6 : vector<1x1x6x64xbf16> to vector<6x64xbf16>
    %cst_7 = arith.constant dense<0.000000e+00> : vector<256x64xf32>
    %8 = tpu.matmul %5, %7, %cst_7 {dimension_numbers = #tpu.dot_dimension_numbers<[1], [0], [0], [1], [0, 0, 1, 1], [], []>} : vector<256x6xbf16>, vector<6x64xbf16>, vector<256x64xf32> -> vector<256x64xf32>
    %9 = arith.addf %2, %8 : vector<256x64xf32>
    %10 = vector.extract_strided_slice %0 {offsets = [0, 0, 1, 0], sizes = [1, 16, 16, 6], strides = [1, 1, 1, 1]} : vector<1x18x18x6xf32> to vector<1x16x16x6xf32>
    %11 = vector.shape_cast %10 : vector<1x16x16x6xf32> to vector<256x6xf32>
    %12 = arith.truncf %11 : vector<256x6xf32> to vector<256x6xbf16>
    %13 = vector.extract_strided_slice %1 {offsets = [0, 1, 0, 0], sizes = [1, 1, 6, 64], strides = [1, 1, 1, 1]} : vector<3x3x6x64xbf16> to vector<1x1x6x64xbf16>
    %14 = vector.shape_cast %13 : vector<1x1x6x64xbf16> to vector<6x64xbf16>
    %cst_8 = arith.constant dense<0.000000e+00> : vector<256x64xf32>
    %15 = tpu.matmul %12, %14, %cst_8 {dimension_numbers = #tpu.dot_dimension_numbers<[1], [0], [0], [1], [0, 0, 1, 1], [], []>} : vector<256x6xbf16>, vector<6x64xbf16>, vector<256x64xf32> -> vector<256x64xf32>
    %16 = arith.addf %9, %15 : vector<256x64xf32>
    %17 = vector.extract_strided_slice %0 {offsets = [0, 0, 2, 0], sizes = [1, 16, 16, 6], strides = [1, 1, 1, 1]} : vector<1x18x18x6xf32> to vector<1x16x16x6xf32>
    %18 = vector.shape_cast %17 : vector<1x16x16x6xf32> to vector<256x6xf32>
    %19 = arith.truncf %18 : vector<256x6xf32> to vector<256x6xbf16>
    %20 = vector.extract_strided_slice %1 {offsets = [0, 2, 0, 0], sizes = [1, 1, 6, 64], strides = [1, 1, 1, 1]} : vector<3x3x6x64xbf16> to vector<1x1x6x64xbf16>
    %21 = vector.shape_cast %20 : vector<1x1x6x64xbf16> to vector<6x64xbf16>
    %cst_9 = arith.constant dense<0.000000e+00> : vector<256x64xf32>
    %22 = tpu.matmul %19, %21, %cst_9 {dimension_numbers = #tpu.dot_dimension_numbers<[1], [0], [0], [1], [0, 0, 1, 1], [], []>} : vector<256x6xbf16>, vector<6x64xbf16>, vector<256x64xf32> -> vector<256x64xf32>
    %23 = arith.addf %16, %22 : vector<256x64xf32>
    %24 = vector.extract_strided_slice %0 {offsets = [0, 1, 0, 0], sizes = [1, 16, 16, 6], strides = [1, 1, 1, 1]} : vector<1x18x18x6xf32> to vector<1x16x16x6xf32>
    %25 = vector.shape_cast %24 : vector<1x16x16x6xf32> to vector<256x6xf32>
    %26 = arith.truncf %25 : vector<256x6xf32> to vector<256x6xbf16>
    %27 = vector.extract_strided_slice %1 {offsets = [1, 0, 0, 0], sizes = [1, 1, 6, 64], strides = [1, 1, 1, 1]} : vector<3x3x6x64xbf16> to vector<1x1x6x64xbf16>
    %28 = vector.shape_cast %27 : vector<1x1x6x64xbf16> to vector<6x64xbf16>
    %cst_10 = arith.constant dense<0.000000e+00> : vector<256x64xf32>
    %29 = tpu.matmul %26, %28, %cst_10 {dimension_numbers = #tpu.dot_dimension_numbers<[1], [0], [0], [1], [0, 0, 1, 1], [], []>} : vector<256x6xbf16>, vector<6x64xbf16>, vector<256x64xf32> -> vector<256x64xf32>
    %30 = arith.addf %23, %29 : vector<256x64xf32>
    %31 = vector.extract_strided_slice %0 {offsets = [0, 1, 1, 0], sizes = [1, 16, 16, 6], strides = [1, 1, 1, 1]} : vector<1x18x18x6xf32> to vector<1x16x16x6xf32>
    %32 = vector.shape_cast %31 : vector<1x16x16x6xf32> to vector<256x6xf32>
    %33 = arith.truncf %32 : vector<256x6xf32> to vector<256x6xbf16>
    %34 = vector.extract_strided_slice %1 {offsets = [1, 1, 0, 0], sizes = [1, 1, 6, 64], strides = [1, 1, 1, 1]} : vector<3x3x6x64xbf16> to vector<1x1x6x64xbf16>
    %35 = vector.shape_cast %34 : vector<1x1x6x64xbf16> to vector<6x64xbf16>
    %cst_11 = arith.constant dense<0.000000e+00> : vector<256x64xf32>
    %36 = tpu.matmul %33, %35, %cst_11 {dimension_numbers = #tpu.dot_dimension_numbers<[1], [0], [0], [1], [0, 0, 1, 1], [], []>} : vector<256x6xbf16>, vector<6x64xbf16>, vector<256x64xf32> -> vector<256x64xf32>
    %37 = arith.addf %30, %36 : vector<256x64xf32>
    %38 = vector.extract_strided_slice %0 {offsets = [0, 1, 2, 0], sizes = [1, 16, 16, 6], strides = [1, 1, 1, 1]} : vector<1x18x18x6xf32> to vector<1x16x16x6xf32>
    %39 = vector.shape_cast %38 : vector<1x16x16x6xf32> to vector<256x6xf32>
    %40 = arith.truncf %39 : vector<256x6xf32> to vector<256x6xbf16>
    %41 = vector.extract_strided_slice %1 {offsets = [1, 2, 0, 0], sizes = [1, 1, 6, 64], strides = [1, 1, 1, 1]} : vector<3x3x6x64xbf16> to vector<1x1x6x64xbf16>
    %42 = vector.shape_cast %41 : vector<1x1x6x64xbf16> to vector<6x64xbf16>
    %cst_12 = arith.constant dense<0.000000e+00> : vector<256x64xf32>
    %43 = tpu.matmul %40, %42, %cst_12 {dimension_numbers = #tpu.dot_dimension_numbers<[1], [0], [0], [1], [0, 0, 1, 1], [], []>} : vector<256x6xbf16>, vector<6x64xbf16>, vector<256x64xf32> -> vector<256x64xf32>
    %44 = arith.addf %37, %43 : vector<256x64xf32>
    %45 = vector.extract_strided_slice %0 {offsets = [0, 2, 0, 0], sizes = [1, 16, 16, 6], strides = [1, 1, 1, 1]} : vector<1x18x18x6xf32> to vector<1x16x16x6xf32>
    %46 = vector.shape_cast %45 : vector<1x16x16x6xf32> to vector<256x6xf32>
    %47 = arith.truncf %46 : vector<256x6xf32> to vector<256x6xbf16>
    %48 = vector.extract_strided_slice %1 {offsets = [2, 0, 0, 0], sizes = [1, 1, 6, 64], strides = [1, 1, 1, 1]} : vector<3x3x6x64xbf16> to vector<1x1x6x64xbf16>
    %49 = vector.shape_cast %48 : vector<1x1x6x64xbf16> to vector<6x64xbf16>
    %cst_13 = arith.constant dense<0.000000e+00> : vector<256x64xf32>
    %50 = tpu.matmul %47, %49, %cst_13 {dimension_numbers = #tpu.dot_dimension_numbers<[1], [0], [0], [1], [0, 0, 1, 1], [], []>} : vector<256x6xbf16>, vector<6x64xbf16>, vector<256x64xf32> -> vector<256x64xf32>
    %51 = arith.addf %44, %50 : vector<256x64xf32>
    %52 = vector.extract_strided_slice %0 {offsets = [0, 2, 1, 0], sizes = [1, 16, 16, 6], strides = [1, 1, 1, 1]} : vector<1x18x18x6xf32> to vector<1x16x16x6xf32>
    %53 = vector.shape_cast %52 : vector<1x16x16x6xf32> to vector<256x6xf32>
    %54 = arith.truncf %53 : vector<256x6xf32> to vector<256x6xbf16>
    %55 = vector.extract_strided_slice %1 {offsets = [2, 1, 0, 0], sizes = [1, 1, 6, 64], strides = [1, 1, 1, 1]} : vector<3x3x6x64xbf16> to vector<1x1x6x64xbf16>
    %56 = vector.shape_cast %55 : vector<1x1x6x64xbf16> to vector<6x64xbf16>
    %cst_14 = arith.constant dense<0.000000e+00> : vector<256x64xf32>
    %57 = tpu.matmul %54, %56, %cst_14 {dimension_numbers = #tpu.dot_dimension_numbers<[1], [0], [0], [1], [0, 0, 1, 1], [], []>} : vector<256x6xbf16>, vector<6x64xbf16>, vector<256x64xf32> -> vector<256x64xf32>
    %58 = arith.addf %51, %57 : vector<256x64xf32>
    %59 = vector.extract_strided_slice %0 {offsets = [0, 2, 2, 0], sizes = [1, 16, 16, 6], strides = [1, 1, 1, 1]} : vector<1x18x18x6xf32> to vector<1x16x16x6xf32>
    %60 = vector.shape_cast %59 : vector<1x16x16x6xf32> to vector<256x6xf32>
    %61 = arith.truncf %60 : vector<256x6xf32> to vector<256x6xbf16>
    %62 = vector.extract_strided_slice %1 {offsets = [2, 2, 0, 0], sizes = [1, 1, 6, 64], strides = [1, 1, 1, 1]} : vector<3x3x6x64xbf16> to vector<1x1x6x64xbf16>
    %63 = vector.shape_cast %62 : vector<1x1x6x64xbf16> to vector<6x64xbf16>
    %cst_15 = arith.constant dense<0.000000e+00> : vector<256x64xf32>
    %64 = tpu.matmul %61, %63, %cst_15 {dimension_numbers = #tpu.dot_dimension_numbers<[1], [0], [0], [1], [0, 0, 1, 1], [], []>} : vector<256x6xbf16>, vector<6x64xbf16>, vector<256x64xf32> -> vector<256x64xf32>
    %65 = arith.addf %58, %64 : vector<256x64xf32>
    %c0_16 = arith.constant 0 : index
    %c0_17 = arith.constant 0 : index
    %66 = vector.load %arg3[%c0_16, %c0_17] : memref<1x64xf32, #tpu.memory_space<vmem>>, vector<1x64xf32>
    %67 = vector.broadcast %66 : vector<1x64xf32> to vector<256x64xf32>
    %68 = arith.addf %65, %67 : vector<256x64xf32>
    %cst_18 = arith.constant 0.000000e+00 : f32
    %69 = vector.broadcast %cst_18 : f32 to vector<256x64xf32>
    %70 = arith.maximumf %68, %69 : vector<256x64xf32>
    %cst_19 = arith.constant 0.000000e+00 : f32
    %71 = vector.broadcast %cst_19 : f32 to vector<1x1x18x64xf32>
    %c0_20 = arith.constant 0 : index
    %c0_21 = arith.constant 0 : index
    %c0_22 = arith.constant 0 : index
    %c0_23 = arith.constant 0 : index
    %72 = vector.load %arg7[%c0_20, %c0_21, %c0_22, %c0_23] : memref<1x18x18x64xf32, #tpu.memory_space<vmem>>, vector<1x1x18x64xf32>
    tpu.vector_store %arg7[%c0_20, %c0_21, %c0_22, %c0_23], %71 {strides = array<i32>} : memref<1x18x18x64xf32, #tpu.memory_space<vmem>>, vector<1x1x18x64xf32>,
    %cst_24 = arith.constant 0.000000e+00 : f32
    %73 = vector.broadcast %cst_24 : f32 to vector<1x1x18x64xf32>
    %c0_25 = arith.constant 0 : index
    %c17 = arith.constant 17 : index
    %c0_26 = arith.constant 0 : index
    %c0_27 = arith.constant 0 : index
    %74 = vector.load %arg7[%c0_25, %c17, %c0_26, %c0_27] : memref<1x18x18x64xf32, #tpu.memory_space<vmem>>, vector<1x1x18x64xf32>
    tpu.vector_store %arg7[%c0_25, %c17, %c0_26, %c0_27], %73 {strides = array<i32>} : memref<1x18x18x64xf32, #tpu.memory_space<vmem>>, vector<1x1x18x64xf32>,
    %cst_28 = arith.constant 0.000000e+00 : f32
    %75 = vector.broadcast %cst_28 : f32 to vector<1x18x1x64xf32>
    %c0_29 = arith.constant 0 : index
    %c0_30 = arith.constant 0 : index
    %c0_31 = arith.constant 0 : index
    %c0_32 = arith.constant 0 : index
    %76 = vector.load %arg7[%c0_29, %c0_30, %c0_31, %c0_32] : memref<1x18x18x64xf32, #tpu.memory_space<vmem>>, vector<1x18x1x64xf32>
    tpu.vector_store %arg7[%c0_29, %c0_30, %c0_31, %c0_32], %75 {strides = array<i32>} : memref<1x18x18x64xf32, #tpu.memory_space<vmem>>, vector<1x18x1x64xf32>,
    %cst_33 = arith.constant 0.000000e+00 : f32
    %77 = vector.broadcast %cst_33 : f32 to vector<1x18x1x64xf32>
    %c0_34 = arith.constant 0 : index
    %c0_35 = arith.constant 0 : index
    %c17_36 = arith.constant 17 : index
    %c0_37 = arith.constant 0 : index
    %78 = vector.load %arg7[%c0_34, %c0_35, %c17_36, %c0_37] : memref<1x18x18x64xf32, #tpu.memory_space<vmem>>, vector<1x18x1x64xf32>
    tpu.vector_store %arg7[%c0_34, %c0_35, %c17_36, %c0_37], %77 {strides = array<i32>} : memref<1x18x18x64xf32, #tpu.memory_space<vmem>>, vector<1x18x1x64xf32>,
    %79 = vector.shape_cast %70 : vector<256x64xf32> to vector<1x16x16x64xf32>
    %c0_38 = arith.constant 0 : index
    %c1 = arith.constant 1 : index
    %c1_39 = arith.constant 1 : index
    %c0_40 = arith.constant 0 : index
    %80 = vector.load %arg7[%c0_38, %c1, %c1_39, %c0_40] : memref<1x18x18x64xf32, #tpu.memory_space<vmem>>, vector<1x16x16x64xf32>
    tpu.vector_store %arg7[%c0_38, %c1, %c1_39, %c0_40], %79 {strides = array<i32>} : memref<1x18x18x64xf32, #tpu.memory_space<vmem>>, vector<1x16x16x64xf32>,
    %c0_41 = arith.constant 0 : index
    %c0_42 = arith.constant 0 : index
    %c0_43 = arith.constant 0 : index
    %c0_44 = arith.constant 0 : index
    %81 = vector.load %arg7[%c0_41, %c0_42, %c0_43, %c0_44] : memref<1x18x18x64xf32, #tpu.memory_space<vmem>>, vector<1x18x18x64xf32>
    %82 = vector.extract_strided_slice %81 {offsets = [0, 0, 0, 0], sizes = [1, 16, 16, 64], strides = [1, 1, 1, 1]} : vector<1x18x18x64xf32> to vector<1x16x16x64xf32>
    %83 = vector.extract_strided_slice %81 {offsets = [0, 0, 1, 0], sizes = [1, 16, 16, 64], strides = [1, 1, 1, 1]} : vector<1x18x18x64xf32> to vector<1x16x16x64xf32>
    %84 = vector.extract_strided_slice %81 {offsets = [0, 0, 2, 0], sizes = [1, 16, 16, 64], strides = [1, 1, 1, 1]} : vector<1x18x18x64xf32> to vector<1x16x16x64xf32>
    %85 = vector.extract_strided_slice %81 {offsets = [0, 1, 0, 0], sizes = [1, 16, 16, 64], strides = [1, 1, 1, 1]} : vector<1x18x18x64xf32> to vector<1x16x16x64xf32>
    %86 = vector.extract_strided_slice %81 {offsets = [0, 1, 1, 0], sizes = [1, 16, 16, 64], strides = [1, 1, 1, 1]} : vector<1x18x18x64xf32> to vector<1x16x16x64xf32>
    %87 = vector.extract_strided_slice %81 {offsets = [0, 1, 2, 0], sizes = [1, 16, 16, 64], strides = [1, 1, 1, 1]} : vector<1x18x18x64xf32> to vector<1x16x16x64xf32>
    %88 = vector.extract_strided_slice %81 {offsets = [0, 2, 0, 0], sizes = [1, 16, 16, 64], strides = [1, 1, 1, 1]} : vector<1x18x18x64xf32> to vector<1x16x16x64xf32>
    %89 = vector.extract_strided_slice %81 {offsets = [0, 2, 1, 0], sizes = [1, 16, 16, 64], strides = [1, 1, 1, 1]} : vector<1x18x18x64xf32> to vector<1x16x16x64xf32>
    %90 = vector.extract_strided_slice %81 {offsets = [0, 2, 2, 0], sizes = [1, 16, 16, 64], strides = [1, 1, 1, 1]} : vector<1x18x18x64xf32> to vector<1x16x16x64xf32>
    %91 = tpu.concatenate %82, %83, %84, %85, %86, %87, %88, %89, %90 in 3 : vector<1x16x16x64xf32>, vector<1x16x16x64xf32>, vector<1x16x16x64xf32>, vector<1x16x16x64xf32>, vector<1x16x16x64xf32>, vector<1x16x16x64xf32>, vector<1x16x16x64xf32>, vector<1x16x16x64xf32>, vector<1x16x16x64xf32> -> vector<1x16x16x576xf32>
    %92 = vector.shape_cast %91 : vector<1x16x16x576xf32> to vector<256x576xf32>
    %93 = arith.truncf %92 : vector<256x576xf32> to vector<256x576xbf16>
    %c0_45 = arith.constant 0 : index
    %c0_46 = arith.constant 0 : index
    %94 = vector.load %arg4[%c0_45, %c0_46] : memref<576x32xbf16, #tpu.memory_space<vmem>>, vector<576x32xbf16>
    %cst_47 = arith.constant dense<0.000000e+00> : vector<256x32xf32>
    %95 = tpu.matmul %93, %94, %cst_47 {dimension_numbers = #tpu.dot_dimension_numbers<[1], [0], [0], [1], [0, 0, 1, 1], [], []>} : vector<256x576xbf16>, vector<576x32xbf16>, vector<256x32xf32> -> vector<256x32xf32>
    %c0_48 = arith.constant 0 : index
    %c0_49 = arith.constant 0 : index
    %96 = vector.load %arg5[%c0_48, %c0_49] : memref<1x32xf32, #tpu.memory_space<vmem>>, vector<1x32xf32>
    %97 = vector.broadcast %96 : vector<1x32xf32> to vector<256x32xf32>
    %98 = arith.addf %95, %97 : vector<256x32xf32>
    %cst_50 = arith.constant 0.000000e+00 : f32
    %99 = vector.broadcast %cst_50 : f32 to vector<256x32xf32>
    %100 = arith.maximumf %98, %99 : vector<256x32xf32>
    %101 = vector.shape_cast %100 : vector<256x32xf32> to vector<1x16x16x32xf32>
    %c0_51 = arith.constant 0 : index
    %c0_52 = arith.constant 0 : index
    %c0_53 = arith.constant 0 : index
    %c0_54 = arith.constant 0 : index
    %102 = vector.load %arg6[%c0_51, %c0_52, %c0_53, %c0_54] : memref<1x16x16x32xf32, #tpu.memory_space<vmem>>, vector<1x16x16x32xf32>
    tpu.vector_store %arg6[%c0_51, %c0_52, %c0_53, %c0_54], %101 {strides = array<i32>} : memref<1x16x16x32xf32, #tpu.memory_space<vmem>>, vector<1x16x16x32xf32>,
    return
  }
  func.func @transform_0(%arg0: i32) -> (i32, i32, i32, i32) {
    %c0_i32 = arith.constant 0 : i32
    %c0_i32_0 = arith.constant 0 : i32
    %c0_i32_1 = arith.constant 0 : i32
    %c0_i32_2 = arith.constant 0 : i32
    return %arg0, %c0_i32, %c0_i32_0, %c0_i32_1 : i32, i32, i32, i32
  }
  func.func @transform_1(%arg0: i32) -> (i32, i32, i32, i32) {
    %c0_i32 = arith.constant 0 : i32
    %c0_i32_0 = arith.constant 0 : i32
    %c0_i32_1 = arith.constant 0 : i32
    %c0_i32_2 = arith.constant 0 : i32
    %c0_i32_3 = arith.constant 0 : i32
    return %c0_i32, %c0_i32_0, %c0_i32_1, %c0_i32_2 : i32, i32, i32, i32
  }
  func.func @transform_2(%arg0: i32) -> (i32, i32) {
    %c0_i32 = arith.constant 0 : i32
    %c0_i32_0 = arith.constant 0 : i32
    %c0_i32_1 = arith.constant 0 : i32
    return %c0_i32, %c0_i32_0 : i32, i32
  }
  func.func @transform_3(%arg0: i32) -> (i32, i32) {
    %c0_i32 = arith.constant 0 : i32
    %c0_i32_0 = arith.constant 0 : i32
    %c0_i32_1 = arith.constant 0 : i32
    return %c0_i32, %c0_i32_0 : i32, i32
  }
  func.func @transform_4(%arg0: i32) -> (i32, i32) {
    %c0_i32 = arith.constant 0 : i32
    %c0_i32_0 = arith.constant 0 : i32
    %c0_i32_1 = arith.constant 0 : i32
    return %c0_i32, %c0_i32_0 : i32, i32
  }
  func.func @transform_5(%arg0: i32) -> (i32, i32, i32, i32) {
    %c0_i32 = arith.constant 0 : i32
    %c0_i32_0 = arith.constant 0 : i32
    %c0_i32_1 = arith.constant 0 : i32
    %c0_i32_2 = arith.constant 0 : i32
    return %arg0, %c0_i32, %c0_i32_0, %c0_i32_1 : i32, i32, i32, i32
  }
}

</mosaic_0001>

<bundles_post_ra>
// kernel: tpu_custom_call.1
= control target key start
LH: loop header
LB: loop body
LE: loop exit
PB: predicated region body
PF: predicated region fallthrough
CT: control target
= control target key end

     0   :  { %10 = vsyncpa [#allocation4], 0  ;;  %s8490_s0 = inlined_call_operand.vmem [shape: f32[2,18,18,6], index: 0, kind: input, shape index: {}]   ;;  %s8491_s1 = inlined_call_operand.vmem [shape: bf16[3,3,6,64], index: 1, kind: input, shape index: {}]   ;;  %s8492_s2 = inlined_call_operand.vmem [shape: f32[1,64], index: 2, kind: input, shape index: {}]   ;;  %s8493_s3 = inlined_call_operand.vmem [shape: bf16[576,32], index: 3, kind: input, shape index: {}]   ;;  %s8494_s4 = inlined_call_operand.vmem [shape: f32[1,32], index: 4, kind: input, shape index: {}]   ;;  %s8495_s5 = inlined_call_operand.hbm [shape: f32[2,16,16,32], index: 5, kind: output, shape index: {}]  }
   0x1   :  { %12 = vsyncpa [#allocation4 + $0x1], 0  ;;  %s6101_s18 = smov 0   ;;  %s6103_s19 = smov 0  }
   0x2   :  { %s6105_s20 = smov 0   ;;  %s6107_s21 = smov 0  }
   0x3 LB: > { %s6122_s22 = sadd.s32 4294967295, %s6064_s21   ;;  %s4452_s23 = sadd.s32 4294967294, %s6064_s21   ;;  %s6064_s21 = sphi %s6107_s21, %s8725_s21   ;;  %s6060_s20 = sphi %s6105_s20, %s8724_s20   ;;  %s6056_s19 = sphi %s6103_s19, %s8723_s19   ;;  %s6052_s18 = sphi %s6101_s18, %s8722_s18  }
   0x4   : > { %s6126_s24 = sadd.s32 1, %s6064_s21   ;;  %s135_s25 = sadd.s32 1, %s6060_s20 }
   0x5   : > { %s132_s26 = ssub.s32 %s6064_s21, %s6126_s24  ;;  %p145_p0 = scmp.ne.s32.totalorder %s6060_s20, %s6056_s19 }
   0x6   : > { %p133_p1 = scmp.eq.s32.totalorder %s132_s26, 0  ;;  %p146_p2 = scmp.eq.s32.totalorder %s6122_s22, 1 }
   0x7   : > { %p151_p3 = scmp.ne.s32.totalorder %s6056_s19, %s6052_s18  ;;  %p152_p4 = scmp.eq.s32.totalorder %s4452_s23, 1 }
   0x8   : > { %s6137_s27 = scalar_select %p133_p1, %s6060_s20, %s135_s25  }
   0x9   : > { %p6139_p5 = por %p146_p2, %p145_p0  ;;  %p6143_p6 = por %p152_p4, %p151_p3 }
   0xa   : > { %p4455_p7 = scmp.ge.s32.totalorder %s6064_s21, 1  ;;  %p190_p8 = scmp.lt.s32.totalorder %s6064_s21, 3 }
   0xc   : > { %p191_p9 = pnand %p4455_p7, %p190_p8 }
   0xe   : > { %194 = sbr.rel (%p191_p9) target bundleno = 1321 (0x529), region = 40 }
  0x15   : > { %v280_v0 = vld [vmem:[%s8491_s1 + $0x8] sm:$0x7]  ;;  %vm529_vm0 = vcmask 1042432   ;;  %p218_p10 = scmp.lt.s32.totalorder %s6122_s22, 1  ;;  %v281_v2 = vld [vmem:[%s8491_s1 + $0xc] sm:$0x7] }
  0x16   : > { %5663 = vmatprep.subr.msk.bf16.mxu0 %vm529_vm0, %v280_v0  ;;  %v1084_v1 = vsel %vm529_vm0, %v280_v0, 0  ;;  %vm906_vm1 = vcmask 1045504   ;;  %vm480_vm2 = vcmask 48128   ;;  %v1284_v24 = vsel %vm529_vm0, %v281_v2, 0  ;;  %v6238_v42 = vld [vmem:[%s8491_s1 + $0x10] sm:$0x7] }
  0x17   : > { %5128 = vmatpush3.bf16.msra.mxu0 %v1084_v1  ;;  %s219_s9 = scalar_select %p218_p10, %s6122_s22, 1  ;;  %8580 = vst [vmem:[#allocation10_spill] sm:$0xff] %v6238_v42  ;;  %vm351_vm3 = vcmask 1046528   ;;  %vm2584_vm4 = vcmask 523264   ;;  %vm2593_vm5 = vcmask 516096   ;;  %vm2587_vm6 = vcmask 517120  }
  0x18   : > { %5664 = vmatprep.subr.msk.bf16.mxu0 %vm529_vm0, %v281_v2  ;;  %s6067_s16 = smov 64   ;;  %vm4343_vm7 = vcmask 261120   ;;  %s4661_s12 = sshll.u32 %s6122_s22, 12 }
  0x19   : > { %s5670_s10 = smul.u32 432, %s219_s9  ;;  %s215_s9 = sand.u32 1, %s6056_s19  }
  0x1a   : > { %s8449_s22 = scalar_lea.sflag [#allocation4], %s215_s9  ;;  %s6068_s23 = smov [#allocation3]  }
  0x1b   : > { %s6163_s13 = scalar_lea.vmem %s8490_s0, %s5670_s10  ;;  %s4456_s10 = sshll.u32 %s215_s9, 8 }
  0x1c   : > { %v6166_v3 = vld [vmem:[%s6163_s13] sm:$0xff]  ;;  %v6169_v4 = vld [vmem:[%s6163_s13 + $0x8] sm:$0xff]  ;;  %v6172_v5 = vld [vmem:[%s6163_s13 + $0x10] sm:$0x3]  ;;  %s8344_s11 = scalar_lea.vmem [#allocation3], %s4456_s10  ;;  %s6006_s25 = sshll.u32 %s6068_s23, 4  ;;  %s6007_s25 = int_to_ptr.vmem [resolvable:$false] %s6006_s25 }
  0x1d   : > { %8576 = vst [vmem:[#allocation6_spill] sm:$0xff] %v6166_v3  ;;  %8577 = vst [vmem:[#allocation7_spill] sm:$0xff] %v6169_v4  ;;  %v907_v6 = vrot.slane %v6166_v3, 2  ;;  %v908_v7 = vrot.slane %v6169_v4, 2  ;;  %v910_v8 = vrot.slane %v6172_v5, 2  ;;  %v6178_v9 = vld [vmem:[%s6163_s13 + $0x18] sm:$0xff] }
  0x1e   : > { %8578 = vst [vmem:[#allocation8_spill] sm:$0xff] %v6172_v5  ;;  %v6181_v10 = vld [vmem:[%s6163_s13 + $0x20] sm:$0xff]  ;;  %v6184_v11 = vld [vmem:[%s6163_s13 + $0x30] sm:$0xff]  ;;  %v6187_v12 = vld [vmem:[%s6163_s13 + $0x28] sm:$0x3]  ;;  %v912_v13 = vrot.slane %v6178_v9, 2 }
  0x1f   : > { %v913_v14 = vrot.slane %v6181_v10, 2  ;;  %v6192_v15 = vld [vmem:[%s6163_s13 + $0x38] sm:$0xff]  ;;  %v909_v16 = vsel %vm906_vm1, %v907_v6, %v908_v7  ;;  %v911_v17 = vsel %vm906_vm1, %v908_v7, %v910_v8  ;;  %v915_v18 = vrot.slane %v6187_v12, 2  ;;  %v6198_v19 = vld [vmem:[%s6163_s13 + $0x40] sm:$0x3]  ;;  %v6201_v20 = vld [vmem:[%s6163_s13 + $0x48] sm:$0xff] }
  0x20   : > { %v6204_v21 = vld [vmem:[%s6163_s13 + $0x50] sm:$0xff]  ;;  %v1019_v22 = vpack.c.bf16 %v911_v17, %v909_v16  ;;  %v917_v25 = vrot.slane %v6184_v11, 2  ;;  %v6210_v26 = vld [vmem:[%s6163_s13 + $0x58] sm:$0x3]  ;;  %v6213_v27 = vld [vmem:[%s6163_s13 + $0x60] sm:$0xff]  ;;  %v918_v30 = vrot.slane %v6192_v15, 2 }
  0x21   : > { %v914_v23 = vsel %vm906_vm1, %v912_v13, %v913_v14  ;;  %v6216_v28 = vld [vmem:[%s6163_s13 + $0x68] sm:$0xff]  ;;  %v916_v29 = vsel %vm906_vm1, %v913_v14, %v915_v18  ;;  %v920_v31 = vrot.slane %v6198_v19, 2  ;;  %v922_v32 = vrot.slane %v6201_v20, 2  ;;  %v6223_v33 = vld [vmem:[%s6163_s13 + $0x70] sm:$0x3]  ;;  %v6247_v46 = vld [vmem:[%s6163_s13 + $0x78] sm:$0xff] }
  0x22   : > { %5129 = vmatprep.mubr.msk.bf16.mxu0 %vm480_vm2, %v1019_v22  ;;  %v6226_v34 = vpack.c.bf16 %v916_v29, %v914_v23  ;;  %v923_v35 = vrot.slane %v6204_v21, 2  ;;  %v925_v36 = vrot.slane %v6210_v26, 2  ;;  %v927_v37 = vrot.slane %v6213_v27, 2  ;;  %v6250_v47 = vld [vmem:[%s6163_s13 + $0x80] sm:$0xff]  ;;  %v6253_v48 = vld [vmem:[%s6163_s13 + $0x88] sm:$0x3] }
  0x23   : > { %v919_v38 = vsel %vm906_vm1, %v917_v25, %v918_v30  ;;  %v921_v39 = vsel %vm906_vm1, %v918_v30, %v920_v31  ;;  %v928_v40 = vrot.slane %v6216_v28, 2  ;;  %v930_v41 = vrot.slane %v6223_v33, 2  ;;  %v6261_v52 = vld [vmem:[%s6163_s13 + $0x90] sm:$0xff]  ;;  %v6264_v53 = vld [vmem:[%s6163_s13 + $0x98] sm:$0xff]  ;;  %v6271_v56 = vld [vmem:[%s6163_s13 + $0xa0] sm:$0x3] }
  0x24   : > { %8579 = vst [vmem:[#allocation9_spill] sm:$0xff] %v6226_v34  ;;  %5130 = vmatmul.mubr.msk.bf16.vlgmr.msra.gmra.mrb[0].mxu0 %vm480_vm2, %v6226_v34  ;;  %v6242_v43 = vpack.c.bf16 %v921_v39, %v919_v38  ;;  %v924_v44 = vsel %vm906_vm1, %v922_v32, %v923_v35  ;;  %v926_v45 = vsel %vm906_vm1, %v923_v35, %v925_v36  ;;  %v6274_v57 = vld [vmem:[%s6163_s13 + $0xa8] sm:$0xff]  ;;  %v6277_v58 = vld [vmem:[%s6163_s13 + $0xb0] sm:$0xff]  ;;  %v932_v60 = vrot.slane %v6247_v46, 2  ;;  %v6285_v63 = vld [vmem:[%s6163_s13 + $0xb8] sm:$0x3] }
  0x25   : > { %5162 = vmatpush3.bf16.msra.mxu0 %v1284_v24  ;;  %v929_v50 = vsel %vm906_vm1, %v927_v37, %v928_v40  ;;  %v931_v51 = vsel %vm906_vm1, %v928_v40, %v930_v41  ;;  %v6279_v59 = vpack.c.bf16 %v926_v45, %v924_v44  ;;  %v933_v61 = vrot.slane %v6250_v47, 2  ;;  %v6292_v6 = vld [vmem:[%s6163_s13 + $0xc0] sm:$0xff]  ;;  %v6295_v7 = vld [vmem:[%s6163_s13 + $0xc8] sm:$0xff]  ;;  %v6298_v8 = vld [vmem:[%s6163_s13 + $0xd0] sm:$0x3]  ;;  %s6008_s26 = scalar_lea.vmem %s6007_s25, 8192 }
  0x26   : > { %8581 = vst [vmem:[#allocation11_spill] sm:$0xff] %v6242_v43  ;;  %5133 = vmatprep.mubr.msk.bf16.mxu0 %vm480_vm2, %v6242_v43  ;;  %5665 = vmatprep.subr.msk.bf16.mxu0 %vm529_vm0, %v6238_v42  ;;  %v935_v62 = vrot.slane %v6253_v48, 2  ;;  %v6287_v0 = vpack.c.bf16 %v931_v51, %v929_v50  ;;  %v937_v1 = vrot.slane %v6261_v52, 2  ;;  %v938_v2 = vrot.slane %v6264_v53, 2  ;;  %v6304_v17 = vld [vmem:[%s6163_s13 + $0xd8] sm:$0xff]  ;;  %v6307_v18 = vld [vmem:[%s6163_s13 + $0xe0] sm:$0xff] }
  0x27   : > { %8582 = vst [vmem:[#allocation12_spill] sm:$0xff] %v6279_v59  ;;  %v940_v13 = vrot.slane %v6271_v56, 2  ;;  %v942_v14 = vrot.slane %v6274_v57, 2  ;;  %v943_v16 = vrot.slane %v6277_v58, 2  ;;  %v6310_v22 = vld [vmem:[%s6163_s13 + $0xf0] sm:$0xff]  ;;  %v945_v23 = vrot.slane %v6285_v63, 2 }
  0x28   : > { %8583 = vst [vmem:[#allocation13_spill] sm:$0xff] %v6287_v0  ;;  %v6314_v24 = vld [vmem:[%s6163_s13 + $0xe8] sm:$0x3]  ;;  %v6317_v25 = vld [vmem:[%s6163_s13 + $0xf8] sm:$0xff]  ;;  %v6320_v29 = vld [vmem:[%s6163_s13 + $0x100] sm:$0x3]  ;;  %v934_v30 = vsel %vm906_vm1, %v932_v60, %v933_v61  ;;  %v936_v31 = vsel %vm906_vm1, %v933_v61, %v935_v62  ;;  %v939_v50 = vsel %vm906_vm1, %v937_v1, %v938_v2 }
  0x29   : > { %v947_v32 = vrot.slane %v6292_v6, 2  ;;  %v948_v35 = vrot.slane %v6295_v7, 2  ;;  %v6329_v36 = vld [vmem:[%s6163_s13 + $0x108] sm:$0xff]  ;;  %v6332_v37 = vld [vmem:[%s6163_s13 + $0x110] sm:$0xff]  ;;  %v6335_v38 = vld [vmem:[%s6163_s13 + $0x118] sm:$0x3]  ;;  %v941_v51 = vsel %vm906_vm1, %v938_v2, %v940_v13  ;;  %v6360_v49 = vpack.c.bf16 %v936_v31, %v934_v30 }
  0x2a   : > { %8584 = vst [vmem:[#allocation14_spill] sm:$0xff] %v6329_v36  ;;  %8585 = vst [vmem:[#allocation15_spill] sm:$0xff] %v6332_v37  ;;  %v950_v39 = vrot.slane %v6298_v8, 2  ;;  %v952_v40 = vrot.slane %v6304_v17, 2  ;;  %v6342_v41 = vld [vmem:[%s6163_s13 + $0x120] sm:$0xff]  ;;  %v6345_v44 = vld [vmem:[%s6163_s13 + $0x128] sm:$0xff]  ;;  %v6373_v34 = vpack.c.bf16 %v941_v51, %v939_v50  ;;  %v944_v3 = vsel %vm906_vm1, %v942_v14, %v943_v16 }
  0x2b   : > { %8586 = vst [vmem:[#allocation16_spill] sm:$0xff] %v6335_v38  ;;  %v6348_v45 = vld [vmem:[%s6163_s13 + $0x130] sm:$0x3]  ;;  %v953_v60 = vrot.slane %v6307_v18, 2  ;;  %v955_v61 = vrot.slane %v6314_v24, 2  ;;  %v6355_v62 = vld [vmem:[%s6163_s13 + $0x138] sm:$0xff]  ;;  %v946_v42 = vsel %vm906_vm1, %v943_v16, %v945_v23  ;;  %v949_v50 = vsel %vm906_vm1, %v947_v32, %v948_v35 }
  0x2c   : > { %5134 = vmatmul.mubr.msk.bf16.gmra.mrb[4].mxu0 %vm480_vm2, %v6279_v59  ;;  %8587 = vst [vmem:[#allocation17_spill] sm:$0xff] %v6348_v45  ;;  %v6358_v55 = vld [vmem:[%s6163_s13 + $0x140] sm:$0xff]  ;;  %8588 = vst [vmem:[#allocation18_spill] sm:$0xff] %v6360_v49  ;;  %v957_v54 = vrot.slane %v6310_v22, 2  ;;  %v6367_v59 = vld [vmem:[%s6163_s13 + $0x150] sm:$0xff]  ;;  %v958_v1 = vrot.slane %v6317_v25, 2  ;;  %v951_v51 = vsel %vm906_vm1, %v948_v35, %v950_v39  ;;  %v6402_v32 = vpack.c.bf16 %v6216_v28, %v6213_v27 }
  0x2d   : > { %5137 = vmatprep.mubr.msk.bf16.mxu0 %vm480_vm2, %v6287_v0  ;;  %v6364_v0 = vld [vmem:[%s6163_s13 + $0x148] sm:$0x3]  ;;  %v960_v2 = vrot.slane %v6320_v29, 2  ;;  %v962_v13 = vrot.slane %v6329_v36, 2  ;;  %v963_v43 = vrot.slane %v6332_v37, 2  ;;  %8589 = vst [vmem:[#allocation19_spill] sm:$0xff] %v6373_v34  ;;  %v954_v14 = vsel %vm906_vm1, %v952_v40, %v953_v60 }
  0x2e   : > { %v965_v30 = vrot.slane %v6335_v38, 2  ;;  %v967_v31 = vrot.slane %v6342_v41, 2  ;;  %v968_v5 = vrot.slane %v6345_v44, 2  ;;  %v970_v4 = vrot.slane %v6348_v45, 2  ;;  %v6394_v23 = vld [vmem:[%s6163_s13 + $0x158] sm:$0xff] }
  0x2f   : > { %v972_v36 = vrot.slane %v6355_v62, 2  ;;  %v956_v16 = vsel %vm906_vm1, %v953_v60, %v955_v61  ;;  %v6398_v37 = vpack.c.bf16 %v6192_v15, %v6184_v11  ;;  %v959_v35 = vsel %vm906_vm1, %v957_v54, %v958_v1  ;;  %v6411_v38 = vld [vmem:[%s6163_s13 + $0x160] sm:$0x3] }
  0x30   : > { %v961_v39 = vsel %vm906_vm1, %v958_v1, %v960_v2  ;;  %v964_v45 = vsel %vm906_vm1, %v962_v13, %v963_v43  ;;  %v966_v40 = vsel %vm906_vm1, %v963_v43, %v965_v30  ;;  %v969_v60 = vsel %vm906_vm1, %v967_v31, %v968_v5 }
  0x31   : > { %v971_v61 = vsel %vm906_vm1, %v968_v5, %v970_v4  ;;  %v6421_v54 = vpack.c.bf16 %v946_v42, %v944_v3  ;;  %v6425_v1 = vpack.c.bf16 %v6317_v25, %v6310_v22  ;;  %v6429_v43 = vpack.c.bf16 %v6345_v44, %v6342_v41 }
  0x32   : > { %v6431_v4 = vpack.c.bf16 %v951_v51, %v949_v50  ;;  %v6433_v5 = vpack.c.bf16 %v956_v16, %v954_v14  ;;  %v6435_v2 = vpack.c.bf16 %v961_v39, %v959_v35  ;;  %v6439_v13 = vpack.c.bf16 %v6394_v23, %v6367_v59 }
  0x33   : > { %v6441_v3 = vpack.c.bf16 %v966_v40, %v964_v45  ;;  %v6443_v42 = vpack.c.bf16 %v971_v61, %v969_v60  ;;  %v8591_v30 = vrot.slane %v6358_v55, 2  ;;  %v357_v51 = vrot.slane %v6178_v9, 1 }
  0x34   : > { %5138 = vmatmul.mubr.msk.bf16.gmra.mrb[8].mxu0 %vm480_vm2, %v6360_v49  ;;  %v6419_v49 = vpack.c.bf16 %v6295_v7, %v6292_v6  ;;  %8590 = vst [vmem:[#allocation20_spill] sm:$0xff] %v6431_v4  ;;  %v358_v14 = vrot.slane %v6181_v10, 1  ;;  %v360_v16 = vrot.slane %v6187_v12, 1  ;;  %v8592_v35 = vrot.slane %v6192_v15, 1 }
  0x35   : > { %5141 = vmatprep.mubr.msk.bf16.mxu0 %vm480_vm2, %v6373_v34  ;;  %v6415_v34 = vpack.c.bf16 %v6264_v53, %v6261_v52  ;;  %v6448_v31 = vsel %vm906_vm1, %v972_v36, %v8591_v30  ;;  %v8593_v45 = vrot.slane %v6184_v11, 1  ;;  %v8594_v40 = vrot.slane %v6198_v19, 1 }
  0x36   : > { %v8595_v60 = vmov %v8592_v35  ;;  %v367_v30 = vrot.slane %v6201_v20, 1  ;;  %v368_v12 = vrot.slane %v6204_v21, 1  ;;  %v359_v11 = vsel %vm351_vm3, %v357_v51, %v358_v14 }
  0x37   : > { %v364_v39 = vsel %vm351_vm3, %v8593_v45, %v8592_v35  ;;  %v366_v61 = vsel %vm351_vm3, %v8595_v60, %v8594_v40  ;;  %v361_v35 = vsel %vm351_vm3, %v358_v14, %v360_v16  ;;  %v370_v36 = vrot.slane %v6210_v26, 1 }
  0x38   : > { %v6473_v45 = vpack.c.bf16 %v366_v61, %v364_v39  ;;  %v6476_v19 = vpack.c.bf16 %v361_v35, %v359_v11  ;;  %v369_v15 = vsel %vm351_vm3, %v367_v30, %v368_v12  ;;  %v372_v40 = vrot.slane %v6213_v27, 1 }
  0x39   : > { %v373_v60 = vrot.slane %v6216_v28, 1  ;;  %v371_v50 = vsel %vm351_vm3, %v368_v12, %v370_v36  ;;  %v377_v51 = vrot.slane %v6247_v46, 1  ;;  %v378_v14 = vrot.slane %v6250_v47, 1 }
  0x3a   : > { %v6485_v16 = vpack.c.bf16 %v371_v50, %v369_v15  ;;  %v380_v39 = vrot.slane %v6253_v48, 1  ;;  %v382_v61 = vrot.slane %v6261_v52, 1  ;;  %v383_v36 = vrot.slane %v6264_v53, 1 }
  0x3b   : > { %v374_v26 = vsel %vm351_vm3, %v372_v40, %v373_v60  ;;  %v379_v28 = vsel %vm351_vm3, %v377_v51, %v378_v14  ;;  %v387_v50 = vrot.slane %v6274_v57, 1  ;;  %v388_v11 = vrot.slane %v6277_v58, 1 }
  0x3c   : > { %5142 = vmatmul.mubr.msk.bf16.gmra.mrb[12].mxu0 %vm480_vm2, %v6421_v54  ;;  %v381_v12 = vsel %vm351_vm3, %v378_v14, %v380_v39  ;;  %v384_v48 = vsel %vm351_vm3, %v382_v61, %v383_v36  ;;  %v392_v15 = vrot.slane %v6292_v6, 1  ;;  %v393_v40 = vrot.slane %v6295_v7, 1 }
  0x3d   : > { %5145 = vmatprep.mubr.msk.bf16.mxu0 %vm480_vm2, %v6431_v4  ;;  %v375_v4 = vrot.slane %v6223_v33, 1  ;;  %v385_v33 = vrot.slane %v6271_v56, 1  ;;  %v6499_v35 = vpack.c.bf16 %v381_v12, %v379_v28  ;;  %v389_v56 = vsel %vm351_vm3, %v387_v50, %v388_v11  ;;  %v8596_v12 = vld [vmem:[#allocation14_spill] sm:$0xff] }
  0x3e   : > { %v395_v51 = vrot.slane %v6298_v8, 1  ;;  %v398_v14 = vrot.slane %v6307_v18, 1  ;;  %v394_v39 = vsel %vm351_vm3, %v392_v15, %v393_v40  ;;  %v400_v61 = vrot.slane %v6314_v24, 1 }
  0x3f   : > { %v376_v27 = vsel %vm351_vm3, %v373_v60, %v375_v4  ;;  %v386_v52 = vsel %vm351_vm3, %v383_v36, %v385_v33  ;;  %v390_v4 = vrot.slane %v6285_v63, 1  ;;  %v397_v63 = vrot.slane %v6304_v17, 1 }
  0x40   : > { %v6494_v30 = vpack.c.bf16 %v376_v27, %v374_v26  ;;  %v6506_v53 = vpack.c.bf16 %v386_v52, %v384_v48  ;;  %v402_v6 = vrot.slane %v6310_v22, 1  ;;  %v396_v7 = vsel %vm351_vm3, %v393_v40, %v395_v51 }
  0x41   : > { %v391_v60 = vsel %vm351_vm3, %v388_v11, %v390_v4  ;;  %v399_v27 = vsel %vm351_vm3, %v397_v63, %v398_v14  ;;  %v403_v28 = vrot.slane %v6317_v25, 1  ;;  %v405_v8 = vrot.slane %v6320_v29, 1  ;;  %v8597_v11 = vld [vmem:[#allocation15_spill] sm:$0xff]  ;;  %v8598_v4 = vld [vmem:[#allocation16_spill] sm:$0xff] }
  0x42   : > { %v6517_v26 = vpack.c.bf16 %v391_v60, %v389_v56  ;;  %v6526_v36 = vpack.c.bf16 %v396_v7, %v394_v39  ;;  %v401_v33 = vsel %vm351_vm3, %v398_v14, %v400_v61  ;;  %v407_v50 = vrot.slane %v8596_v12, 1  ;;  %v8603_v7 = vld [vmem:[#allocation17_spill] sm:$0xff] }
  0x43   : > { %v408_v48 = vrot.slane %v8597_v11, 1  ;;  %v6531_v52 = vpack.c.bf16 %v401_v33, %v399_v27  ;;  %v404_v22 = vsel %vm351_vm3, %v402_v6, %v403_v28  ;;  %v406_v24 = vsel %vm351_vm3, %v403_v28, %v405_v8  ;;  %v269_v33 = vld [vmem:[%s6163_s13 + $0x168] sm:$0xff] }
  0x44   : > { %5146 = vmatmul.mubr.msk.bf16.gmra.mrb[16].mxu0 %vm480_vm2, %v6433_v5  ;;  %v410_v56 = vrot.slane %v8598_v4, 1  ;;  %v6536_v25 = vpack.c.bf16 %v406_v24, %v404_v22  ;;  %v412_v15 = vrot.slane %v6342_v41, 1  ;;  %v413_v40 = vrot.slane %v6345_v44, 1 }
  0x45   : > { %5149 = vmatprep.mubr.msk.bf16.mxu0 %vm480_vm2, %v6435_v2  ;;  %v409_v29 = vsel %vm351_vm3, %v407_v50, %v408_v48  ;;  %v8599_v60 = vrot.slane %v6364_v0, 2  ;;  %v8600_v51 = vrot.slane %v6358_v55, 2  ;;  %v8601_v14 = vrot.slane %v6394_v23, 2 }
  0x46   : > { %v8602_v39 = vrot.slane %v6367_v59, 2  ;;  %v411_v6 = vsel %vm351_vm3, %v408_v48, %v410_v56  ;;  %v415_v41 = vrot.slane %v8603_v7, 1  ;;  %v414_v27 = vsel %vm351_vm3, %v412_v15, %v413_v40  ;;  %v270_v15 = vld [vmem:[%s6163_s13 + $0x170] sm:$0xff] }
  0x47   : > { %v976_v63 = vsel %vm906_vm1, %v8600_v51, %v8599_v60  ;;  %v6555_v44 = vpack.c.bf16 %v411_v6, %v409_v29  ;;  %v417_v28 = vrot.slane %v6355_v62, 1  ;;  %v418_v8 = vrot.slane %v6358_v55, 1  ;;  %v271_v60 = vld [vmem:[%s6163_s13 + $0x178] sm:$0x3] }
  0x48   : > { %v979_v61 = vsel %vm906_vm1, %v8602_v39, %v8601_v14  ;;  %v416_v50 = vsel %vm351_vm3, %v413_v40, %v415_v41  ;;  %v420_v48 = vrot.slane %v6364_v0, 1  ;;  %v422_v22 = vrot.slane %v6367_v59, 1 }
  0x49   : > { %v423_v24 = vrot.slane %v6394_v23, 1  ;;  %v8604_v4 = vrot.slane %v6411_v38, 2  ;;  %v8605_v56 = vmov %v8601_v14  ;;  %v6574_v51 = vpack.c.bf16 %v416_v50, %v414_v27 }
  0x4a   : > { %v419_v14 = vsel %vm351_vm3, %v417_v28, %v418_v8  ;;  %v425_v40 = vrot.slane %v6411_v38, 1  ;;  %v421_v0 = vsel %vm351_vm3, %v418_v8, %v420_v48  ;;  %v6581_v39 = vpack.c.bf16 %v976_v63, %v6448_v31 }
  0x4b   : > { %v981_v29 = vsel %vm906_vm1, %v8605_v56, %v8604_v4  ;;  %v424_v59 = vsel %vm351_vm3, %v422_v22, %v423_v24  ;;  %v982_v6 = vrot.slane %v269_v33, 2  ;;  %v6583_v7 = vpack.c.bf16 %v421_v0, %v419_v14  ;;  %v8607_v0 = vld [vmem:[#allocation6_spill] sm:$0xff] }
  0x4c   : > { %5150 = vmatmul.mubr.msk.bf16.gmra.mrb[20].mxu0 %vm480_vm2, %v6441_v3  ;;  %v426_v23 = vsel %vm351_vm3, %v423_v24, %v425_v40  ;;  %v6586_v41 = vpack.c.bf16 %v981_v29, %v979_v61  ;;  %v983_v27 = vrot.slane %v270_v15, 2  ;;  %v985_v50 = vrot.slane %v271_v60, 2  ;;  %v283_v40 = vld [vmem:[%s8491_s1 + $0x14] sm:$0x7] }
  0x4d   : > { %5153 = vmatprep.mubr.msk.bf16.mxu0 %vm480_vm2, %v6443_v42  ;;  %v6588_v4 = vpack.c.bf16 %v426_v23, %v424_v59  ;;  %v427_v38 = vrot.slane %v269_v33, 1  ;;  %v428_v28 = vrot.slane %v270_v15, 1  ;;  %v430_v8 = vrot.slane %v271_v60, 1  ;;  %v8606_v60 = vld [vmem:[#allocation10_spill] sm:$0xff] }
  0x4e   : > { %v984_v31 = vsel %vm906_vm1, %v982_v6, %v983_v27  ;;  %v986_v63 = vsel %vm906_vm1, %v983_v27, %v985_v50  ;;  %v6604_v56 = vpack.c.bf16 %v6181_v10, %v6178_v9  ;;  %v6612_v29 = vpack.c.bf16 %v6204_v21, %v6201_v20  ;;  %v8608_v6 = vld [vmem:[#allocation7_spill] sm:$0xff]  ;;  %v8609_v27 = vld [vmem:[#allocation8_spill] sm:$0xff] }
  0x4f   : > { %v429_v61 = vsel %vm351_vm3, %v427_v38, %v428_v28  ;;  %v431_v48 = vsel %vm351_vm3, %v428_v28, %v430_v8  ;;  %v6600_v24 = vpack.c.bf16 %v986_v63, %v984_v31  ;;  %v1494_v14 = vsel %vm529_vm0, %v8606_v60, 0  ;;  %v279_v38 = vld [vmem:[%s8491_s1 + $0x4] sm:$0x7] }
  0x50   : > { %v6598_v22 = vpack.c.bf16 %v431_v48, %v429_v61  ;;  %v6626_v9 = vpack.c.bf16 %v6250_v47, %v6247_v46  ;;  %v6634_v10 = vpack.c.bf16 %v6277_v58, %v6274_v57  ;;  %v6642_v20 = vpack.c.bf16 %v6307_v18, %v6304_v17  ;;  %v6665_v47 = vld [vmem:[%s6163_s13 + $0x180] sm:$0xff]  ;;  %v6668_v57 = vld [vmem:[%s6163_s13 + $0x188] sm:$0xff]  ;;  %5661 = vmatprep.subr.msk.bf16.mxu1 %vm529_vm0, %v279_v38  ;;  %v284_v48 = vld [vmem:[%s8491_s1 + $0x18] sm:$0x7] }
  0x51   : > { %v6650_v21 = vpack.c.bf16 %v8597_v11, %v8596_v12  ;;  %v6658_v46 = vpack.c.bf16 %v6358_v55, %v6355_v62  ;;  %v6670_v58 = vpack.c.bf16 %v270_v15, %v269_v33  ;;  %v1689_v17 = vrot.slane %v6665_v47, 2  ;;  %v274_v55 = vld [vmem:[%s6163_s13 + $0x190] sm:$0x3] }
  0x52   : > { %v1690_v18 = vrot.slane %v6668_v57, 2  ;;  %v1692_v12 = vrot.slane %v274_v55, 2  ;;  %v6683_v33 = vpack.c.bf16 %v6668_v57, %v6665_v47  ;;  %v352_v59 = vrot.slane %v8607_v0, 1 }
  0x53   : > { %v353_v23 = vrot.slane %v8608_v6, 1  ;;  %v355_v50 = vrot.slane %v8609_v27, 1  ;;  %v531_v28 = vsel %vm529_vm0, %v279_v38, 0  ;;  %v1701_v61 = vsel %vm529_vm0, %v283_v40, 0  ;;  %v8616_v27 = vld [vmem:[#allocation20_spill] sm:$0xff] }
  0x54   : > { %5154 = vmatmul.mubr.msk.bf16.gmra.mrb[24].mxu0 %vm480_vm2, %v6581_v39  ;;  %v1691_v62 = vsel %vm906_vm1, %v1689_v17, %v1690_v18  ;;  %v1693_v11 = vsel %vm906_vm1, %v1690_v18, %v1692_v12  ;;  %5060 = vmatpush3.bf16.msra.mxu1 %v531_v28  ;;  %v1483_v60 = vrot.slane %v6668_v57, 1  ;;  %v278_v57 = vld [vmem:[%s8491_s1] sm:$0x7]  ;;  %v8610_v18 = vld [vmem:[#allocation9_spill] sm:$0xff]  ;;  %v1901_v12 = vsel %vm529_vm0, %v284_v48, 0 }
  0x55   : > { %5157 = vmatprep.mubr.msk.bf16.mxu0 %vm480_vm2, %v6586_v41  ;;  %v6685_v15 = vpack.c.bf16 %v1693_v11, %v1691_v62  ;;  %v354_v8 = vsel %vm351_vm3, %v352_v59, %v353_v23  ;;  %v356_v31 = vsel %vm351_vm3, %v353_v23, %v355_v50  ;;  %5662 = vmatprep.subr.msk.bf16.mxu1 %vm529_vm0, %v278_v57  ;;  %v285_v11 = vld [vmem:[%s8491_s1 + $0x1c] sm:$0x7]  ;;  %v286_v38 = vld [vmem:[%s8491_s1 + $0x20] sm:$0x7] }
  0x56   : > { %v464_v63 = vpack.c.bf16 %v356_v31, %v354_v8  ;;  %v287_v62 = vpack.c.bf16 %v8608_v6, %v8607_v0  ;;  %v8611_v59 = vld [vmem:[#allocation11_spill] sm:$0xff]  ;;  %v8612_v0 = vld [vmem:[#allocation12_spill] sm:$0xff]  ;;  %v8614_v6 = vld [vmem:[#allocation18_spill] sm:$0xff]  ;;  %v2111_v50 = vsel %vm529_vm0, %v285_v11, 0 }
  0x57   : > { %v8615_v23 = vld [vmem:[#allocation19_spill] sm:$0xff] }
  0x58   : > { %5061 = vmatprep.mubr.msk.bf16.mxu1 %vm480_vm2, %v464_v63 }
  0x59   : > { %5062 = vmatmul.mubr.msk.bf16.vlgmr.msra.gmra.mrb[0].mxu1 %vm480_vm2, %v6476_v19 }
  0x5a   : > { %5065 = vmatprep.mubr.msk.bf16.mxu1 %vm480_vm2, %v6473_v45 }
  0x5c   : > { %5158 = vmatmul.mubr.msk.bf16.gmra.mrb[28].mxu0 %vm480_vm2, %v6600_v24 }
  0x5d   : > { %5163 = vmatprep.mubr.msk.bf16.mxu0 %vm480_vm2, %v6604_v56 }
  0x61   : > { %5066 = vmatmul.mubr.msk.bf16.gmra.mrb[4].mxu1 %vm480_vm2, %v6485_v16 }
  0x62   : > { %5069 = vmatprep.mubr.msk.bf16.mxu1 %vm480_vm2, %v6494_v30 }
  0x64   : > { %5164 = vmatmul.mubr.msk.bf16.vlgmr.msra.gmra.mrb[0].mxu0 %vm480_vm2, %v6398_v37 }
  0x65   : > { %5196 = vmatpush3.bf16.msra.mxu0 %v1494_v14  ;;  %5167 = vmatprep.mubr.msk.bf16.mxu0 %vm480_vm2, %v6612_v29  ;;  %v1485_v14 = vrot.slane %v274_v55, 1  ;;  %v743_v55 = vsel %vm529_vm0, %v278_v57, 0  ;;  %v5964_v57 = vld [vmem:[%s8493_s3 + $0x40] sm:$0xff]  }
  0x66   : > { %5666 = vmatprep.subr.msk.bf16.mxu0 %vm529_vm0, %v283_v40  ;;  %5094 = vmatpush3.bf16.msra.mxu1 %v743_v55  ;;  %v5966_v55 = vld [vmem:[%s8493_s3 + $0x48] sm:$0xff]  }
  0x67   : > { %v1486_v17 = vsel %vm351_vm3, %v1483_v60, %v1485_v14  ;;  %4815 = vmatprep.subr.bf16.mxu1 %v5964_v57 }
  0x69   : > { %5070 = vmatmul.mubr.msk.bf16.gmra.mrb[8].mxu1 %vm480_vm2, %v6499_v35 }
  0x6a   : > { %5073 = vmatprep.mubr.msk.bf16.mxu1 %vm480_vm2, %v6506_v53 }
  0x6c   : > { %5168 = vmatmul.mubr.msk.bf16.gmra.mrb[4].mxu0 %vm480_vm2, %v6402_v32 }
  0x6d   : > { %5171 = vmatprep.mubr.msk.bf16.mxu0 %vm480_vm2, %v6626_v9 }
  0x71   : > { %5074 = vmatmul.mubr.msk.bf16.gmra.mrb[12].mxu1 %vm480_vm2, %v6517_v26 }
  0x72   : > { %5077 = vmatprep.mubr.msk.bf16.mxu1 %vm480_vm2, %v6526_v36 }
  0x74   : > { %5172 = vmatmul.mubr.msk.bf16.gmra.mrb[8].mxu0 %vm480_vm2, %v6415_v34 }
  0x75   : > { %5175 = vmatprep.mubr.msk.bf16.mxu0 %vm480_vm2, %v6634_v10 }
  0x79   : > { %5078 = vmatmul.mubr.msk.bf16.gmra.mrb[16].mxu1 %vm480_vm2, %v6531_v52 }
  0x7a   : > { %5081 = vmatprep.mubr.msk.bf16.mxu1 %vm480_vm2, %v6536_v25 }
  0x7c   : > { %5176 = vmatmul.mubr.msk.bf16.gmra.mrb[12].mxu0 %vm480_vm2, %v6419_v49 }
  0x7d   : > { %5179 = vmatprep.mubr.msk.bf16.mxu0 %vm480_vm2, %v6642_v20 }
  0x81   : > { %5082 = vmatmul.mubr.msk.bf16.gmra.mrb[20].mxu1 %vm480_vm2, %v6555_v44 }
  0x82   : > { %5085 = vmatprep.mubr.msk.bf16.mxu1 %vm480_vm2, %v6574_v51 }
  0x84   : > { %5180 = vmatmul.mubr.msk.bf16.gmra.mrb[16].mxu0 %vm480_vm2, %v6425_v1 }
  0x85   : > { %5183 = vmatprep.mubr.msk.bf16.mxu0 %vm480_vm2, %v6650_v21 }
  0x89   : > { %5086 = vmatmul.mubr.msk.bf16.gmra.mrb[24].mxu1 %vm480_vm2, %v6583_v7 }
  0x8a   : > { %5089 = vmatprep.mubr.msk.bf16.mxu1 %vm480_vm2, %v6588_v4 }
  0x8c   : > { %5184 = vmatmul.mubr.msk.bf16.gmra.mrb[20].mxu0 %vm480_vm2, %v6429_v43 }
  0x8d   : > { %5187 = vmatprep.mubr.msk.bf16.mxu0 %vm480_vm2, %v6658_v46 }
  0x91   : > { %5090 = vmatmul.mubr.msk.bf16.gmra.mrb[28].mxu1 %vm480_vm2, %v6598_v22 }
  0x92   : > { %5095 = vmatprep.mubr.msk.bf16.mxu1 %vm480_vm2, %v287_v62  ;;  %v5967_v62 = vld [vmem:[%s8493_s3 + $0x8] sm:$0xff]  }
  0x94   : > { %5188 = vmatmul.mubr.msk.bf16.gmra.mrb[24].mxu0 %vm480_vm2, %v6439_v13 }
  0x95   : > { %5191 = vmatprep.mubr.msk.bf16.mxu0 %vm480_vm2, %v6670_v58 }
  0x99   : > { %5096 = vmatmul.mubr.msk.bf16.vlgmr.msra.gmra.mrb[0].mxu1 %vm480_vm2, %v6604_v56  ;;  %v8613_v56 = vld [vmem:[#allocation13_spill] sm:$0xff] }
  0x9a   : > { %5099 = vmatprep.mubr.msk.bf16.mxu1 %vm480_vm2, %v6398_v37 }
  0x9c   : > { %5192 = vmatmul.mubr.msk.bf16.gmra.mrb[28].mxu0 %vm480_vm2, %v6683_v33 }
  0x9d   : > { %5197 = vmatprep.mubr.msk.bf16.mxu0 %vm480_vm2, %v6476_v19  ;;  %v1482_v19 = vrot.slane %v6665_v47, 1 }
  0x9f   : > { %v1484_v40 = vsel %vm351_vm3, %v1482_v19, %v1483_v60 }
  0xa0   : > { %v6767_v47 = vpack.c.bf16 %v1486_v17, %v1484_v40 }
  0xa1   : > { %5100 = vmatmul.mubr.msk.bf16.gmra.mrb[4].mxu1 %vm480_vm2, %v6612_v29 }
  0xa2   : > { %5103 = vmatprep.mubr.msk.bf16.mxu1 %vm480_vm2, %v6402_v32 }
  0xa4   : > { %5198 = vmatmul.mubr.msk.bf16.vlgmr.msra.gmra.mrb[0].mxu0 %vm480_vm2, %v6473_v45 }
  0xa5   : > { %5230 = vmatpush3.bf16.msra.mxu0 %v1701_v61  ;;  %5201 = vmatprep.mubr.msk.bf16.mxu0 %vm480_vm2, %v6485_v16 }
  0xa6   : > { %5667 = vmatprep.subr.msk.bf16.mxu0 %vm529_vm0, %v284_v48 }
  0xa9   : > { %5104 = vmatmul.mubr.msk.bf16.gmra.mrb[8].mxu1 %vm480_vm2, %v6626_v9 }
  0xaa   : > { %5107 = vmatprep.mubr.msk.bf16.mxu1 %vm480_vm2, %v6415_v34 }
  0xac   : > { %5202 = vmatmul.mubr.msk.bf16.gmra.mrb[4].mxu0 %vm480_vm2, %v6494_v30 }
  0xad   : > { %5205 = vmatprep.mubr.msk.bf16.mxu0 %vm480_vm2, %v6499_v35 }
  0xb1   : > { %5108 = vmatmul.mubr.msk.bf16.gmra.mrb[12].mxu1 %vm480_vm2, %v6634_v10 }
  0xb2   : > { %5111 = vmatprep.mubr.msk.bf16.mxu1 %vm480_vm2, %v6419_v49 }
  0xb4   : > { %5206 = vmatmul.mubr.msk.bf16.gmra.mrb[8].mxu0 %vm480_vm2, %v6506_v53 }
  0xb5   : > { %5209 = vmatprep.mubr.msk.bf16.mxu0 %vm480_vm2, %v6517_v26 }
  0xb9   : > { %5112 = vmatmul.mubr.msk.bf16.gmra.mrb[16].mxu1 %vm480_vm2, %v6642_v20 }
  0xba   : > { %5115 = vmatprep.mubr.msk.bf16.mxu1 %vm480_vm2, %v6425_v1 }
  0xbc   : > { %5210 = vmatmul.mubr.msk.bf16.gmra.mrb[12].mxu0 %vm480_vm2, %v6526_v36 }
  0xbd   : > { %5213 = vmatprep.mubr.msk.bf16.mxu0 %vm480_vm2, %v6531_v52 }
  0xc1   : > { %5116 = vmatmul.mubr.msk.bf16.gmra.mrb[20].mxu1 %vm480_vm2, %v6650_v21 }
  0xc2   : > { %5119 = vmatprep.mubr.msk.bf16.mxu1 %vm480_vm2, %v6429_v43 }
  0xc4   : > { %5214 = vmatmul.mubr.msk.bf16.gmra.mrb[16].mxu0 %vm480_vm2, %v6536_v25 }
  0xc5   : > { %5217 = vmatprep.mubr.msk.bf16.mxu0 %vm480_vm2, %v6555_v44 }
  0xc9   : > { %5120 = vmatmul.mubr.msk.bf16.gmra.mrb[24].mxu1 %vm480_vm2, %v6658_v46 }
  0xca   : > { %5123 = vmatprep.mubr.msk.bf16.mxu1 %vm480_vm2, %v6439_v13 }
  0xcc   : > { %5218 = vmatmul.mubr.msk.bf16.gmra.mrb[20].mxu0 %vm480_vm2, %v6574_v51 }
  0xcd   : > { %5221 = vmatprep.mubr.msk.bf16.mxu0 %vm480_vm2, %v6583_v7 }
  0xd1   : > { %5124 = vmatmul.mubr.msk.bf16.gmra.mrb[28].mxu1 %vm480_vm2, %v6670_v58 }
  0xd4   : > { %5222 = vmatmul.mubr.msk.bf16.gmra.mrb[24].mxu0 %vm480_vm2, %v6588_v4 }
  0xd5   : > { %5225 = vmatprep.mubr.msk.bf16.mxu0 %vm480_vm2, %v6598_v22 }
  0xdc   : > { %5226 = vmatmul.mubr.msk.bf16.gmra.mrb[28].mxu0 %vm480_vm2, %v6767_v47 }
  0xdd   : > { %5231 = vmatprep.mubr.msk.bf16.mxu0 %vm480_vm2, %v8610_v18  ;;  %v5965_v18 = vld [vmem:[%s8493_s3] sm:$0xff]  }
  0xde   : > { %4816 = vmatpush3.bf16.msra.mxu1 %v5965_v18 }
  0xdf   : > { %4817 = vmatprep.subr.bf16.mxu1 %v5966_v55 }
  0xe2   : > { %4818 = vmatpush3.bf16.msra.mxu1 %v5967_v62 }
  0xe4   : > { %5232 = vmatmul.mubr.msk.bf16.vlgmr.msra.gmra.mrb[0].mxu0 %vm480_vm2, %v8611_v59 }
  0xe5   : > { %5264 = vmatpush3.bf16.msra.mxu0 %v1901_v12  ;;  %5235 = vmatprep.mubr.msk.bf16.mxu0 %vm480_vm2, %v8612_v0  ;;  %v5968_v12 = vld [vmem:[%s8493_s3 + $0x50] sm:$0xff]  }
  0xe6   : > { %5668 = vmatprep.subr.msk.bf16.mxu0 %vm529_vm0, %v285_v11  ;;  %4819 = vmatprep.subr.bf16.mxu1 %v5968_v12  ;;  %v5969_v11 = vld [vmem:[%s8493_s3 + $0x10] sm:$0xff]  }
  0xe7   : > { %4820 = vmatpush3.bf16.msra.mxu1 %v5969_v11 }
  0xec   : > { %5236 = vmatmul.mubr.msk.bf16.gmra.mrb[4].mxu0 %vm480_vm2, %v8613_v56 }
  0xed   : > { %5239 = vmatprep.mubr.msk.bf16.mxu0 %vm480_vm2, %v8614_v6 }
  0xf4   : > { %5240 = vmatmul.mubr.msk.bf16.gmra.mrb[8].mxu0 %vm480_vm2, %v8615_v23 }
  0xf5   : > { %5243 = vmatprep.mubr.msk.bf16.mxu0 %vm480_vm2, %v6421_v54 }
  0xfc   : > { %5244 = vmatmul.mubr.msk.bf16.gmra.mrb[12].mxu0 %vm480_vm2, %v8616_v27 }
  0xfd   : > { %5247 = vmatprep.mubr.msk.bf16.mxu0 %vm480_vm2, %v6433_v5 }
 0x104   : > { %5248 = vmatmul.mubr.msk.bf16.gmra.mrb[16].mxu0 %vm480_vm2, %v6435_v2 }
 0x105   : > { %5251 = vmatprep.mubr.msk.bf16.mxu0 %vm480_vm2, %v6441_v3 }
 0x10c   : > { %5252 = vmatmul.mubr.msk.bf16.gmra.mrb[20].mxu0 %vm480_vm2, %v6443_v42 }
 0x10d   : > { %5255 = vmatprep.mubr.msk.bf16.mxu0 %vm480_vm2, %v6581_v39 }
 0x114   : > { %5256 = vmatmul.mubr.msk.bf16.gmra.mrb[24].mxu0 %vm480_vm2, %v6586_v41 }
 0x115   : > { %5259 = vmatprep.mubr.msk.bf16.mxu0 %vm480_vm2, %v6600_v24 }
 0x11c   : > { %5260 = vmatmul.mubr.msk.bf16.gmra.mrb[28].mxu0 %vm480_vm2, %v6685_v15 }
 0x11d   : > { %5265 = vmatprep.mubr.msk.bf16.mxu0 %vm480_vm2, %v6398_v37 }
 0x124   : > { %5266 = vmatmul.mubr.msk.bf16.vlgmr.msra.gmra.mrb[0].mxu0 %vm480_vm2, %v6612_v29 }
 0x125   : > { %5298 = vmatpush3.bf16.msra.mxu0 %v2111_v50  ;;  %5269 = vmatprep.mubr.msk.bf16.mxu0 %vm480_vm2, %v6402_v32  ;;  %v5976_v50 = vld [vmem:[%s8493_s3 + $0x70] sm:$0xff]  }
 0x126   : > { %5669 = vmatprep.subr.msk.bf16.mxu0 %vm529_vm0, %v286_v38 }
 0x12c   : > { %5270 = vmatmul.mubr.msk.bf16.gmra.mrb[4].mxu0 %vm480_vm2, %v6626_v9 }
 0x12d   : > { %5273 = vmatprep.mubr.msk.bf16.mxu0 %vm480_vm2, %v6415_v34  ;;  %v275_v34 = vld [vmem:[%s6163_s13 + $0x198] sm:$0xff] }
 0x12e   : > { %v2306_v37 = vrot.slane %v275_v34, 2 }
 0x134   : > { %5274 = vmatmul.mubr.msk.bf16.gmra.mrb[8].mxu0 %vm480_vm2, %v6634_v10 }
 0x135   : > { %5277 = vmatprep.mubr.msk.bf16.mxu0 %vm480_vm2, %v6419_v49  ;;  %v276_v49 = vld [vmem:[%s6163_s13 + $0x1a0] sm:$0xff] }
 0x136   : > { %v2307_v32 = vrot.slane %v276_v49, 2  ;;  %v1896_v10 = vpack.c.bf16 %v276_v49, %v275_v34 }
 0x138   : > { %v6887_v29 = vsel %vm906_vm1, %v2306_v37, %v2307_v32 }
 0x13c   : > { %5278 = vmatmul.mubr.msk.bf16.gmra.mrb[12].mxu0 %vm480_vm2, %v6642_v20  ;;  %v2318_v20 = vsel %vm529_vm0, %v286_v38, 0  ;;  %v5977_v38 = vld [vmem:[%s8493_s3 + $0x30] sm:$0xff]  }
 0x13d   : > { %5281 = vmatprep.mubr.msk.bf16.mxu0 %vm480_vm2, %v6425_v1  ;;  %v277_v1 = vld [vmem:[%s6163_s13 + $0x1a8] sm:$0x3]  ;;  %s4390_s13 = sshll.u32 %s8344_s11, 4  ;;  %s8439_s13 = int_to_ptr.vmem [resolvable:$true] %s4390_s13 }
 0x13e   : > { %s6002_s17 = scalar_lea.vmem %s8439_s13, 4096  ;;  %p6009_p0 = scmp.lt.s32.totalorder %s8439_s13, %s6007_s25 }
 0x13f   : > { %p6003_p11 = scmp.ne.s32.totalorder %s8439_s13, %s6002_s17  ;;  %p6010_p1 = scmp.lt.s32.totalorder %s6008_s26, %s6002_s17 }
 0x141   : > { %p6004_p12 = pnand %p6003_p11, %p6139_p5  ;;  %p6011_p2 = por %p6010_p1, %p6009_p0 }
 0x143   : > { %p6005_p13 = pneg %p6004_p12 }
 0x144   : > { %5282 = vmatmul.mubr.msk.bf16.gmra.mrb[16].mxu0 %vm480_vm2, %v6650_v21 }
 0x145   : > { %5285 = vmatprep.mubr.msk.bf16.mxu0 %vm480_vm2, %v6429_v43  ;;  %v2309_v43 = vrot.slane %v277_v1, 2  ;;  %p6012_p3 = pnand %p6011_p2, %p6005_p13 }
 0x147   : > { %v6890_v9 = vsel %vm906_vm1, %v2307_v32, %v2309_v43 }
 0x14c   : > { %5286 = vmatmul.mubr.msk.bf16.gmra.mrb[20].mxu0 %vm480_vm2, %v6658_v46 }
 0x14d   : > { %5289 = vmatprep.mubr.msk.bf16.mxu0 %vm480_vm2, %v6439_v13  ;;  %v2313_v13 = vpack.c.bf16 %v6890_v9, %v6887_v29 }
 0x154   : > { %5290 = vmatmul.mubr.msk.bf16.gmra.mrb[24].mxu0 %vm480_vm2, %v6670_v58 }
 0x155   : > { %5293 = vmatprep.mubr.msk.bf16.mxu0 %vm480_vm2, %v6683_v33 }
 0x15c   : > { %5294 = vmatmul.mubr.msk.bf16.gmra.mrb[28].mxu0 %vm480_vm2, %v1896_v10 }
 0x15d   : > { %5299 = vmatprep.mubr.msk.bf16.mxu0 %vm480_vm2, %v6473_v45  ;;  %v2099_v45 = vrot.slane %v275_v34, 1 }
 0x164   : > { %5300 = vmatmul.mubr.msk.bf16.vlgmr.msra.gmra.mrb[0].mxu0 %vm480_vm2, %v6485_v16  ;;  %v2100_v16 = vrot.slane %v276_v49, 1  ;;  %v7109_v49 = vld [vmem:[%s8492_s2] ss:$0 sm:$0xff] }
 0x165   : > { %5332 = vmatpush3.bf16.msra.mxu0 %v2318_v20  ;;  %5303 = vmatprep.mubr.msk.bf16.mxu0 %vm480_vm2, %v6494_v30  ;;  %v2102_v30 = vrot.slane %v277_v1, 1 }
 0x16c   : > { %5304 = vmatmul.mubr.msk.bf16.gmra.mrb[4].mxu0 %vm480_vm2, %v6499_v35  ;;  %v2101_v35 = vsel %vm351_vm3, %v2099_v45, %v2100_v16 }
 0x16d   : > { %5307 = vmatprep.mubr.msk.bf16.mxu0 %vm480_vm2, %v6506_v53  ;;  %v2103_v53 = vsel %vm351_vm3, %v2100_v16, %v2102_v30 }
 0x174   : > { %5308 = vmatmul.mubr.msk.bf16.gmra.mrb[8].mxu0 %vm480_vm2, %v6517_v26  ;;  %v2106_v26 = vpack.c.bf16 %v2103_v53, %v2101_v35 }
 0x175   : > { %5311 = vmatprep.mubr.msk.bf16.mxu0 %vm480_vm2, %v6526_v36  ;;  %v6941_v36 = vpop.f32.mrb[0].mxu1 }
 0x17c   : > { %5312 = vmatmul.mubr.msk.bf16.gmra.mrb[12].mxu0 %vm480_vm2, %v6531_v52  ;;  %v6945_v52 = vpop.f32.mrb[1].mxu1 }
 0x17d   : > { %5315 = vmatprep.mubr.msk.bf16.mxu0 %vm480_vm2, %v6536_v25  ;;  %v6947_v25 = vpop.f32.mrb[2].mxu1 }
 0x184   : > { %5316 = vmatmul.mubr.msk.bf16.gmra.mrb[16].mxu0 %vm480_vm2, %v6555_v44  ;;  %v6949_v44 = vpop.f32.mrb[3].mxu1 }
 0x185   : > { %5319 = vmatprep.mubr.msk.bf16.mxu0 %vm480_vm2, %v6574_v51  ;;  %v6953_v51 = vpop.f32.mrb[4].mxu1 }
 0x18c   : > { %5320 = vmatmul.mubr.msk.bf16.gmra.mrb[20].mxu0 %vm480_vm2, %v6583_v7 }
 0x18d   : > { %5323 = vmatprep.mubr.msk.bf16.mxu0 %vm480_vm2, %v6588_v4 }
 0x194   : > { %5324 = vmatmul.mubr.msk.bf16.gmra.mrb[24].mxu0 %vm480_vm2, %v6598_v22 }
 0x195   : > { %5327 = vmatprep.mubr.msk.bf16.mxu0 %vm480_vm2, %v6767_v47  ;;  %v6066_v47 = vmov 0.0  }
 0x196   : > { %2596 = vst.msk [vmem:[#allocation2 + $0x30] sm:$0x1] %vm2593_vm5, %v6066_v47  ;;  %2595 = vst.msk [vmem:[#allocation2 + $0x18] sm:$0x1] %vm2593_vm5, %v6066_v47 }
 0x197   : > { %2585 = vst.msk [vmem:[#allocation2] sm:$0xff] %vm2584_vm4, %v6066_v47  ;;  %2586 = vst.msk [vmem:[#allocation2 + $0x8] sm:$0xff] %vm2584_vm4, %v6066_v47 }
 0x198   : > { %2590 = vst.msk [vmem:[#allocation2 + $0x198] sm:$0xff] %vm2584_vm4, %v6066_v47  ;;  %2591 = vst.msk [vmem:[#allocation2 + $0x1a0] sm:$0xff] %vm2584_vm4, %v6066_v47 }
 0x199   : > { %2597 = vst.msk [vmem:[#allocation2 + $0x48] sm:$0x1] %vm2593_vm5, %v6066_v47  ;;  %2598 = vst.msk [vmem:[#allocation2 + $0x60] sm:$0x1] %vm2593_vm5, %v6066_v47 }
 0x19a   : > { %2599 = vst.msk [vmem:[#allocation2 + $0x78] sm:$0x1] %vm2593_vm5, %v6066_v47  ;;  %2600 = vst.msk [vmem:[#allocation2 + $0x90] sm:$0x1] %vm2593_vm5, %v6066_v47 }
 0x19b   : > { %2601 = vst.msk [vmem:[#allocation2 + $0xa8] sm:$0x1] %vm2593_vm5, %v6066_v47  ;;  %2602 = vst.msk [vmem:[#allocation2 + $0xc0] sm:$0x1] %vm2593_vm5, %v6066_v47 }
 0x19c   : > { %5328 = vmatmul.mubr.msk.bf16.gmra.mrb[28].mxu0 %vm480_vm2, %v2106_v26  ;;  %2603 = vst.msk [vmem:[#allocation2 + $0xd8] sm:$0x1] %vm2593_vm5, %v6066_v47  ;;  %2604 = vst.msk [vmem:[#allocation2 + $0xf0] sm:$0x1] %vm2593_vm5, %v6066_v47 }
 0x19d   : > { %5333 = vmatprep.mubr.msk.bf16.mxu0 %vm480_vm2, %v8611_v59  ;;  %2605 = vst.msk [vmem:[#allocation2 + $0x108] sm:$0x1] %vm2593_vm5, %v6066_v47  ;;  %2606 = vst.msk [vmem:[#allocation2 + $0x120] sm:$0x1] %vm2593_vm5, %v6066_v47  ;;  %v5970_v59 = vld [vmem:[%s8493_s3 + $0x58] sm:$0xff]  }
 0x19e   : > { %2607 = vst.msk [vmem:[#allocation2 + $0x138] sm:$0x1] %vm2593_vm5, %v6066_v47  ;;  %2608 = vst.msk [vmem:[#allocation2 + $0x150] sm:$0x1] %vm2593_vm5, %v6066_v47  ;;  %4821 = vmatprep.subr.bf16.mxu1 %v5970_v59  ;;  %v7121_v26 = vld [vmem:[#allocation2 + $0x8] sm:$0xff] }
 0x19f   : > { %2609 = vst.msk [vmem:[#allocation2 + $0x168] sm:$0x1] %vm2593_vm5, %v6066_v47  ;;  %2610 = vst.msk [vmem:[#allocation2 + $0x180] sm:$0x1] %vm2593_vm5, %v6066_v47  ;;  %v2766_v12 = vrot.slane %v7121_v26, 1 }
 0x1a0   : > { %2613 = vst.msk [vmem:[#allocation2 + $0x29] sm:$0x1] %vm2593_vm5, %v6066_v47  ;;  %2614 = vst.msk [vmem:[#allocation2 + $0x41] sm:$0x1] %vm2593_vm5, %v6066_v47 }
 0x1a1   : > { %2615 = vst.msk [vmem:[#allocation2 + $0x59] sm:$0x1] %vm2593_vm5, %v6066_v47  ;;  %2616 = vst.msk [vmem:[#allocation2 + $0x71] sm:$0x1] %vm2593_vm5, %v6066_v47 }
 0x1a2   : > { %2617 = vst.msk [vmem:[#allocation2 + $0x89] sm:$0x1] %vm2593_vm5, %v6066_v47  ;;  %2618 = vst.msk [vmem:[#allocation2 + $0xa1] sm:$0x1] %vm2593_vm5, %v6066_v47 }
 0x1a3   : > { %2619 = vst.msk [vmem:[#allocation2 + $0xb9] sm:$0x1] %vm2593_vm5, %v6066_v47  ;;  %2620 = vst.msk [vmem:[#allocation2 + $0xd1] sm:$0x1] %vm2593_vm5, %v6066_v47 }
 0x1a4   : > { %5334 = vmatmul.mubr.msk.bf16.vlgmr.msra.gmra.mrb[0].mxu0 %vm480_vm2, %v8612_v0  ;;  %2621 = vst.msk [vmem:[#allocation2 + $0xe9] sm:$0x1] %vm2593_vm5, %v6066_v47  ;;  %2622 = vst.msk [vmem:[#allocation2 + $0x101] sm:$0x1] %vm2593_vm5, %v6066_v47  ;;  %v5971_v0 = vld [vmem:[%s8493_s3 + $0x18] sm:$0xff]  }
 0x1a5   : > { %5337 = vmatprep.mubr.msk.bf16.mxu0 %vm480_vm2, %v8613_v56  ;;  %2623 = vst.msk [vmem:[#allocation2 + $0x119] sm:$0x1] %vm2593_vm5, %v6066_v47  ;;  %2624 = vst.msk [vmem:[#allocation2 + $0x131] sm:$0x1] %vm2593_vm5, %v6066_v47  ;;  %4822 = vmatpush3.bf16.msra.mxu1 %v5971_v0  ;;  %v5972_v56 = vld [vmem:[%s8493_s3 + $0x60] sm:$0xff]  }
 0x1a6   : > { %2625 = vst.msk [vmem:[#allocation2 + $0x149] sm:$0x1] %vm2593_vm5, %v6066_v47  ;;  %2626 = vst.msk [vmem:[#allocation2 + $0x161] sm:$0x1] %vm2593_vm5, %v6066_v47  ;;  %4823 = vmatprep.subr.bf16.mxu1 %v5972_v56 }
 0x1a7   : > { %2627 = vst.msk [vmem:[#allocation2 + $0x179] sm:$0x1] %vm2593_vm5, %v6066_v47  ;;  %2628 = vst.msk [vmem:[#allocation2 + $0x191] sm:$0x1] %vm2593_vm5, %v6066_v47 }
 0x1a8   : > { %2594 = vst.msk [vmem:[#allocation2] sm:$0x1] %vm2593_vm5, %v6066_v47  ;;  %2611 = vst.msk [vmem:[#allocation2 + $0x198] sm:$0x1] %vm2593_vm5, %v6066_v47 }
 0x1a9   : > { %2588 = vst.msk [vmem:[#allocation2 + $0x10] sm:$0x3] %vm2587_vm6, %v6066_v47  ;;  %2592 = vst.msk [vmem:[#allocation2 + $0x1a8] sm:$0x3] %vm2587_vm6, %v6066_v47 }
 0x1aa   : > { %2612 = vst.msk [vmem:[#allocation2 + $0x11] sm:$0x1] %vm2593_vm5, %v6066_v47  ;;  %2629 = vst.msk [vmem:[#allocation2 + $0x1a9] sm:$0x1] %vm2593_vm5, %v6066_v47 }
 0x1ac   : > { %5338 = vmatmul.mubr.msk.bf16.gmra.mrb[4].mxu0 %vm480_vm2, %v8614_v6  ;;  %v5973_v6 = vld [vmem:[%s8493_s3 + $0x20] sm:$0xff]  }
 0x1ad   : > { %5341 = vmatprep.mubr.msk.bf16.mxu0 %vm480_vm2, %v8615_v23  ;;  %4824 = vmatpush3.bf16.msra.mxu1 %v5973_v6  ;;  %v5974_v23 = vld [vmem:[%s8493_s3 + $0x68] sm:$0xff]  }
 0x1ae   : > { %4825 = vmatprep.subr.bf16.mxu1 %v5974_v23 }
 0x1af   : > { %v7119_v53 = vld [vmem:[#allocation2] sm:$0xff] }
 0x1b0   : > { %v2765_v62 = vrot.slane %v7119_v53, 1 }
 0x1b4   : > { %5342 = vmatmul.mubr.msk.bf16.gmra.mrb[8].mxu0 %vm480_vm2, %v6421_v54  ;;  %v6957_v54 = vpop.f32.mrb[5].mxu1 }
 0x1b5   : > { %5345 = vmatprep.mubr.msk.bf16.mxu0 %vm480_vm2, %v8616_v27  ;;  %v6959_v7 = vpop.f32.mrb[6].mxu1  ;;  %v5975_v27 = vld [vmem:[%s8493_s3 + $0x28] sm:$0xff]  }
 0x1b6   : > { %v6961_v4 = vpop.f32.mrb[7].mxu1  ;;  %4826 = vmatpush3.bf16.msra.mxu1 %v5975_v27 }
 0x1b7   : > { %v6965_v22 = vpop.f32.mrb[8].mxu1  ;;  %4827 = vmatprep.subr.bf16.mxu1 %v5976_v50 }
 0x1ba   : > { %4828 = vmatpush3.bf16.msra.mxu1 %v5977_v38 }
 0x1bc   : > { %5346 = vmatmul.mubr.msk.bf16.gmra.mrb[12].mxu0 %vm480_vm2, %v6433_v5  ;;  %v6969_v5 = vpop.f32.mrb[9].mxu1 }
 0x1bd   : > { %5349 = vmatprep.mubr.msk.bf16.mxu0 %vm480_vm2, %v6435_v2  ;;  %v6971_v21 = vpop.f32.mrb[10].mxu1 }
 0x1be   : > { %v6973_v46 = vpop.f32.mrb[11].mxu1 }
 0x1bf   : > { %v6977_v2 = vpop.f32.mrb[12].mxu1 }
 0x1c4   : > { %5350 = vmatmul.mubr.msk.bf16.gmra.mrb[16].mxu0 %vm480_vm2, %v6441_v3  ;;  %v6981_v3 = vpop.f32.mrb[13].mxu1 }
 0x1c5   : > { %5353 = vmatprep.mubr.msk.bf16.mxu0 %vm480_vm2, %v6443_v42  ;;  %v6983_v58 = vpop.f32.mrb[14].mxu1 }
 0x1c6   : > { %v6985_v33 = vpop.f32.mrb[15].mxu1 }
 0x1c7   : > { %v6989_v42 = vpop.f32.mrb[16].mxu1 }
 0x1cc   : > { %5354 = vmatmul.mubr.msk.bf16.gmra.mrb[20].mxu0 %vm480_vm2, %v6581_v39  ;;  %v6993_v39 = vpop.f32.mrb[17].mxu1 }
 0x1cd   : > { %5357 = vmatprep.mubr.msk.bf16.mxu0 %vm480_vm2, %v6586_v41  ;;  %v6995_v28 = vpop.f32.mrb[18].mxu1 }
 0x1ce   : > { %v6997_v8 = vpop.f32.mrb[19].mxu1 }
 0x1cf   : > { %v7000_v41 = vpop.f32.mrb[20].mxu1 }
 0x1d0   : > { %v7002_v31 = vpop.f32.mrb[21].mxu1 }
 0x1d1   : > { %v7004_v63 = vpop.f32.mrb[22].mxu1 }
 0x1d4   : > { %5358 = vmatmul.mubr.msk.bf16.gmra.mrb[24].mxu0 %vm480_vm2, %v6600_v24  ;;  %v7006_v24 = vpop.f32.mrb[23].mxu1 }
 0x1d5   : > { %5361 = vmatprep.mubr.msk.bf16.mxu0 %vm480_vm2, %v6685_v15  ;;  %v7008_v61 = vpop.f32.mrb[24].mxu1 }
 0x1d6   : > { %v7010_v48 = vpop.f32.mrb[25].mxu1 }
 0x1d7   : > { %v7012_v15 = vpop.f32.mrb[26].mxu1 }
 0x1d8   : > { %v7014_v19 = vpop.f32.mrb[27].mxu1 }
 0x1d9   : > { %v7016_v60 = vpop.f32.mrb[28].mxu1 }
 0x1da   : > { %v7018_v14 = vpop.f32.mrb[29].mxu1 }
 0x1db   : > { %v7020_v40 = vpop.f32.mrb[30].mxu1 }
 0x1dc   : > { %5362 = vmatmul.mubr.msk.bf16.gmra.mrb[28].mxu0 %vm480_vm2, %v2313_v13  ;;  %v7022_v17 = vpop.f32.mrb[31].mxu1 }
 0x277   : > { %v5335_v34 = vpop.f32.mrb[0].mxu0 }
 0x278   : > { %v5405_v37 = vadd.f32 %v5335_v34, %v6941_v36  ;;  %v2354_v32 = vpop.f32.mrb[1].mxu0  ;;  %v7123_v36 = vld [vmem:[#allocation2 + $0x10] sm:$0x3]  ;;  %v2767_v34 = vsel %vm351_vm3, %v2765_v62, %v2766_v12 }
 0x279   : > { %v5406_v1 = vadd.f32 %v2354_v32, %v6945_v52  ;;  %v5336_v29 = vpop.f32.mrb[2].mxu0  ;;  %v2768_v11 = vrot.slane %v7123_v36, 1 }
 0x27a   : > { %v2522_v43 = vadd.f32 %v5405_v37, %v7109_v49  ;;  %v5407_v9 = vadd.f32 %v5336_v29, %v6947_v25  ;;  %v2357_v10 = vpop.f32.mrb[3].mxu0  ;;  %v5978_v25 = vld [vmem:[%s8493_s3 + $0x78] sm:$0xff]  }
 0x27b   : > { %v2520_v13 = vadd.f32 %v5406_v1, %v7109_v49  ;;  %v5408_v20 = vadd.f32 %v2357_v10, %v6949_v44  ;;  %v5979_v44 = vld [vmem:[%s8493_s3 + $0x38] sm:$0xff]   ;;  %4829 = vmatprep.subr.bf16.mxu1 %v5978_v25  ;;  %v2769_v37 = vsel %vm351_vm3, %v2766_v12, %v2768_v11 }
 0x27c   : > { %v2554_v45 = vmax.f32 %v2522_v43, 0.0  ;;  %v2523_v16 = vadd.f32 %v5407_v9, %v7109_v49  ;;  %4830 = vmatpush3.bf16.msra.mxu1 %v5979_v44 }
 0x27d   : > { %v2552_v30 = vmax.f32 %v2520_v13, 0.0  ;;  %v2521_v35 = vadd.f32 %v5408_v20, %v7109_v49  ;;  %v5719_v13 = vpack.i.bf16 %v2769_v37, %v2767_v34 }
 0x27e   : > { %2633 = vst.msk [vmem:[#allocation2 + $0x31] sm:$0xff] %vm2584_vm4, %v2554_v45  ;;  %v2555_v52 = vmax.f32 %v2523_v16, 0.0 }
 0x27f   : > { %2631 = vst.msk [vmem:[#allocation2 + $0x19] sm:$0xff] %vm2584_vm4, %v2552_v30  ;;  %v2553_v47 = vmax.f32 %v2521_v35, 0.0  ;;  %v5339_v57 = vpop.f32.mrb[4].mxu0 }
 0x280   : > { %2634 = vst.msk [vmem:[#allocation2 + $0x39] sm:$0xff] %vm2584_vm4, %v2555_v52  ;;  %v5409_v18 = vadd.f32 %v5339_v57, %v6953_v51  ;;  %v2370_v55 = vpop.f32.mrb[5].mxu0 }
 0x281   : > { %2632 = vst.msk [vmem:[#allocation2 + $0x21] sm:$0xff] %vm2584_vm4, %v2553_v47  ;;  %v5410_v59 = vadd.f32 %v2370_v55, %v6957_v54  ;;  %v5340_v0 = vpop.f32.mrb[6].mxu0 }
 0x282   : > { %v2526_v56 = vadd.f32 %v5409_v18, %v7109_v49  ;;  %v5411_v6 = vadd.f32 %v5340_v0, %v6959_v7  ;;  %v2373_v23 = vpop.f32.mrb[7].mxu0  ;;  %v5980_v7 = vld [vmem:[%s8493_s3 + $0xc0] sm:$0xff]  }
 0x283   : > { %v2524_v51 = vadd.f32 %v5410_v59, %v7109_v49  ;;  %v5412_v27 = vadd.f32 %v2373_v23, %v6961_v4  ;;  %4927 = vmatprep.subr.bf16.mxu1 %v5980_v7 }
 0x284   : > { %v2558_v50 = vmax.f32 %v2526_v56, 0.0  ;;  %v2527_v38 = vadd.f32 %v5411_v6, %v7109_v49 }
 0x285   : > { %v2556_v32 = vmax.f32 %v2524_v51, 0.0  ;;  %v2525_v54 = vadd.f32 %v5412_v27, %v7109_v49  ;;  %v7155_v9 = vld [vmem:[#allocation2 + $0x30] sm:$0xff] }
 0x286   : > { %2637 = vst.msk [vmem:[#allocation2 + $0x61] sm:$0xff] %vm2584_vm4, %v2558_v50  ;;  %v2559_v1 = vmax.f32 %v2527_v38, 0.0  ;;  %v7149_v29 = vld [vmem:[#allocation2 + $0x18] sm:$0xff]  ;;  %v2775_v59 = vrot.slane %v7155_v9, 1 }
 0x287   : > { %2635 = vst.msk [vmem:[#allocation2 + $0x49] sm:$0xff] %vm2584_vm4, %v2556_v32  ;;  %v2557_v4 = vmax.f32 %v2525_v54, 0.0  ;;  %v5343_v43 = vpop.f32.mrb[8].mxu0  ;;  %v7157_v10 = vld [vmem:[#allocation2 + $0x38] sm:$0xff]  ;;  %v7159_v20 = vld [vmem:[#allocation2 + $0x40] sm:$0x3] }
 0x288   : > { %2638 = vst.msk [vmem:[#allocation2 + $0x69] sm:$0xff] %vm2584_vm4, %v2559_v1  ;;  %v5413_v45 = vadd.f32 %v5343_v43, %v6965_v22  ;;  %v2386_v16 = vpop.f32.mrb[9].mxu0  ;;  %v5724_v30 = vpack.i.bf16 %v7157_v10, %v7155_v9  ;;  %v7165_v35 = vld [vmem:[#allocation2 + $0x20] sm:$0xff]  ;;  %v7167_v52 = vld [vmem:[#allocation2 + $0x28] sm:$0x3]  ;;  %v2770_v25 = vrot.slane %v7149_v29, 1 }
 0x289   : > { %v2776_v44 = vrot.slane %v7157_v10, 1  ;;  %2636 = vst.msk [vmem:[#allocation2 + $0x51] sm:$0xff] %vm2584_vm4, %v2557_v4  ;;  %v5414_v47 = vadd.f32 %v2386_v16, %v6969_v5  ;;  %v5344_v57 = vpop.f32.mrb[10].mxu0  ;;  %v5714_v22 = vpack.i.bf16 %v7165_v35, %v7149_v29  ;;  %v2771_v18 = vrot.slane %v7165_v35, 1 }
 0x28a   : > { %v2773_v55 = vrot.slane %v7167_v52, 1  ;;  %v2530_v62 = vadd.f32 %v5413_v45, %v7109_v49  ;;  %v5415_v12 = vadd.f32 %v5344_v57, %v6971_v21  ;;  %v2389_v11 = vpop.f32.mrb[11].mxu0  ;;  %5725 = vrot.lane.b32.xlu1 %v5724_v30, %s6067_s16  ;;  %v2778_v5 = vrot.slane %v7159_v20, 1 }
 0x28b   : > { %v2528_v0 = vadd.f32 %v5414_v47, %v7109_v49  ;;  %v5416_v56 = vadd.f32 %v2389_v11, %v6973_v46  ;;  %5715 = vrot.lane.b32.xlu0 %v5714_v22, %s6067_s16  ;;  %v7186_v6 = vsel %vm351_vm3, %v2770_v25, %v2771_v18  ;;  %v7196_v34 = vsel %vm351_vm3, %v2775_v59, %v2776_v44 }
 0x28c   : > { %8617 = vst [vmem:[#allocation14_spill] sm:$0xff] %v7186_v6  ;;  %v7189_v23 = vsel %vm351_vm3, %v2771_v18, %v2773_v55  ;;  %v2562_v21 = vmax.f32 %v2530_v62, 0.0  ;;  %v2531_v51 = vadd.f32 %v5415_v12, %v7109_v49  ;;  %8619 = vst [vmem:[#allocation16_spill] sm:$0xff] %v7196_v34  ;;  %v7199_v46 = vsel %vm351_vm3, %v2776_v44, %v2778_v5 }
 0x28d   : > { %8618 = vst [vmem:[#allocation15_spill] sm:$0xff] %v7189_v23  ;;  %v5729_v27 = vpack.i.bf16 %v7189_v23, %v7186_v6  ;;  %v2560_v50 = vmax.f32 %v2528_v0, 0.0  ;;  %v2529_v38 = vadd.f32 %v5416_v56, %v7109_v49  ;;  %8620 = vst [vmem:[#allocation17_spill] sm:$0xff] %v7199_v46  ;;  %v7205_v54 = vld [vmem:[#allocation2 + $0x60] sm:$0xff]  ;;  %v5739_v25 = vpack.i.bf16 %v7199_v46, %v7196_v34 }
 0x28e   : > { %2641 = vst.msk [vmem:[#allocation2 + $0x91] sm:$0xff] %vm2584_vm4, %v2562_v21  ;;  %v2563_v37 = vmax.f32 %v2531_v51, 0.0  ;;  %v7203_v32 = vld [vmem:[#allocation2 + $0x48] sm:$0xff]  ;;  %v2785_v5 = vrot.slane %v7205_v54, 1 }
 0x28f   : > { %5730 = vrot.lane.b32.xlu1 %v5729_v27, %s6067_s16  ;;  %2639 = vst.msk [vmem:[#allocation2 + $0x79] sm:$0xff] %vm2584_vm4, %v2560_v50  ;;  %v2561_v1 = vmax.f32 %v2529_v38, 0.0  ;;  %v5347_v7 = vpop.f32.mrb[12].mxu0  ;;  %5720 = vrot.lane.b32.xlu0 %v5719_v13, %s6067_s16  ;;  %v2780_v4 = vrot.slane %v7203_v32, 1  ;;  %v7210_v43 = vld [vmem:[#allocation2 + $0x68] sm:$0xff] }
 0x290   : > { %8621 = vst [vmem:[#allocation10_spill] sm:$0xff] %v7210_v43  ;;  %v7212_v45 = vld [vmem:[#allocation2 + $0x70] sm:$0x3]  ;;  %2642 = vst.msk [vmem:[#allocation2 + $0x99] sm:$0xff] %vm2584_vm4, %v2563_v37  ;;  %v5417_v16 = vadd.f32 %v5347_v7, %v6977_v2  ;;  %v2402_v30 = vpop.f32.mrb[13].mxu0  ;;  %v2786_v13 = vrot.slane %v7210_v43, 1  ;;  %v5744_v50 = vpack.i.bf16 %v7210_v43, %v7205_v54 }
 0x291   : > { %v7218_v44 = vld [vmem:[#allocation2 + $0x50] sm:$0xff]  ;;  %v7220_v47 = vld [vmem:[#allocation2 + $0x58] sm:$0x3]  ;;  %v2788_v57 = vrot.slane %v7212_v45, 1  ;;  %2640 = vst.msk [vmem:[#allocation2 + $0x81] sm:$0xff] %vm2584_vm4, %v2561_v1  ;;  %v5418_v22 = vadd.f32 %v2402_v30, %v6981_v3  ;;  %v5348_v18 = vpop.f32.mrb[14].mxu0 }
 0x292   : > { %v5734_v2 = vpack.i.bf16 %v7218_v44, %v7203_v32  ;;  %v2781_v55 = vrot.slane %v7218_v44, 1  ;;  %v2783_v62 = vrot.slane %v7220_v47, 1  ;;  %v2534_v12 = vadd.f32 %v5417_v16, %v7109_v49  ;;  %v2405_v59 = vpop.f32.mrb[15].mxu0 }
 0x293   : > { %v5419_v11 = vadd.f32 %v5348_v18, %v6983_v58  ;;  %5740 = vrot.lane.b32.xlu1 %v5739_v25, %s6067_s16  ;;  %v2532_v0 = vadd.f32 %v5418_v22, %v7109_v49  ;;  %v5420_v3 = vadd.f32 %v2405_v59, %v6985_v33  ;;  %v7250_v37 = vsel %vm351_vm3, %v2785_v5, %v2786_v13 }
 0x294   : > { %5735 = vrot.lane.b32.xlu0 %v5734_v2, %s6067_s16  ;;  %v7238_v56 = vsel %vm351_vm3, %v2780_v4, %v2781_v55  ;;  %v7241_v21 = vsel %vm351_vm3, %v2781_v55, %v2783_v62  ;;  %v2566_v51 = vmax.f32 %v2534_v12, 0.0  ;;  %8624 = vst [vmem:[#allocation8_spill] sm:$0xff] %v7250_v37  ;;  %v7253_v1 = vsel %vm351_vm3, %v2786_v13, %v2788_v57 }
 0x295   : > { %8622 = vst [vmem:[#allocation6_spill] sm:$0xff] %v7238_v56  ;;  %8623 = vst [vmem:[#allocation7_spill] sm:$0xff] %v7241_v21  ;;  %v2535_v58 = vadd.f32 %v5419_v11, %v7109_v49  ;;  %v5749_v27 = vpack.i.bf16 %v7241_v21, %v7238_v56  ;;  %v2564_v38 = vmax.f32 %v2532_v0, 0.0  ;;  %v2533_v33 = vadd.f32 %v5420_v3, %v7109_v49  ;;  %v7259_v16 = vld [vmem:[#allocation2 + $0x90] sm:$0xff] }
 0x296   : > { %8625 = vst [vmem:[#allocation9_spill] sm:$0xff] %v7253_v1  ;;  %2645 = vst.msk [vmem:[#allocation2 + $0xc1] sm:$0xff] %vm2584_vm4, %v2566_v51  ;;  %v7257_v4 = vld [vmem:[#allocation2 + $0x78] sm:$0xff]  ;;  %v5759_v55 = vpack.i.bf16 %v7253_v1, %v7250_v37  ;;  %v2964_v34 = vrot.slane %v7212_v45, 2  ;;  %v2957_v45 = vrot.slane %v7218_v44, 2 }
 0x297   : > { %v2567_v7 = vmax.f32 %v2535_v58, 0.0  ;;  %5750 = vrot.lane.b32.xlu1 %v5749_v27, %s6067_s16  ;;  %8626 = vst [vmem:[#allocation11_spill] sm:$0xff] %v7257_v4  ;;  %8627 = vst [vmem:[#allocation12_spill] sm:$0xff] %v7259_v16  ;;  %v2565_v30 = vmax.f32 %v2533_v33, 0.0  ;;  %v5351_v25 = vpop.f32.mrb[16].mxu0  ;;  %v2790_v22 = vrot.slane %v7257_v4, 1 }
 0x298   : > { %2643 = vst.msk [vmem:[#allocation2 + $0xa9] sm:$0xff] %vm2584_vm4, %v2564_v38  ;;  %5745 = vrot.lane.b32.xlu0 %v5744_v50, %s6067_s16  ;;  %v7264_v18 = vld [vmem:[#allocation2 + $0x98] sm:$0xff]  ;;  %v7266_v13 = vld [vmem:[#allocation2 + $0xa0] sm:$0x3]  ;;  %v5421_v57 = vadd.f32 %v5351_v25, %v6989_v42  ;;  %v2418_v2 = vpop.f32.mrb[17].mxu0  ;;  %v2795_v38 = vrot.slane %v7259_v16, 1 }
 0x299   : > { %8628 = vst [vmem:[#allocation13_spill] sm:$0xff] %v7264_v18  ;;  %2646 = vst.msk [vmem:[#allocation2 + $0xc9] sm:$0xff] %vm2584_vm4, %v2567_v7  ;;  %v7272_v62 = vld [vmem:[#allocation2 + $0x80] sm:$0xff]  ;;  %v7274_v12 = vld [vmem:[#allocation2 + $0x88] sm:$0x3]  ;;  %v2796_v11 = vrot.slane %v7264_v18, 1  ;;  %v5422_v5 = vadd.f32 %v2418_v2, %v6993_v39  ;;  %v5764_v2 = vpack.i.bf16 %v7264_v18, %v7259_v16 }
 0x29a   : > { %8629 = vst [vmem:[#allocation18_spill] sm:$0xff] %v7272_v62  ;;  %v2798_v59 = vrot.slane %v7266_v13, 1  ;;  %2644 = vst.msk [vmem:[#allocation2 + $0xb1] sm:$0xff] %vm2584_vm4, %v2565_v30  ;;  %v5352_v0 = vpop.f32.mrb[18].mxu0  ;;  %v5754_v42 = vpack.i.bf16 %v7272_v62, %v7257_v4  ;;  %v2791_v3 = vrot.slane %v7272_v62, 1  ;;  %v2793_v51 = vrot.slane %v7274_v12, 1 }
 0x29b   : > { %v2538_v58 = vadd.f32 %v5421_v57, %v7109_v49  ;;  %v5423_v27 = vadd.f32 %v5352_v0, %v6995_v28  ;;  %v2421_v50 = vpop.f32.mrb[19].mxu0  ;;  %5760 = vrot.lane.b32.xlu1 %v5759_v55, %s6067_s16  ;;  %v2536_v33 = vadd.f32 %v5422_v5, %v7109_v49  ;;  %v7304_v5 = vsel %vm351_vm3, %v2795_v38, %v2796_v11 }
 0x29c   : > { %v5424_v39 = vadd.f32 %v2421_v50, %v6997_v8  ;;  %5755 = vrot.lane.b32.xlu0 %v5754_v42, %s6067_s16  ;;  %v7292_v7 = vsel %vm351_vm3, %v2790_v22, %v2791_v3  ;;  %v7295_v30 = vsel %vm351_vm3, %v2791_v3, %v2793_v51  ;;  %8632 = vst [vmem:[#allocation21_spill] sm:$0xff] %v7304_v5 }
 0x29d   : > { %8630 = vst [vmem:[#allocation19_spill] sm:$0xff] %v7292_v7  ;;  %8631 = vst [vmem:[#allocation20_spill] sm:$0xff] %v7295_v30  ;;  %v2570_v25 = vmax.f32 %v2538_v58, 0.0  ;;  %v2539_v28 = vadd.f32 %v5423_v27, %v7109_v49  ;;  %v5769_v57 = vpack.i.bf16 %v7295_v30, %v7292_v7  ;;  %v2568_v55 = vmax.f32 %v2536_v33, 0.0  ;;  %v7313_v3 = vld [vmem:[#allocation2 + $0xc0] sm:$0xff] }
 0x29e   : > { %v2537_v8 = vadd.f32 %v5424_v39, %v7109_v49  ;;  %v7307_v22 = vsel %vm351_vm3, %v2796_v11, %v2798_v59  ;;  %8635 = vst [vmem:[#allocation24_spill] sm:$0xff] %v7313_v3  ;;  %v2805_v30 = vrot.slane %v7313_v3, 1 }
 0x29f   : > { %8633 = vst [vmem:[#allocation22_spill] sm:$0xff] %v7307_v22  ;;  %2649 = vst.msk [vmem:[#allocation2 + $0xf1] sm:$0xff] %vm2584_vm4, %v2570_v25  ;;  %v2571_v0 = vmax.f32 %v2539_v28, 0.0  ;;  %5770 = vrot.lane.b32.xlu1 %v5769_v57, %s6067_s16  ;;  %v7311_v42 = vld [vmem:[#allocation2 + $0xa8] sm:$0xff]  ;;  %v5355_v58 = vpop.f32.mrb[20].mxu0  ;;  %v5779_v33 = vpack.i.bf16 %v7307_v22, %v7304_v5 }
 0x2a0   : > { %8634 = vst [vmem:[#allocation23_spill] sm:$0xff] %v7311_v42  ;;  %2647 = vst.msk [vmem:[#allocation2 + $0xd9] sm:$0xff] %vm2584_vm4, %v2568_v55  ;;  %v2569_v51 = vmax.f32 %v2537_v8, 0.0  ;;  %5765 = vrot.lane.b32.xlu0 %v5764_v2, %s6067_s16  ;;  %v2800_v27 = vrot.slane %v7311_v42, 1  ;;  %v7318_v50 = vld [vmem:[#allocation2 + $0xc8] sm:$0xff]  ;;  %v5425_v59 = vadd.f32 %v5355_v58, %v7000_v41  ;;  %v2434_v38 = vpop.f32.mrb[21].mxu0 }
 0x2a1   : > { %8636 = vst [vmem:[#allocation25_spill] sm:$0xff] %v7318_v50  ;;  %v7320_v11 = vld [vmem:[#allocation2 + $0xd0] sm:$0x3]  ;;  %2650 = vst.msk [vmem:[#allocation2 + $0xf9] sm:$0xff] %vm2584_vm4, %v2571_v0  ;;  %v7328_v25 = vld [vmem:[#allocation2 + $0xb8] sm:$0x3]  ;;  %v5426_v2 = vadd.f32 %v2434_v38, %v7002_v31 }
 0x2a2   : > { %v7326_v39 = vld [vmem:[#allocation2 + $0xb0] sm:$0xff]  ;;  %v2806_v28 = vrot.slane %v7318_v50, 1  ;;  %v2808_v57 = vrot.slane %v7320_v11, 1  ;;  %2648 = vst.msk [vmem:[#allocation2 + $0xe1] sm:$0xff] %vm2584_vm4, %v2569_v51  ;;  %v5356_v55 = vpop.f32.mrb[22].mxu0  ;;  %v2803_v0 = vrot.slane %v7328_v25, 1  ;;  %v2542_v58 = vadd.f32 %v5425_v59, %v7109_v49 }
 0x2a3   : > { %8637 = vst [vmem:[#allocation26_spill] sm:$0xff] %v7326_v39  ;;  %v5774_v41 = vpack.i.bf16 %v7326_v39, %v7311_v42  ;;  %v2801_v8 = vrot.slane %v7326_v39, 1  ;;  %v5427_v22 = vadd.f32 %v5356_v55, %v7004_v63  ;;  %v2437_v5 = vpop.f32.mrb[23].mxu0  ;;  %5780 = vrot.lane.b32.xlu1 %v5779_v33, %s6067_s16  ;;  %v2540_v51 = vadd.f32 %v5426_v2, %v7109_v49 }
 0x2a4   : > { %v5428_v31 = vadd.f32 %v2437_v5, %v7006_v24  ;;  %v2574_v59 = vmax.f32 %v2542_v58, 0.0  ;;  %v5784_v55 = vpack.i.bf16 %v7318_v50, %v7313_v3  ;;  %v7358_v5 = vsel %vm351_vm3, %v2805_v30, %v2806_v28 }
 0x2a5   : > { %5775 = vrot.lane.b32.xlu0 %v5774_v41, %s6067_s16  ;;  %v7346_v38 = vsel %vm351_vm3, %v2800_v27, %v2801_v8  ;;  %v7349_v7 = vsel %vm351_vm3, %v2801_v8, %v2803_v0  ;;  %v2543_v63 = vadd.f32 %v5427_v22, %v7109_v49  ;;  %v2572_v2 = vmax.f32 %v2540_v51, 0.0  ;;  %8640 = vst [vmem:[#allocation29_spill] sm:$0xff] %v7358_v5 }
 0x2a6   : > { %8638 = vst [vmem:[#allocation27_spill] sm:$0xff] %v7346_v38  ;;  %8639 = vst [vmem:[#allocation28_spill] sm:$0xff] %v7349_v7  ;;  %v5789_v33 = vpack.i.bf16 %v7349_v7, %v7346_v38  ;;  %v2541_v24 = vadd.f32 %v5428_v31, %v7109_v49  ;;  %v7361_v27 = vsel %vm351_vm3, %v2806_v28, %v2808_v57  ;;  %v7367_v8 = vld [vmem:[#allocation2 + $0xf0] sm:$0xff] }
 0x2a7   : > { %8641 = vst [vmem:[#allocation30_spill] sm:$0xff] %v7361_v27  ;;  %2653 = vst.msk [vmem:[#allocation2 + $0x121] sm:$0xff] %vm2584_vm4, %v2574_v59  ;;  %v2575_v41 = vmax.f32 %v2543_v63, 0.0  ;;  %v7365_v22 = vld [vmem:[#allocation2 + $0xd8] sm:$0xff]  ;;  %v5359_v58 = vpop.f32.mrb[24].mxu0  ;;  %v5799_v59 = vpack.i.bf16 %v7361_v27, %v7358_v5  ;;  %v2815_v1 = vrot.slane %v7367_v8, 1 }
 0x2a8   : > { %5790 = vrot.lane.b32.xlu1 %v5789_v33, %s6067_s16  ;;  %8642 = vst [vmem:[#allocation31_spill] sm:$0xff] %v7367_v8  ;;  %2651 = vst.msk [vmem:[#allocation2 + $0x109] sm:$0xff] %vm2584_vm4, %v2572_v2  ;;  %v2573_v0 = vmax.f32 %v2541_v24, 0.0  ;;  %v2810_v30 = vrot.slane %v7365_v22, 1  ;;  %v7372_v51 = vld [vmem:[#allocation2 + $0xf8] sm:$0xff]  ;;  %v5429_v57 = vadd.f32 %v5359_v58, %v7008_v61  ;;  %v2450_v31 = vpop.f32.mrb[25].mxu0 }
 0x2a9   : > { %5785 = vrot.lane.b32.xlu0 %v5784_v55, %s6067_s16  ;;  %8643 = vst [vmem:[#allocation32_spill] sm:$0xff] %v7372_v51  ;;  %v7374_v28 = vld [vmem:[#allocation2 + $0x100] sm:$0x3]  ;;  %2654 = vst.msk [vmem:[#allocation2 + $0x129] sm:$0xff] %vm2584_vm4, %v2575_v41  ;;  %v7382_v33 = vld [vmem:[#allocation2 + $0xe8] sm:$0x3]  ;;  %v5430_v24 = vadd.f32 %v2450_v31, %v7010_v48 }
 0x2aa   : > { %v7380_v63 = vld [vmem:[#allocation2 + $0xe0] sm:$0xff]  ;;  %v2816_v55 = vrot.slane %v7372_v51, 1  ;;  %v2818_v2 = vrot.slane %v7374_v28, 1  ;;  %2652 = vst.msk [vmem:[#allocation2 + $0x111] sm:$0xff] %vm2584_vm4, %v2573_v0  ;;  %v5360_v7 = vpop.f32.mrb[26].mxu0  ;;  %v2813_v58 = vrot.slane %v7382_v33, 1  ;;  %v2546_v27 = vadd.f32 %v5429_v57, %v7109_v49 }
 0x2ab   : > { %v5794_v61 = vpack.i.bf16 %v7380_v63, %v7365_v22  ;;  %v2811_v41 = vrot.slane %v7380_v63, 1  ;;  %v5431_v5 = vadd.f32 %v5360_v7, %v7012_v15  ;;  %v2453_v38 = vpop.f32.mrb[27].mxu0  ;;  %v2544_v0 = vadd.f32 %v5430_v24, %v7109_v49 }
 0x2ac   : > { %5800 = vrot.lane.b32.xlu1 %v5799_v59, %s6067_s16  ;;  %v5432_v48 = vadd.f32 %v2453_v38, %v7014_v19  ;;  %v2578_v57 = vmax.f32 %v2546_v27, 0.0  ;;  %v5804_v59 = vpack.i.bf16 %v7372_v51, %v7367_v8  ;;  %v7412_v38 = vsel %vm351_vm3, %v2815_v1, %v2816_v55 }
 0x2ad   : > { %5795 = vrot.lane.b32.xlu0 %v5794_v61, %s6067_s16  ;;  %v7400_v31 = vsel %vm351_vm3, %v2810_v30, %v2811_v41  ;;  %v7403_v37 = vsel %vm351_vm3, %v2811_v41, %v2813_v58  ;;  %v2547_v15 = vadd.f32 %v5431_v5, %v7109_v49  ;;  %v2576_v24 = vmax.f32 %v2544_v0, 0.0  ;;  %8646 = vst [vmem:[#allocation35_spill] sm:$0xff] %v7412_v38 }
 0x2ae   : > { %8644 = vst [vmem:[#allocation33_spill] sm:$0xff] %v7400_v31  ;;  %8645 = vst [vmem:[#allocation34_spill] sm:$0xff] %v7403_v37  ;;  %v5809_v7 = vpack.i.bf16 %v7403_v37, %v7400_v31  ;;  %v2545_v19 = vadd.f32 %v5432_v48, %v7109_v49  ;;  %v7415_v30 = vsel %vm351_vm3, %v2816_v55, %v2818_v2  ;;  %v7421_v61 = vld [vmem:[#allocation2 + $0x120] sm:$0xff] }
 0x2af   : > { %8647 = vst [vmem:[#allocation36_spill] sm:$0xff] %v7415_v30  ;;  %2657 = vst.msk [vmem:[#allocation2 + $0x151] sm:$0xff] %vm2584_vm4, %v2578_v57  ;;  %v2579_v27 = vmax.f32 %v2547_v15, 0.0  ;;  %v7419_v5 = vld [vmem:[#allocation2 + $0x108] sm:$0xff]  ;;  %v5363_v58 = vpop.f32.mrb[28].mxu0  ;;  %v5819_v57 = vpack.i.bf16 %v7415_v30, %v7412_v38  ;;  %v2825_v21 = vrot.slane %v7421_v61, 1 }
 0x2b0   : > { %5810 = vrot.lane.b32.xlu1 %v5809_v7, %s6067_s16  ;;  %2655 = vst.msk [vmem:[#allocation2 + $0x139] sm:$0xff] %vm2584_vm4, %v2576_v24  ;;  %v2577_v41 = vmax.f32 %v2545_v19, 0.0  ;;  %v2820_v1 = vrot.slane %v7419_v5, 1  ;;  %v7426_v0 = vld [vmem:[#allocation2 + $0x128] sm:$0xff]  ;;  %v7428_v55 = vld [vmem:[#allocation2 + $0x130] sm:$0x3]  ;;  %v5433_v2 = vadd.f32 %v5363_v58, %v7016_v60 }
 0x2b1   : > { %5805 = vrot.lane.b32.xlu0 %v5804_v59, %s6067_s16  ;;  %8648 = vst [vmem:[#allocation37_spill] sm:$0xff] %v7426_v0  ;;  %2658 = vst.msk [vmem:[#allocation2 + $0x159] sm:$0xff] %vm2584_vm4, %v2579_v27  ;;  %v2466_v48 = vpop.f32.mrb[29].mxu0  ;;  %v7434_v15 = vld [vmem:[#allocation2 + $0x110] sm:$0xff]  ;;  %v7436_v7 = vld [vmem:[#allocation2 + $0x118] sm:$0x3] }
 0x2b2   : > { %v2826_v59 = vrot.slane %v7426_v0, 1  ;;  %v2828_v24 = vrot.slane %v7428_v55, 1  ;;  %2656 = vst.msk [vmem:[#allocation2 + $0x141] sm:$0xff] %vm2584_vm4, %v2577_v41  ;;  %v5434_v19 = vadd.f32 %v2466_v48, %v7018_v14  ;;  %v5364_v37 = vpop.f32.mrb[30].mxu0  ;;  %v5814_v60 = vpack.i.bf16 %v7434_v15, %v7419_v5 }
 0x2b3   : > { %v2821_v27 = vrot.slane %v7434_v15, 1  ;;  %v2823_v58 = vrot.slane %v7436_v7, 1  ;;  %v2550_v30 = vadd.f32 %v5433_v2, %v7109_v49  ;;  %v5435_v38 = vadd.f32 %v5364_v37, %v7020_v40  ;;  %v2469_v31 = vpop.f32.mrb[31].mxu0 }
 0x2b4   : > { %5820 = vrot.lane.b32.xlu1 %v5819_v57, %s6067_s16  ;;  %v2548_v41 = vadd.f32 %v5434_v19, %v7109_v49  ;;  %v5436_v14 = vadd.f32 %v2469_v31, %v7022_v17  ;;  %v5824_v57 = vpack.i.bf16 %v7426_v0, %v7421_v61  ;;  %v7466_v31 = vsel %vm351_vm3, %v2825_v21, %v2826_v59 }
 0x2b5   : > { %5815 = vrot.lane.b32.xlu0 %v5814_v60, %s6067_s16  ;;  %v7454_v48 = vsel %vm351_vm3, %v2820_v1, %v2821_v27  ;;  %v7457_v56 = vsel %vm351_vm3, %v2821_v27, %v2823_v58  ;;  %v2582_v2 = vmax.f32 %v2550_v30, 0.0  ;;  %v2551_v40 = vadd.f32 %v5435_v38, %v7109_v49  ;;  %8651 = vst [vmem:[#allocation40_spill] sm:$0xff] %v7466_v31 }
 0x2b6   : > { %8649 = vst [vmem:[#allocation38_spill] sm:$0xff] %v7454_v48  ;;  %8650 = vst [vmem:[#allocation39_spill] sm:$0xff] %v7457_v56  ;;  %v5829_v37 = vpack.i.bf16 %v7457_v56, %v7454_v48  ;;  %v2580_v19 = vmax.f32 %v2548_v41, 0.0  ;;  %v2549_v17 = vadd.f32 %v5436_v14, %v7109_v49  ;;  %v7469_v1 = vsel %vm351_vm3, %v2826_v59, %v2828_v24  ;;  %v7489_v41 = vld [vmem:[#allocation2 + $0x150] sm:$0xff] }
 0x2b7   : > { %8652 = vst [vmem:[#allocation41_spill] sm:$0xff] %v7469_v1  ;;  %2661 = vst.msk [vmem:[#allocation2 + $0x181] sm:$0xff] %vm2584_vm4, %v2582_v2  ;;  %v2583_v30 = vmax.f32 %v2551_v40, 0.0  ;;  %v7473_v38 = vld [vmem:[#allocation2 + $0x138] sm:$0xff]  ;;  %v5839_v21 = vpack.i.bf16 %v7469_v1, %v7466_v31  ;;  %v2949_v56 = vrot.slane %v7167_v52, 2  ;;  %v2946_v52 = vrot.slane %v7149_v29, 2 }
 0x2b8   : > { %5830 = vrot.lane.b32.xlu1 %v5829_v37, %s6067_s16  ;;  %2659 = vst.msk [vmem:[#allocation2 + $0x169] sm:$0xff] %vm2584_vm4, %v2580_v19  ;;  %v2581_v60 = vmax.f32 %v2549_v17, 0.0  ;;  %v7477_v27 = vld [vmem:[#allocation2 + $0x158] sm:$0xff]  ;;  %v7479_v49 = vld [vmem:[#allocation2 + $0x160] sm:$0x3]  ;;  %v2830_v58 = vrot.slane %v7473_v38, 1 }
 0x2b9   : > { %5825 = vrot.lane.b32.xlu0 %v5824_v57, %s6067_s16  ;;  %8653 = vst [vmem:[#allocation42_spill] sm:$0xff] %v7477_v27  ;;  %2662 = vst.msk [vmem:[#allocation2 + $0x189] sm:$0xff] %vm2584_vm4, %v2583_v30  ;;  %v7484_v59 = vld [vmem:[#allocation2 + $0x140] sm:$0xff]  ;;  %v7486_v24 = vld [vmem:[#allocation2 + $0x148] sm:$0x3]  ;;  %v2836_v14 = vrot.slane %v7477_v27, 1  ;;  %v5844_v1 = vpack.i.bf16 %v7477_v27, %v7489_v41 }
 0x2ba   : > { %8654 = vst [vmem:[#allocation43_spill] sm:$0xff] %v7489_v41  ;;  %2660 = vst.msk [vmem:[#allocation2 + $0x171] sm:$0xff] %vm2584_vm4, %v2581_v60  ;;  %v5834_v2 = vpack.i.bf16 %v7484_v59, %v7473_v38  ;;  %v2831_v40 = vrot.slane %v7484_v59, 1  ;;  %v2833_v37 = vrot.slane %v7486_v24, 1  ;;  %v2838_v57 = vrot.slane %v7479_v49, 1 }
 0x2bb   : > { %v2835_v30 = vrot.slane %v7489_v41, 1 }
 0x2bc   : > { %5840 = vrot.lane.b32.xlu1 %v5839_v21, %s6067_s16  ;;  %v7501_v19 = vsel %vm351_vm3, %v2830_v58, %v2831_v40  ;;  %v7504_v17 = vsel %vm351_vm3, %v2831_v40, %v2833_v37  ;;  %v7515_v21 = vsel %vm351_vm3, %v2836_v14, %v2838_v57 }
 0x2bd   : > { %5835 = vrot.lane.b32.xlu0 %v5834_v2, %s6067_s16  ;;  %8655 = vst [vmem:[#allocation44_spill] sm:$0xff] %v7501_v19  ;;  %8656 = vst [vmem:[#allocation45_spill] sm:$0xff] %v7504_v17  ;;  %v5849_v60 = vpack.i.bf16 %v7504_v17, %v7501_v19  ;;  %v7512_v31 = vsel %vm351_vm3, %v2835_v30, %v2836_v14  ;;  %v2952_v2 = vrot.slane %v7157_v10, 2  ;;  %v2954_v30 = vrot.slane %v7159_v20, 2 }
 0x2be   : > { %8657 = vst [vmem:[#allocation46_spill] sm:$0xff] %v7512_v31  ;;  %8658 = vst [vmem:[#allocation47_spill] sm:$0xff] %v7515_v21  ;;  %v5859_v40 = vpack.i.bf16 %v7515_v21, %v7512_v31  ;;  %v2951_v19 = vrot.slane %v7155_v9, 2  ;;  %v2947_v31 = vrot.slane %v7165_v35, 2  ;;  %v2962_v20 = vrot.slane %v7210_v43, 2  ;;  %v7551_v6 = vld [vmem:[#allocation2 + $0x180] sm:$0xff] }
 0x2bf   : > { %v7518_v58 = vld [vmem:[#allocation2 + $0x168] sm:$0xff] }
 0x2c0   : > { %5850 = vrot.lane.b32.xlu1 %v5849_v60, %s6067_s16  ;;  %8659 = vst [vmem:[#allocation48_spill] sm:$0xff] %v7518_v58  ;;  %v2840_v57 = vrot.slane %v7518_v58, 1  ;;  %v7536_v21 = vld [vmem:[#allocation2 + $0x188] sm:$0xff]  ;;  %v7554_v23 = vsel %vm906_vm1, %v2951_v19, %v2952_v2  ;;  %v7570_v19 = vsel %vm906_vm1, %v2947_v31, %v2949_v56  ;;  %v7599_v43 = vld [vmem:[#allocation2 + $0x190] sm:$0x3] }
 0x2c1   : > { %5845 = vrot.lane.b32.xlu0 %v5844_v1, %s6067_s16  ;;  %v7524_v37 = vld [vmem:[#allocation2 + $0x170] sm:$0xff]  ;;  %v7526_v17 = vld [vmem:[#allocation2 + $0x178] sm:$0x3] }
 0x2c2   : > { %8660 = vst [vmem:[#allocation49_spill] sm:$0xff] %v7524_v37  ;;  %v5854_v14 = vpack.i.bf16 %v7524_v37, %v7518_v58  ;;  %v2841_v60 = vrot.slane %v7524_v37, 1  ;;  %v2843_v1 = vrot.slane %v7526_v17, 1 }
 0x2c4   : > { %5860 = vrot.lane.b32.xlu1 %v5859_v40, %s6067_s16  ;;  %v7543_v48 = vsel %vm351_vm3, %v2840_v57, %v2841_v60  ;;  %v7546_v46 = vsel %vm351_vm3, %v2841_v60, %v2843_v1  ;;  %v5864_v57 = vpack.i.bf16 %v7536_v21, %v7551_v6  ;;  %v7561_v60 = vsel %vm906_vm1, %v2952_v2, %v2954_v30 }
 0x2c5   : > { %5855 = vrot.lane.b32.xlu0 %v5854_v14, %s6067_s16  ;;  %8661 = vst [vmem:[#allocation50_spill] sm:$0xff] %v7543_v48  ;;  %8662 = vst [vmem:[#allocation51_spill] sm:$0xff] %v7546_v46  ;;  %v5869_v40 = vpack.i.bf16 %v7546_v46, %v7543_v48  ;;  %v2961_v14 = vrot.slane %v7205_v54, 2  ;;  %v2959_v1 = vrot.slane %v7220_v47, 2  ;;  %v7567_v46 = vsel %vm906_vm1, %v2946_v52, %v2947_v31 }
 0x2c6   : > { %v7577_v2 = vsel %vm906_vm1, %v2962_v20, %v2964_v34  ;;  %v2956_v30 = vrot.slane %v7203_v32, 2  ;;  %v2972_v47 = vrot.slane %v7264_v18, 2  ;;  %v5879_v52 = vpack.i.bf16 %v7561_v60, %v7554_v23 }
 0x2c7   : > { %v7573_v48 = vsel %vm906_vm1, %v2961_v14, %v2962_v20  ;;  %v5874_v56 = vpack.i.bf16 %v7570_v19, %v7567_v46  ;;  %v7590_v14 = vsel %vm906_vm1, %v2957_v45, %v2959_v1  ;;  %v2971_v34 = vrot.slane %v7259_v16, 2 }
 0x2c8   : > { %5870 = vrot.lane.b32.xlu1 %v5869_v40, %s6067_s16  ;;  %v2974_v40 = vrot.slane %v7266_v13, 2  ;;  %v7587_v31 = vsel %vm906_vm1, %v2956_v30, %v2957_v45  ;;  %v5889_v20 = vpack.i.bf16 %v7577_v2, %v7573_v48  ;;  %v2967_v13 = vrot.slane %v7272_v62, 2 }
 0x2c9   : > { %5865 = vrot.lane.b32.xlu0 %v5864_v57, %s6067_s16  ;;  %v2969_v57 = vrot.slane %v7274_v12, 2  ;;  %v2982_v18 = vrot.slane %v7318_v50, 2  ;;  %v7603_v45 = vsel %vm906_vm1, %v2971_v34, %v2972_v47  ;;  %v2984_v30 = vrot.slane %v7320_v11, 2 }
 0x2ca   : > { %v7606_v1 = vsel %vm906_vm1, %v2972_v47, %v2974_v40  ;;  %v5884_v16 = vpack.i.bf16 %v7590_v14, %v7587_v31  ;;  %v2966_v12 = vrot.slane %v7257_v4, 2  ;;  %v2981_v50 = vrot.slane %v7313_v3, 2 }
 0x2cb   : > { %v2979_v62 = vrot.slane %v7328_v25, 2  ;;  %v3189_v34 = vrot.slane %v7551_v6, 2  ;;  %v3190_v47 = vrot.slane %v7536_v21, 2  ;;  %v3192_v40 = vrot.slane %v7599_v43, 2 }
 0x2cc   : > { %5880 = vrot.lane.b32.xlu1 %v5879_v52, %s6067_s16  ;;  %v2977_v52 = vrot.slane %v7326_v39, 2  ;;  %v5899_v11 = vpack.i.bf16 %v7606_v1, %v7603_v45  ;;  %v7623_v39 = vsel %vm906_vm1, %v2966_v12, %v2967_v13  ;;  %v7626_v3 = vsel %vm906_vm1, %v2967_v13, %v2969_v57 }
 0x2cd   : > { %5875 = vrot.lane.b32.xlu0 %v5874_v56, %s6067_s16  ;;  %v2976_v56 = vrot.slane %v7311_v42, 2  ;;  %v7629_v25 = vsel %vm906_vm1, %v2981_v50, %v2982_v18  ;;  %v7633_v42 = vsel %vm906_vm1, %v2982_v18, %v2984_v30  ;;  %v7642_v12 = vsel %vm906_vm1, %v3190_v47, %v3192_v40 }
 0x2ce   : > { %8664 = vst [vmem:[#allocation53_spill] sm:$0xff] %v7642_v12  ;;  %v7645_v13 = vsel %vm906_vm1, %v2977_v52, %v2979_v62  ;;  %v2992_v50 = vrot.slane %v7372_v51, 2  ;;  %v2994_v57 = vrot.slane %v7374_v28, 2  ;;  %v5894_v18 = vpack.i.bf16 %v7626_v3, %v7623_v39 }
 0x2cf   : > { %v7636_v4 = vsel %vm906_vm1, %v2976_v56, %v2977_v52  ;;  %v2987_v30 = vrot.slane %v7380_v63, 2  ;;  %v2989_v56 = vrot.slane %v7382_v33, 2  ;;  %v5909_v62 = vpack.i.bf16 %v7633_v42, %v7629_v25 }
 0x2d0   : > { %5890 = vrot.lane.b32.xlu1 %v5889_v20, %s6067_s16  ;;  %v7639_v20 = vsel %vm906_vm1, %v3189_v34, %v3190_v47  ;;  %v2991_v34 = vrot.slane %v7367_v8, 2  ;;  %v5904_v28 = vpack.i.bf16 %v7645_v13, %v7636_v4  ;;  %v2986_v52 = vrot.slane %v7365_v22, 2 }
 0x2d1   : > { %5885 = vrot.lane.b32.xlu0 %v5884_v16, %s6067_s16  ;;  %8663 = vst [vmem:[#allocation52_spill] sm:$0xff] %v7639_v20  ;;  %v7667_v40 = vsel %vm906_vm1, %v2992_v50, %v2994_v57  ;;  %v3002_v33 = vrot.slane %v7426_v0, 2  ;;  %v7675_v16 = vsel %vm906_vm1, %v2987_v30, %v2989_v56  ;;  %v2997_v51 = vrot.slane %v7434_v15, 2 }
 0x2d2   : > { %v7664_v47 = vsel %vm906_vm1, %v2991_v34, %v2992_v50  ;;  %v2999_v8 = vrot.slane %v7436_v7, 2  ;;  %v3001_v34 = vrot.slane %v7421_v61, 2  ;;  %v2996_v50 = vrot.slane %v7419_v5, 2 }
 0x2d3   : > { %v3007_v0 = vrot.slane %v7484_v59, 2 }
 0x2d4   : > { %5900 = vrot.lane.b32.xlu1 %v5899_v11, %s6067_s16  ;;  %v3004_v11 = vrot.slane %v7428_v55, 2  ;;  %v5919_v55 = vpack.i.bf16 %v7667_v40, %v7664_v47  ;;  %v7694_v7 = vsel %vm906_vm1, %v2996_v50, %v2997_v51 }
 0x2d5   : > { %5895 = vrot.lane.b32.xlu0 %v5894_v18, %s6067_s16  ;;  %v7672_v18 = vsel %vm906_vm1, %v2986_v52, %v2987_v30  ;;  %v7688_v30 = vsel %vm906_vm1, %v3001_v34, %v3002_v33  ;;  %v3014_v52 = vrot.slane %v7479_v49, 2  ;;  %v3009_v34 = vrot.slane %v7486_v24, 2 }
 0x2d6   : > { %v5914_v57 = vpack.i.bf16 %v7675_v16, %v7672_v18  ;;  %v7691_v56 = vsel %vm906_vm1, %v3002_v33, %v3004_v11  ;;  %v3011_v33 = vrot.slane %v7489_v41, 2  ;;  %v3017_v24 = vrot.slane %v7524_v37, 2 }
 0x2d7   : > { %v5929_v11 = vpack.i.bf16 %v7691_v56, %v7688_v30  ;;  %v3153_v41 = vrot.slane %v7536_v21, 1 }
 0x2d8   : > { %5910 = vrot.lane.b32.xlu1 %v5909_v62, %s6067_s16  ;;  %v7697_v62 = vsel %vm906_vm1, %v2997_v51, %v2999_v8  ;;  %v3006_v51 = vrot.slane %v7473_v38, 2 }
 0x2d9   : > { %5905 = vrot.lane.b32.xlu0 %v5904_v28, %s6067_s16  ;;  %v3012_v28 = vrot.slane %v7477_v27, 2  ;;  %v5924_v8 = vpack.i.bf16 %v7697_v62, %v7694_v7  ;;  %v7724_v27 = vsel %vm906_vm1, %v3007_v0, %v3009_v34 }
 0x2db   : > { %v7712_v49 = vsel %vm906_vm1, %v3011_v33, %v3012_v28  ;;  %v7715_v50 = vsel %vm906_vm1, %v3012_v28, %v3014_v52  ;;  %v3155_v33 = vrot.slane %v7599_v43, 1  ;;  %v3016_v28 = vrot.slane %v7518_v58, 2  ;;  %v7769_v58 = vld [vmem:[#allocation2 + $0x1a8] sm:$0x3] }
 0x2dc   : > { %5920 = vrot.lane.b32.xlu1 %v5919_v55, %s6067_s16  ;;  %v3019_v55 = vrot.slane %v7526_v17, 2  ;;  %v5939_v52 = vpack.i.bf16 %v7715_v50, %v7712_v49  ;;  %v3152_v17 = vrot.slane %v7551_v6, 1  ;;  %8668 = vst [vmem:[#allocation57_spill] sm:$0xff] %v7769_v58 }
 0x2dd   : > { %5915 = vrot.lane.b32.xlu0 %v5914_v57, %s6067_s16  ;;  %v7721_v57 = vsel %vm906_vm1, %v3006_v51, %v3007_v0  ;;  %v7736_v51 = vsel %vm906_vm1, %v3016_v28, %v3017_v24  ;;  %v7746_v21 = vsel %vm351_vm3, %v3153_v41, %v3155_v33 }
 0x2de   : > { %v7739_v0 = vsel %vm906_vm1, %v3017_v24, %v3019_v55  ;;  %v7743_v43 = vsel %vm351_vm3, %v3152_v17, %v3153_v41  ;;  %8667 = vst [vmem:[#allocation56_spill] sm:$0xff] %v7746_v21  ;;  %v2944_v41 = vrot.slane %v7123_v36, 2  ;;  %v2941_v24 = vrot.slane %v7119_v53, 2  ;;  %v7767_v36 = vld [vmem:[#allocation2 + $0x1a0] sm:$0xff] }
 0x2df   : > { %8665 = vst [vmem:[#allocation54_spill] sm:$0xff] %v7739_v0  ;;  %8666 = vst [vmem:[#allocation55_spill] sm:$0xff] %v7743_v43  ;;  %v5949_v6 = vpack.i.bf16 %v7739_v0, %v7736_v51  ;;  %v5944_v34 = vpack.i.bf16 %v7746_v21, %v7743_v43  ;;  %v2942_v55 = vrot.slane %v7121_v26, 2 }
 0x2e0   : > { %5930 = vrot.lane.b32.xlu1 %v5929_v11, %s6067_s16  ;;  %v5934_v11 = vpack.i.bf16 %v7724_v27, %v7721_v57 }
 0x2e1   : > { %5925 = vrot.lane.b32.xlu0 %v5924_v8, %s6067_s16  ;;  %v5959_v8 = vpack.i.bf16 %v7642_v12, %v7639_v20  ;;  %v2945_v17 = vsel %vm906_vm1, %v2942_v55, %v2944_v41  ;;  %v7765_v12 = vld [vmem:[#allocation2 + $0x198] sm:$0xff] }
 0x2e4   : > { %5940 = vrot.lane.b32.xlu1 %v5939_v52, %s6067_s16  ;;  %v2943_v52 = vsel %vm906_vm1, %v2941_v24, %v2942_v55  ;;  %v3293_v24 = vrot.slane %v7765_v12, 1  ;;  %v3294_v55 = vrot.slane %v7767_v36, 1 }
 0x2e5   : > { %5935 = vrot.lane.b32.xlu0 %v5934_v11, %s6067_s16 }
 0x2e8   : > { %5950 = vrot.lane.b32.xlu1 %v5949_v6, %s6067_s16 }
 0x2e9   : > { %5945 = vrot.lane.b32.xlu0 %v5944_v34, %s6067_s16 }
 0x2ec   : > { %5960 = vrot.lane.b32.xlu1 %v5959_v8, %s6067_s16 }
 0x2fc   : > { %v5726_v33 = vpop.permute.xlu1 %5725 }
 0x2fd   : > { %v5716_v28 = vpop.permute.xlu0 %5715  ;;  %v5728_v34 = vunpack.i.h.bf16 %v5726_v33  ;;  %v5727_v21 = vunpack.i.l.bf16 %v5726_v33  ;;  %v3296_v33 = vrot.slane %v7769_v58, 1 }
 0x2fe   : > { %v5718_v11 = vunpack.i.h.bf16 %v5716_v28  ;;  %v5717_v6 = vunpack.i.l.bf16 %v5716_v28 }
 0x300   : > { %v3351_v20 = vsel %vm2584_vm4, %v2943_v52, %v5717_v6  ;;  %v3352_v8 = vsel %vm2584_vm4, %v2945_v17, %v5718_v11  ;;  %v3353_v52 = vsel %vm2584_vm4, %v7567_v46, %v5727_v21  ;;  %v3354_v17 = vsel %vm2584_vm4, %v7570_v19, %v5728_v34  ;;  %v5982_v46 = vld [vmem:[%s8493_s3 + $0xc8] sm:$0xff]  }
 0x301   : > { %v5721_v43 = vpop.permute.xlu0 %5720  ;;  %v3420_v37 = vpack.c.bf16 %v3352_v8, %v3351_v20  ;;  %v5731_v28 = vpop.permute.xlu1 %5730  ;;  %v3295_v6 = vsel %vm351_vm3, %v3293_v24, %v3294_v55  ;;  %v3297_v19 = vsel %vm351_vm3, %v3294_v55, %v3296_v33  ;;  %v5983_v24 = vld [vmem:[%s8493_s3 + $0x88] sm:$0xff]  }
 0x302   : > { %v5723_v0 = vunpack.i.h.bf16 %v5721_v43  ;;  %v5722_v41 = vunpack.i.l.bf16 %v5721_v43  ;;  %v5981_v43 = vld [vmem:[%s8493_s3 + $0x80] sm:$0xff]   ;;  %v5733_v21 = vunpack.i.h.bf16 %v5731_v28  ;;  %v5732_v34 = vunpack.i.l.bf16 %v5731_v28 }
 0x303   : > { %3860 = vmatprep.mubr.bf16.mxu1 %v3420_v37 }
 0x304   : > { %v3320_v20 = vsel %vm2584_vm4, %v7121_v26, %v5723_v0  ;;  %v3319_v11 = vsel %vm2584_vm4, %v7119_v53, %v5722_v41  ;;  %v3425_v26 = vpack.c.bf16 %v3354_v17, %v3353_v52  ;;  %v5954_v0 = vpack.i.bf16 %v3297_v19, %v3295_v6  ;;  %v5984_v41 = vld [vmem:[%s8493_s3 + $0xd0] sm:$0xff]   ;;  %v5988_v19 = vld [vmem:[%s8493_s3 + $0xe0] sm:$0xff]  }
 0x305   : > { %v3419_v8 = vpack.c.bf16 %v3320_v20, %v3319_v11  ;;  %v3321_v55 = vsel %vm2584_vm4, %v7149_v29, %v5732_v34  ;;  %v3322_v33 = vsel %vm2584_vm4, %v7165_v35, %v5733_v21  ;;  %v5741_v28 = vpop.permute.xlu1 %5740  ;;  %v5985_v11 = vld [vmem:[%s8493_s3 + $0x90] sm:$0xff]   ;;  %v5986_v29 = vld [vmem:[%s8493_s3 + $0xd8] sm:$0xff]  }
 0x306   : > { %v5736_v37 = vpop.permute.xlu0 %5735  ;;  %5955 = vrot.lane.b32.xlu0 %v5954_v0, %s6067_s16  ;;  %v5743_v35 = vunpack.i.h.bf16 %v5741_v28  ;;  %v5742_v6 = vunpack.i.l.bf16 %v5741_v28  ;;  %s8437_s16 = scalar_lea.hbm %s8495_s5, %s4661_s12 }
 0x307   : > { %v5738_v58 = vunpack.i.h.bf16 %v5736_v37  ;;  %v5737_v53 = vunpack.i.l.bf16 %v5736_v37  ;;  %3861 = vmatmul.mubr.bf16.vlgmr.msra.gmra.mrb[32].mxu1 %v3419_v8 }
 0x308   : > { %4928 = vmatpush3.bf16.msra.mxu1 %v5981_v43  ;;  %3868 = vmatprep.mubr.bf16.mxu1 %v3425_v26  ;;  %v3424_v43 = vpack.c.bf16 %v3322_v33, %v3321_v55  ;;  %v3323_v21 = vsel %vm2584_vm4, %v7155_v9, %v5742_v6  ;;  %v3324_v34 = vsel %vm2584_vm4, %v7157_v10, %v5743_v35  ;;  %v5990_v9 = vld [vmem:[%s8493_s3 + $0xe8] sm:$0xff]  }
 0x309   : > { %4929 = vmatprep.subr.bf16.mxu1 %v5982_v46  ;;  %v3355_v52 = vsel %vm2584_vm4, %v7554_v23, %v5737_v53  ;;  %v3356_v17 = vsel %vm2584_vm4, %v7561_v60, %v5738_v58  ;;  %v5987_v58 = vld [vmem:[%s8493_s3 + $0x98] sm:$0xff]   ;;  %v5751_v26 = vpop.permute.xlu1 %5750  ;;  %v7828_v55 = vpack.c.bf16 %v3324_v34, %v3323_v21 }
 0x30a   : > { %v5746_v20 = vpop.permute.xlu0 %5745  ;;  %v3429_v8 = vpack.c.bf16 %v3356_v17, %v3355_v52  ;;  %v5753_v10 = vunpack.i.h.bf16 %v5751_v26  ;;  %v5752_v33 = vunpack.i.l.bf16 %v5751_v26 }
 0x30b   : > { %v5748_v37 = vunpack.i.h.bf16 %v5746_v20  ;;  %v5747_v46 = vunpack.i.l.bf16 %v5746_v20  ;;  %v5991_v20 = vld [vmem:[%s8493_s3 + $0xa8] sm:$0xff]  }
 0x30c   : > { %4930 = vmatpush3.bf16.msra.mxu1 %v5983_v24 }
 0x30d   : > { %4931 = vmatprep.subr.bf16.mxu1 %v5984_v41  ;;  %v3357_v0 = vsel %vm2584_vm4, %v7587_v31, %v5747_v46  ;;  %v3358_v53 = vsel %vm2584_vm4, %v7590_v14, %v5748_v37  ;;  %v5989_v41 = vld [vmem:[%s8493_s3 + $0xa0] sm:$0xff]   ;;  %v5761_v35 = vpop.permute.xlu1 %5760  ;;  %v5993_v46 = vld [vmem:[%s8493_s3 + $0xb0] sm:$0xff]  }
 0x30e   : > { %v5756_v24 = vpop.permute.xlu0 %5755  ;;  %v3433_v28 = vpack.c.bf16 %v3358_v53, %v3357_v0  ;;  %v5995_v0 = vld [vmem:[%s8493_s3 + $0xb8] sm:$0xff]   ;;  %v7863_v53 = vld [vmem:[%s8493_s3 + $0x100] sm:$0xff]  }
 0x30f   : > { %3869 = vmatmul.mubr.bf16.gmra.mrb[36].mxu1 %v3424_v43  ;;  %v5758_v52 = vunpack.i.h.bf16 %v5756_v24  ;;  %v5757_v17 = vunpack.i.l.bf16 %v5756_v24  ;;  %v3325_v43 = vsel %vm2584_vm4, %v7203_v32, %v5752_v33  ;;  %v5994_v32 = vld [vmem:[%s8493_s3 + $0xf8] sm:$0xff]  }
 0x310   : > { %3876 = vmatprep.mubr.bf16.mxu1 %v3429_v8  ;;  %4932 = vmatpush3.bf16.msra.mxu1 %v5985_v11  ;;  %v5992_v11 = vld [vmem:[%s8493_s3 + $0xf0] sm:$0xff]  }
 0x311   : > { %4933 = vmatprep.subr.bf16.mxu1 %v5986_v29  ;;  %v3326_v29 = vsel %vm2584_vm4, %v7218_v44, %v5753_v10  ;;  %v3359_v6 = vsel %vm2584_vm4, %v7573_v48, %v5757_v17  ;;  %v3360_v8 = vsel %vm2584_vm4, %v7577_v2, %v5758_v52  ;;  %v5763_v44 = vunpack.i.h.bf16 %v5761_v35  ;;  %v5771_v10 = vpop.permute.xlu1 %5770 }
 0x312   : > { %v5766_v37 = vpop.permute.xlu0 %5765  ;;  %v3437_v21 = vpack.c.bf16 %v3360_v8, %v3359_v6  ;;  %v8671_v8 = vld [vmem:[#allocation18_spill] sm:$0xff] }
 0x313   : > { %v5768_v34 = vunpack.i.h.bf16 %v5766_v37  ;;  %v5767_v26 = vunpack.i.l.bf16 %v5766_v37 }
 0x314   : > { %4934 = vmatpush3.bf16.msra.mxu1 %v5987_v58  ;;  %v7851_v58 = vpack.c.bf16 %v3326_v29, %v3325_v43 }
 0x315   : > { %4935 = vmatprep.subr.bf16.mxu1 %v5988_v19  ;;  %v5762_v19 = vunpack.i.l.bf16 %v5761_v35  ;;  %v3361_v33 = vsel %vm2584_vm4, %v7623_v39, %v5767_v26  ;;  %v8670_v35 = vld [vmem:[#allocation11_spill] sm:$0xff] }
 0x317   : > { %3877 = vmatmul.mubr.bf16.gmra.mrb[40].mxu1 %v7828_v55  ;;  %v3327_v24 = vsel %vm2584_vm4, %v7205_v54, %v5762_v19  ;;  %v5776_v52 = vpop.permute.xlu0 %5775 }
 0x318   : > { %3884 = vmatprep.mubr.bf16.mxu1 %v3433_v28  ;;  %4936 = vmatpush3.bf16.msra.mxu1 %v5989_v41  ;;  %v8669_v41 = vld [vmem:[#allocation10_spill] sm:$0xff]  ;;  %v3362_v28 = vsel %vm2584_vm4, %v7626_v3, %v5768_v34  ;;  %v5778_v54 = vunpack.i.h.bf16 %v5776_v52  ;;  %v5777_v29 = vunpack.i.l.bf16 %v5776_v52 }
 0x319   : > { %4937 = vmatprep.subr.bf16.mxu1 %v5990_v9  ;;  %v3328_v9 = vsel %vm2584_vm4, %v8669_v41, %v5763_v44  ;;  %v3441_v43 = vpack.c.bf16 %v3362_v28, %v3361_v33  ;;  %v8673_v33 = vld [vmem:[#allocation13_spill] sm:$0xff] }
 0x31a   : > { %v7873_v17 = vpack.c.bf16 %v3328_v9, %v3327_v24  ;;  %v3364_v44 = vsel %vm2584_vm4, %v7606_v1, %v5778_v54  ;;  %v8672_v9 = vld [vmem:[#allocation12_spill] sm:$0xff] }
 0x31b   : > { %v5786_v19 = vpop.permute.xlu0 %5785 }
 0x31c   : > { %4938 = vmatpush3.bf16.msra.mxu1 %v5991_v20  ;;  %v5773_v20 = vunpack.i.h.bf16 %v5771_v10  ;;  %v5788_v24 = vunpack.i.h.bf16 %v5786_v19  ;;  %v5787_v41 = vunpack.i.l.bf16 %v5786_v19 }
 0x31d   : > { %4939 = vmatprep.subr.bf16.mxu1 %v5992_v11  ;;  %v5772_v11 = vunpack.i.l.bf16 %v5771_v10 }
 0x31e   : > { %v3330_v37 = vsel %vm2584_vm4, %v8671_v8, %v5773_v20  ;;  %v3365_v20 = vsel %vm2584_vm4, %v7636_v4, %v5787_v41 }
 0x31f   : > { %3885 = vmatmul.mubr.bf16.gmra.mrb[44].mxu1 %v7851_v58  ;;  %v3329_v6 = vsel %vm2584_vm4, %v8670_v35, %v5772_v11  ;;  %v3366_v11 = vsel %vm2584_vm4, %v7645_v13, %v5788_v24 }
 0x320   : > { %3892 = vmatprep.mubr.bf16.mxu1 %v3437_v21  ;;  %4940 = vmatpush3.bf16.msra.mxu1 %v5993_v46  ;;  %v5781_v46 = vpop.permute.xlu1 %5780  ;;  %v7885_v21 = vpack.c.bf16 %v3330_v37, %v3329_v6  ;;  %v3449_v6 = vpack.c.bf16 %v3366_v11, %v3365_v20  ;;  %v8676_v20 = vld [vmem:[#allocation24_spill] sm:$0xff] }
 0x321   : > { %4941 = vmatprep.subr.bf16.mxu1 %v5994_v32  ;;  %v3363_v32 = vsel %vm2584_vm4, %v7603_v45, %v5777_v29  ;;  %v5783_v34 = vunpack.i.h.bf16 %v5781_v46  ;;  %v5782_v26 = vunpack.i.l.bf16 %v5781_v46  ;;  %v8674_v46 = vld [vmem:[#allocation23_spill] sm:$0xff] }
 0x323   : > { %v3331_v10 = vsel %vm2584_vm4, %v8672_v9, %v5782_v26  ;;  %v3332_v28 = vsel %vm2584_vm4, %v8673_v33, %v5783_v34 }
 0x324   : > { %4942 = vmatpush3.bf16.msra.mxu1 %v5995_v0  ;;  %v3445_v0 = vpack.c.bf16 %v3364_v44, %v3363_v32  ;;  %v5791_v52 = vpop.permute.xlu1 %5790  ;;  %v7896_v54 = vpack.c.bf16 %v3332_v28, %v3331_v10  ;;  %v8675_v44 = vld [vmem:[#allocation26_spill] sm:$0xff] }
 0x325   : > { %5365 = vmatprep.subr.bf16.mxu1 %v7863_v53  ;;  %v5793_v29 = vunpack.i.h.bf16 %v5791_v52  ;;  %v5792_v35 = vunpack.i.l.bf16 %v5791_v52 }
 0x327   : > { %3893 = vmatmul.mubr.bf16.gmra.mrb[48].mxu1 %v7873_v17  ;;  %v3333_v32 = vsel %vm2584_vm4, %v8674_v46, %v5792_v35  ;;  %v3334_v19 = vsel %vm2584_vm4, %v8675_v44, %v5793_v29 }
 0x328   : > { %3900 = vmatprep.mubr.bf16.mxu1 %v3441_v43  ;;  %v5796_v43 = vpop.permute.xlu0 %5795  ;;  %v5801_v34 = vpop.permute.xlu1 %5800  ;;  %v7907_v41 = vpack.c.bf16 %v3334_v19, %v3333_v32 }
 0x329   : > { %v5798_v8 = vunpack.i.h.bf16 %v5796_v43  ;;  %v5797_v37 = vunpack.i.l.bf16 %v5796_v43  ;;  %v5803_v9 = vunpack.i.h.bf16 %v5801_v34  ;;  %v5802_v10 = vunpack.i.l.bf16 %v5801_v34  ;;  %v8677_v43 = vld [vmem:[#allocation25_spill] sm:$0xff] }
 0x32b   : > { %v3367_v26 = vsel %vm2584_vm4, %v7629_v25, %v5797_v37  ;;  %v3335_v11 = vsel %vm2584_vm4, %v8676_v20, %v5802_v10  ;;  %v3336_v29 = vsel %vm2584_vm4, %v8677_v43, %v5803_v9 }
 0x32c   : > { %v5806_v24 = vpop.permute.xlu0 %5805  ;;  %v5811_v35 = vpop.permute.xlu1 %5810  ;;  %v7918_v46 = vpack.c.bf16 %v3336_v29, %v3335_v11 }
 0x32d   : > { %v5808_v28 = vunpack.i.h.bf16 %v5806_v24  ;;  %v5807_v52 = vunpack.i.l.bf16 %v5806_v24  ;;  %v5813_v32 = vunpack.i.h.bf16 %v5811_v35  ;;  %v5812_v44 = vunpack.i.l.bf16 %v5811_v35 }
 0x32f   : > { %3901 = vmatmul.mubr.bf16.gmra.mrb[52].mxu1 %v7885_v21  ;;  %v3338_v24 = vsel %vm2584_vm4, %v7380_v63, %v5813_v32 }
 0x330   : > { %3908 = vmatprep.mubr.bf16.mxu1 %v3445_v0  ;;  %v3368_v0 = vsel %vm2584_vm4, %v7633_v42, %v5798_v8  ;;  %v3370_v8 = vsel %vm2584_vm4, %v7675_v16, %v5808_v28  ;;  %v5816_v37 = vpop.permute.xlu0 %5815  ;;  %v5821_v9 = vpop.permute.xlu1 %5820 }
 0x331   : > { %v3453_v33 = vpack.c.bf16 %v3368_v0, %v3367_v26  ;;  %v5818_v34 = vunpack.i.h.bf16 %v5816_v37  ;;  %v5817_v26 = vunpack.i.l.bf16 %v5816_v37  ;;  %v3337_v0 = vsel %vm2584_vm4, %v7365_v22, %v5812_v44  ;;  %v8678_v22 = vld [vmem:[#allocation31_spill] sm:$0xff] }
 0x332   : > { %v5823_v20 = vunpack.i.h.bf16 %v5821_v9  ;;  %v5822_v11 = vunpack.i.l.bf16 %v5821_v9 }
 0x333   : > { %v3371_v10 = vsel %vm2584_vm4, %v7664_v47, %v5817_v26 }
 0x334   : > { %v5826_v28 = vpop.permute.xlu0 %5825  ;;  %v3339_v63 = vsel %vm2584_vm4, %v8678_v22, %v5822_v11  ;;  %v5831_v37 = vpop.permute.xlu1 %5830 }
 0x335   : > { %v5828_v29 = vunpack.i.h.bf16 %v5826_v28  ;;  %v5827_v35 = vunpack.i.l.bf16 %v5826_v28  ;;  %v5833_v26 = vunpack.i.h.bf16 %v5831_v37 }
 0x337   : > { %3909 = vmatmul.mubr.bf16.gmra.mrb[56].mxu1 %v7896_v54  ;;  %v3373_v32 = vsel %vm2584_vm4, %v7694_v7, %v5827_v35  ;;  %v3374_v44 = vsel %vm2584_vm4, %v7697_v62, %v5828_v29  ;;  %v3342_v28 = vsel %vm2584_vm4, %v7434_v15, %v5833_v26  ;;  %v8680_v15 = vld [vmem:[#allocation37_spill] sm:$0xff] }
 0x338   : > { %3916 = vmatprep.mubr.bf16.mxu1 %v3449_v6  ;;  %v3369_v6 = vsel %vm2584_vm4, %v7672_v18, %v5807_v52  ;;  %v7929_v52 = vpack.c.bf16 %v3338_v24, %v3337_v0  ;;  %v5832_v0 = vunpack.i.l.bf16 %v5831_v37  ;;  %v3465_v24 = vpack.c.bf16 %v3374_v44, %v3373_v32 }
 0x339   : > { %v3457_v19 = vpack.c.bf16 %v3370_v8, %v3369_v6  ;;  %v8679_v6 = vld [vmem:[#allocation32_spill] sm:$0xff] }
 0x33a   : > { %v3340_v8 = vsel %vm2584_vm4, %v8679_v6, %v5823_v20  ;;  %v5841_v20 = vpop.permute.xlu1 %5840 }
 0x33b   : > { %v5843_v22 = vunpack.i.h.bf16 %v5841_v20 }
 0x33d   : > { %v3344_v32 = vsel %vm2584_vm4, %v8680_v15, %v5843_v22 }
 0x33e   : > { %v5851_v44 = vpop.permute.xlu1 %5850 }
 0x33f   : > { %3917 = vmatmul.mubr.bf16.gmra.mrb[60].mxu1 %v7907_v41 }
 0x340   : > { %3924 = vmatprep.mubr.bf16.mxu1 %v3453_v33  ;;  %v3372_v33 = vsel %vm2584_vm4, %v7667_v40, %v5818_v34  ;;  %v7940_v34 = vpack.c.bf16 %v3340_v8, %v3339_v63  ;;  %v5842_v63 = vunpack.i.l.bf16 %v5841_v20 }
 0x341   : > { %v3461_v43 = vpack.c.bf16 %v3372_v33, %v3371_v10  ;;  %v3341_v33 = vsel %vm2584_vm4, %v7419_v5, %v5832_v0 }
 0x342   : > { %v7951_v35 = vpack.c.bf16 %v3342_v28, %v3341_v33  ;;  %v3343_v5 = vsel %vm2584_vm4, %v7421_v61, %v5842_v63 }
 0x347   : > { %3925 = vmatmul.mubr.bf16.gmra.mrb[64].mxu1 %v7918_v46 }
 0x348   : > { %3932 = vmatprep.mubr.bf16.mxu1 %v3457_v19  ;;  %v5836_v19 = vpop.permute.xlu0 %5835 }
 0x349   : > { %v5838_v9 = vunpack.i.h.bf16 %v5836_v19  ;;  %v5837_v10 = vunpack.i.l.bf16 %v5836_v19 }
 0x34b   : > { %v3375_v11 = vsel %vm2584_vm4, %v7688_v30, %v5837_v10  ;;  %v5852_v10 = vunpack.i.l.bf16 %v5851_v44 }
 0x34c   : > { %v5846_v29 = vpop.permute.xlu0 %5845 }
 0x34d   : > { %v5848_v8 = vunpack.i.h.bf16 %v5846_v29  ;;  %v5847_v37 = vunpack.i.l.bf16 %v5846_v29  ;;  %v3345_v61 = vsel %vm2584_vm4, %v7473_v38, %v5852_v10  ;;  %v8681_v38 = vld [vmem:[#allocation43_spill] sm:$0xff] }
 0x34f   : > { %3933 = vmatmul.mubr.bf16.gmra.mrb[68].mxu1 %v7929_v52  ;;  %v3377_v19 = vsel %vm2584_vm4, %v7721_v57, %v5847_v37  ;;  %v3378_v26 = vsel %vm2584_vm4, %v7724_v27, %v5848_v8 }
 0x350   : > { %3940 = vmatprep.mubr.bf16.mxu1 %v3461_v43  ;;  %v3376_v43 = vsel %vm2584_vm4, %v7691_v56, %v5838_v9  ;;  %v5856_v0 = vpop.permute.xlu0 %5855  ;;  %v5853_v9 = vunpack.i.h.bf16 %v5851_v44  ;;  %v3473_v33 = vpack.c.bf16 %v3378_v26, %v3377_v19  ;;  %v8682_v44 = vld [vmem:[#allocation42_spill] sm:$0xff] }
 0x351   : > { %v3469_v6 = vpack.c.bf16 %v3376_v43, %v3375_v11  ;;  %v5858_v28 = vunpack.i.h.bf16 %v5856_v0  ;;  %v5857_v20 = vunpack.i.l.bf16 %v5856_v0  ;;  %v5861_v43 = vpop.permute.xlu1 %5860 }
 0x352   : > { %v3346_v11 = vsel %vm2584_vm4, %v7484_v59, %v5853_v9  ;;  %v5863_v8 = vunpack.i.h.bf16 %v5861_v43  ;;  %v5862_v37 = vunpack.i.l.bf16 %v5861_v43  ;;  %v8683_v9 = vld [vmem:[#allocation54_spill] sm:$0xff] }
 0x353   : > { %v3379_v29 = vsel %vm2584_vm4, %v7712_v49, %v5857_v20  ;;  %v3380_v22 = vsel %vm2584_vm4, %v7715_v50, %v5858_v28 }
 0x354   : > { %v5866_v63 = vpop.permute.xlu0 %5865  ;;  %v3347_v59 = vsel %vm2584_vm4, %v8681_v38, %v5862_v37  ;;  %v3348_v19 = vsel %vm2584_vm4, %v8682_v44, %v5863_v8  ;;  %v8687_v38 = vld [vmem:[#allocation14_spill] sm:$0xff] }
 0x355   : > { %v5868_v15 = vunpack.i.h.bf16 %v5866_v63  ;;  %v5871_v26 = vpop.permute.xlu1 %5870 }
 0x356   : > { %v5873_v28 = vunpack.i.h.bf16 %v5871_v26  ;;  %v5872_v20 = vunpack.i.l.bf16 %v5871_v26  ;;  %v5997_v26 = vld [vmem:[%s8493_s3 + $0x108] sm:$0xff]  }
 0x357   : > { %3941 = vmatmul.mubr.bf16.gmra.mrb[72].mxu1 %v7940_v34  ;;  %v3382_v10 = vsel %vm2584_vm4, %v8683_v9, %v5868_v15  ;;  %v8686_v15 = vld [vmem:[#allocation15_spill] sm:$0xff] }
 0x358   : > { %3948 = vmatprep.mubr.bf16.mxu1 %v3465_v24  ;;  %v7962_v24 = vpack.c.bf16 %v3344_v32, %v3343_v5  ;;  %v3477_v5 = vpack.c.bf16 %v3380_v22, %v3379_v29  ;;  %v5867_v32 = vunpack.i.l.bf16 %v5866_v63  ;;  %v8685_v29 = vld [vmem:[#allocation49_spill] sm:$0xff]  ;;  %v5876_v63 = vpop.permute.xlu0 %5875 }
 0x359   : > { %v3350_v22 = vsel %vm2584_vm4, %v8685_v29, %v5873_v28  ;;  %v5878_v37 = vunpack.i.h.bf16 %v5876_v63  ;;  %v5881_v44 = vpop.permute.xlu1 %5880  ;;  %v8688_v28 = vld [vmem:[#allocation16_spill] sm:$0xff] }
 0x35a   : > { %v3381_v0 = vsel %vm2584_vm4, %v7736_v51, %v5867_v32 }
 0x35b   : > { %v3384_v32 = vsel %vm2584_vm4, %v8686_v15, %v5878_v37 }
 0x35f   : > { %3949 = vmatmul.mubr.bf16.gmra.mrb[76].mxu1 %v7951_v35 }
 0x360   : > { %3956 = vmatprep.mubr.bf16.mxu1 %v3469_v6  ;;  %v7973_v6 = vpack.c.bf16 %v3346_v11, %v3345_v61  ;;  %v3481_v61 = vpack.c.bf16 %v3382_v10, %v3381_v0  ;;  %v8684_v11 = vld [vmem:[#allocation48_spill] sm:$0xff]  ;;  %v5883_v0 = vunpack.i.h.bf16 %v5881_v44  ;;  %v5882_v10 = vunpack.i.l.bf16 %v5881_v44 }
 0x361   : > { %v3349_v43 = vsel %vm2584_vm4, %v8684_v11, %v5872_v20 }
 0x362   : > { %v7991_v8 = vpack.c.bf16 %v3350_v22, %v3349_v43  ;;  %v3385_v20 = vsel %vm2584_vm4, %v8688_v28, %v5882_v10  ;;  %v5886_v43 = vpop.permute.xlu0 %5885 }
 0x363   : > { %v5887_v22 = vunpack.i.l.bf16 %v5886_v43 }
 0x366   : > { %v5896_v10 = vpop.permute.xlu0 %5895 }
 0x367   : > { %3957 = vmatmul.mubr.bf16.gmra.mrb[80].mxu1 %v7962_v24  ;;  %v5898_v28 = vunpack.i.h.bf16 %v5896_v10 }
 0x368   : > { %3964 = vmatprep.mubr.bf16.mxu1 %v3473_v33  ;;  %v7984_v33 = vpack.c.bf16 %v3348_v19, %v3347_v59 }
 0x36f   : > { %3965 = vmatmul.mubr.bf16.gmra.mrb[84].mxu1 %v7973_v6 }
 0x370   : > { %3972 = vmatprep.mubr.bf16.mxu1 %v3477_v5  ;;  %v5877_v5 = vunpack.i.l.bf16 %v5876_v63  ;;  %v8690_v63 = vld [vmem:[#allocation6_spill] sm:$0xff] }
 0x371   : > { %v3387_v37 = vsel %vm2584_vm4, %v8690_v63, %v5887_v22  ;;  %v8696_v63 = vld [vmem:[#allocation21_spill] sm:$0xff] }
 0x372   : > { %v3383_v59 = vsel %vm2584_vm4, %v8687_v38, %v5877_v5  ;;  %v8691_v5 = vld [vmem:[#allocation7_spill] sm:$0xff] }
 0x373   : > { %v3421_v19 = vpack.c.bf16 %v3384_v32, %v3383_v59  ;;  %v5891_v32 = vpop.permute.xlu1 %5890 }
 0x374   : > { %v5893_v59 = vunpack.i.h.bf16 %v5891_v32  ;;  %v5892_v44 = vunpack.i.l.bf16 %v5891_v32 }
 0x377   : > { %3973 = vmatmul.mubr.bf16.gmra.mrb[88].mxu1 %v7984_v33 }
 0x378   : > { %3980 = vmatprep.mubr.bf16.mxu1 %v3481_v61  ;;  %v8689_v61 = vld [vmem:[#allocation17_spill] sm:$0xff] }
 0x379   : > { %v3386_v11 = vsel %vm2584_vm4, %v8689_v61, %v5883_v0  ;;  %v8694_v61 = vld [vmem:[#allocation19_spill] sm:$0xff] }
 0x37a   : > { %v3426_v29 = vpack.c.bf16 %v3386_v11, %v3385_v20  ;;  %v5897_v20 = vunpack.i.l.bf16 %v5896_v10 }
 0x37c   : > { %v3391_v11 = vsel %vm2584_vm4, %v8694_v61, %v5897_v20  ;;  %v8701_v61 = vld [vmem:[#allocation30_spill] sm:$0xff] }
 0x37f   : > { %3981 = vmatmul.mubr.bf16.gmra.mrb[92].mxu1 %v7991_v8 }
 0x380   : > { %4021 = vmatprep.mubr.bf16.mxu1 %v7828_v55  ;;  %v5998_v55 = vld [vmem:[%s8493_s3 + $0x110] sm:$0xff]  }
 0x387   : > { %4022 = vmatmul.mubr.bf16.vlgmr.msra.gmra.mrb[96].mxu1 %v3421_v19  ;;  %v8692_v19 = vld [vmem:[#allocation8_spill] sm:$0xff] }
 0x388   : > { %5366 = vmatpush3.bf16.msra.mxu1 %v7863_v53  ;;  %4029 = vmatprep.mubr.bf16.mxu1 %v7851_v58  ;;  %v5999_v53 = vld [vmem:[%s8493_s3 + $0x118] sm:$0xff]   ;;  %v5888_v58 = vunpack.i.h.bf16 %v5886_v43  ;;  %v8695_v43 = vld [vmem:[#allocation20_spill] sm:$0xff] }
 0x389   : > { %5367 = vmatprep.subr.bf16.mxu1 %v5997_v26 }
 0x38a   : > { %v3388_v15 = vsel %vm2584_vm4, %v8691_v5, %v5888_v58  ;;  %v8697_v5 = vld [vmem:[#allocation22_spill] sm:$0xff] }
 0x38b   : > { %v3430_v38 = vpack.c.bf16 %v3388_v15, %v3387_v37 }
 0x38c   : > { %5368 = vmatpush3.bf16.msra.mxu1 %v5997_v26  ;;  %v3389_v26 = vsel %vm2584_vm4, %v8692_v19, %v5892_v44  ;;  %v8698_v44 = vld [vmem:[#allocation27_spill] sm:$0xff] }
 0x38d   : > { %5369 = vmatprep.subr.bf16.mxu1 %v5998_v55 }
 0x38f   : > { %4030 = vmatmul.mubr.bf16.gmra.mrb[100].mxu1 %v3426_v29  ;;  %v3392_v29 = vsel %vm2584_vm4, %v8695_v43, %v5898_v28  ;;  %v8700_v28 = vld [vmem:[#allocation29_spill] sm:$0xff] }
 0x390   : > { %4037 = vmatprep.mubr.bf16.mxu1 %v7873_v17  ;;  %5370 = vmatpush3.bf16.msra.mxu1 %v5998_v55  ;;  %v8693_v17 = vld [vmem:[#allocation9_spill] sm:$0xff] }
 0x391   : > { %5371 = vmatprep.subr.bf16.mxu1 %v5999_v53  ;;  %v3390_v0 = vsel %vm2584_vm4, %v8693_v17, %v5893_v59 }
 0x392   : > { %v3434_v55 = vpack.c.bf16 %v3390_v0, %v3389_v26  ;;  %v8699_v26 = vld [vmem:[#allocation28_spill] sm:$0xff] }
 0x394   : > { %5372 = vmatpush3.bf16.msra.mxu1 %v5999_v53  ;;  %v3438_v53 = vpack.c.bf16 %v3392_v29, %v3391_v11 }
 0x397   : > { %4038 = vmatmul.mubr.bf16.gmra.mrb[104].mxu1 %v3430_v38 }
 0x398   : > { %4045 = vmatprep.mubr.bf16.mxu1 %v7885_v21  ;;  %v5901_v21 = vpop.permute.xlu1 %5900 }
 0x399   : > { %v5903_v58 = vunpack.i.h.bf16 %v5901_v21  ;;  %v5902_v22 = vunpack.i.l.bf16 %v5901_v21 }
 0x39b   : > { %v3393_v37 = vsel %vm2584_vm4, %v8696_v63, %v5902_v22  ;;  %v3394_v15 = vsel %vm2584_vm4, %v8697_v5, %v5903_v58  ;;  %v8703_v22 = vld [vmem:[#allocation34_spill] sm:$0xff] }
 0x39c   : > { %v3442_v32 = vpack.c.bf16 %v3394_v15, %v3393_v37 }
 0x39f   : > { %4046 = vmatmul.mubr.bf16.gmra.mrb[108].mxu1 %v3434_v55 }
 0x3a0   : > { %4053 = vmatprep.mubr.bf16.mxu1 %v7896_v54  ;;  %v5906_v54 = vpop.permute.xlu0 %5905 }
 0x3a1   : > { %v5908_v38 = vunpack.i.h.bf16 %v5906_v54  ;;  %v5907_v59 = vunpack.i.l.bf16 %v5906_v54  ;;  %v8704_v54 = vld [vmem:[#allocation35_spill] sm:$0xff] }
 0x3a3   : > { %v3395_v19 = vsel %vm2584_vm4, %v8698_v44, %v5907_v59  ;;  %v3396_v17 = vsel %vm2584_vm4, %v8699_v26, %v5908_v38  ;;  %v8705_v38 = vld [vmem:[#allocation36_spill] sm:$0xff] }
 0x3a4   : > { %v3446_v0 = vpack.c.bf16 %v3396_v17, %v3395_v19  ;;  %v8706_v17 = vld [vmem:[#allocation38_spill] sm:$0xff] }
 0x3a7   : > { %4054 = vmatmul.mubr.bf16.gmra.mrb[112].mxu1 %v3438_v53  ;;  %v8702_v53 = vld [vmem:[#allocation33_spill] sm:$0xff] }
 0x3a8   : > { %4061 = vmatprep.mubr.bf16.mxu1 %v7907_v41  ;;  %v5911_v41 = vpop.permute.xlu1 %5910 }
 0x3a9   : > { %v5913_v10 = vunpack.i.h.bf16 %v5911_v41  ;;  %v5912_v55 = vunpack.i.l.bf16 %v5911_v41 }
 0x3ab   : > { %v3397_v20 = vsel %vm2584_vm4, %v8700_v28, %v5912_v55  ;;  %v3398_v11 = vsel %vm2584_vm4, %v8701_v61, %v5913_v10 }
 0x3ac   : > { %v3450_v43 = vpack.c.bf16 %v3398_v11, %v3397_v20  ;;  %v8708_v11 = vld [vmem:[#allocation40_spill] sm:$0xff] }
 0x3af   : > { %4062 = vmatmul.mubr.bf16.gmra.mrb[116].mxu1 %v3442_v32 }
 0x3b0   : > { %4069 = vmatprep.mubr.bf16.mxu1 %v7918_v46  ;;  %v5916_v46 = vpop.permute.xlu0 %5915 }
 0x3b1   : > { %v5918_v29 = vunpack.i.h.bf16 %v5916_v46  ;;  %v5917_v21 = vunpack.i.l.bf16 %v5916_v46 }
 0x3b3   : > { %v3399_v58 = vsel %vm2584_vm4, %v8702_v53, %v5917_v21  ;;  %v3400_v63 = vsel %vm2584_vm4, %v8703_v22, %v5918_v29 }
 0x3b4   : > { %v3454_v37 = vpack.c.bf16 %v3400_v63, %v3399_v58 }
 0x3b7   : > { %4070 = vmatmul.mubr.bf16.gmra.mrb[120].mxu1 %v3446_v0  ;;  %v8707_v0 = vld [vmem:[#allocation39_spill] sm:$0xff] }
 0x3b8   : > { %4077 = vmatprep.mubr.bf16.mxu1 %v7929_v52  ;;  %v5921_v52 = vpop.permute.xlu1 %5920 }
 0x3b9   : > { %v5923_v5 = vunpack.i.h.bf16 %v5921_v52  ;;  %v5922_v15 = vunpack.i.l.bf16 %v5921_v52 }
 0x3bb   : > { %v3401_v32 = vsel %vm2584_vm4, %v8704_v54, %v5922_v15  ;;  %v3402_v59 = vsel %vm2584_vm4, %v8705_v38, %v5923_v5  ;;  %v8710_v15 = vld [vmem:[#allocation44_spill] sm:$0xff] }
 0x3bc   : > { %v3458_v44 = vpack.c.bf16 %v3402_v59, %v3401_v32  ;;  %v8711_v32 = vld [vmem:[#allocation45_spill] sm:$0xff] }
 0x3bf   : > { %4078 = vmatmul.mubr.bf16.gmra.mrb[124].mxu1 %v3450_v43  ;;  %v8709_v43 = vld [vmem:[#allocation41_spill] sm:$0xff] }
 0x3c0   : > { %4085 = vmatprep.mubr.bf16.mxu1 %v7940_v34  ;;  %v5926_v34 = vpop.permute.xlu0 %5925 }
 0x3c1   : > { %v5928_v19 = vunpack.i.h.bf16 %v5926_v34  ;;  %v5927_v26 = vunpack.i.l.bf16 %v5926_v34 }
 0x3c3   : > { %v3403_v41 = vsel %vm2584_vm4, %v8706_v17, %v5927_v26  ;;  %v3404_v10 = vsel %vm2584_vm4, %v8707_v0, %v5928_v19 }
 0x3c4   : > { %v3462_v55 = vpack.c.bf16 %v3404_v10, %v3403_v41  ;;  %v5936_v29 = vpop.permute.xlu0 %5935 }
 0x3c5   : > { %v5938_v52 = vunpack.i.h.bf16 %v5936_v29 }
 0x3c7   : > { %4086 = vmatmul.mubr.bf16.gmra.mrb[128].mxu1 %v3454_v37  ;;  %v5937_v37 = vunpack.i.l.bf16 %v5936_v29  ;;  %v3408_v38 = vsel %vm2584_vm4, %v8711_v32, %v5938_v52 }
 0x3c8   : > { %4093 = vmatprep.mubr.bf16.mxu1 %v7951_v35  ;;  %v5931_v35 = vpop.permute.xlu1 %5930 }
 0x3c9   : > { %v5933_v28 = vunpack.i.h.bf16 %v5931_v35  ;;  %v5932_v20 = vunpack.i.l.bf16 %v5931_v35  ;;  %v3407_v54 = vsel %vm2584_vm4, %v8710_v15, %v5937_v37 }
 0x3ca   : > { %v3470_v41 = vpack.c.bf16 %v3408_v38, %v3407_v54 }
 0x3cb   : > { %v3405_v46 = vsel %vm2584_vm4, %v8708_v11, %v5932_v20  ;;  %v8712_v20 = vld [vmem:[#allocation46_spill] sm:$0xff]  ;;  %v8713_v11 = vld [vmem:[#allocation47_spill] sm:$0xff] }
 0x3cc   : > { %v5941_v59 = vpop.permute.xlu1 %5940 }
 0x3cd   : > { %v5943_v0 = vunpack.i.h.bf16 %v5941_v59  ;;  %v5942_v10 = vunpack.i.l.bf16 %v5941_v59 }
 0x3cf   : > { %4094 = vmatmul.mubr.bf16.gmra.mrb[132].mxu1 %v3458_v44  ;;  %v5946_v44 = vpop.permute.xlu0 %5945 }
 0x3d0   : > { %4101 = vmatprep.mubr.bf16.mxu1 %v7962_v24  ;;  %v3406_v24 = vsel %vm2584_vm4, %v8709_v43, %v5933_v28 }
 0x3d1   : > { %v3466_v63 = vpack.c.bf16 %v3406_v24, %v3405_v46  ;;  %v3410_v46 = vsel %vm2584_vm4, %v8713_v11, %v5943_v0  ;;  %v5951_v24 = vpop.permute.xlu1 %5950 }
 0x3d2   : > { %v5953_v32 = vunpack.i.h.bf16 %v5951_v24  ;;  %v5952_v38 = vunpack.i.l.bf16 %v5951_v24 }
 0x3d3   : > { %v5956_v43 = vpop.permute.xlu0 %5955 }
 0x3d4   : > { %v5958_v15 = vunpack.i.h.bf16 %v5956_v43  ;;  %v5957_v54 = vunpack.i.l.bf16 %v5956_v43 }
 0x3d7   : > { %4102 = vmatmul.mubr.bf16.gmra.mrb[136].mxu1 %v3462_v55  ;;  %v5947_v55 = vunpack.i.l.bf16 %v5946_v44 }
 0x3d8   : > { %4109 = vmatprep.mubr.bf16.mxu1 %v7973_v6 }
 0x3da   : > { %v4831_v61 = vpop.f32.mrb[32].mxu1 }
 0x3db   : > { %v4832_v21 = vpop.f32.mrb[33].mxu1 }
 0x3dc   : > { %v8064_v53 = vadd.f32 %v4832_v21, %v4831_v61  ;;  %v4834_v58 = vpop.f32.mrb[34].mxu1  ;;  %v3409_v61 = vsel %vm2584_vm4, %v8712_v20, %v5942_v10  ;;  %v6000_v21 = vld [vmem:[#allocation2 + $0x180] sm:$0xff]  ;;  %v8715_v10 = vld [vmem:[#allocation51_spill] sm:$0xff] }
 0x3dd   : > { %v4835_v22 = vpop.f32.mrb[35].mxu1 }
 0x3de   : > { %v8066_v5 = vadd.f32 %v4835_v22, %v4834_v58  ;;  %v3415_v58 = vsel %vm2584_vm4, %v6000_v21, %v5947_v55  ;;  %v6001_v22 = vld [vmem:[#allocation2 + $0x188] sm:$0xff]  ;;  %v5961_v55 = vpop.permute.xlu1 %5960 }
 0x3df   : > { %4110 = vmatmul.mubr.bf16.gmra.mrb[140].mxu1 %v3466_v63  ;;  %v5963_v24 = vunpack.i.h.bf16 %v5961_v55 }
 0x3e0   : > { %4117 = vmatprep.mubr.bf16.mxu1 %v7984_v33  ;;  %v5948_v33 = vunpack.i.h.bf16 %v5946_v44  ;;  %v3417_v44 = vsel %vm2584_vm4, %v7765_v12, %v5957_v54 }
 0x3e2   : > { %v4837_v6 = vpop.f32.mrb[36].mxu1  ;;  %v3416_v63 = vsel %vm2584_vm4, %v6001_v22, %v5948_v33  ;;  %v3412_v33 = vsel %vm2584_vm4, %v8715_v10, %v5953_v32  ;;  %v8716_v22 = vld [vmem:[#allocation55_spill] sm:$0xff]  ;;  %v3428_v10 = vpack.c.bf16 %v7590_v14, %v7587_v31  ;;  %v3440_v14 = vpack.c.bf16 %v7606_v1, %v7603_v45 }
 0x3e3   : > { %v4838_v34 = vpop.f32.mrb[37].mxu1 }
 0x3e4   : > { %v8073_v19 = vadd.f32 %v4838_v34, %v4837_v6  ;;  %v4840_v26 = vpop.f32.mrb[38].mxu1  ;;  %v3474_v6 = vpack.c.bf16 %v3410_v46, %v3409_v61  ;;  %v3479_v34 = vpack.c.bf16 %v3416_v63, %v3415_v58 }
 0x3e5   : > { %v4841_v17 = vpop.f32.mrb[39].mxu1 }
 0x3e6   : > { %v8075_v35 = vadd.f32 %v4841_v17, %v4840_v26  ;;  %v3418_v26 = vsel %vm2584_vm4, %v7767_v36, %v5958_v15 }
 0x3e7   : > { %4118 = vmatmul.mubr.bf16.gmra.mrb[144].mxu1 %v3470_v41  ;;  %v8714_v41 = vld [vmem:[#allocation50_spill] sm:$0xff]  ;;  %v3483_v11 = vpack.c.bf16 %v3418_v26, %v3417_v44  ;;  %v3423_v44 = vpack.c.bf16 %v7561_v60, %v7554_v23 }
 0x3e8   : > { %4125 = vmatprep.mubr.bf16.mxu1 %v7991_v8  ;;  %v3411_v0 = vsel %vm2584_vm4, %v8714_v41, %v5952_v38 }
 0x3e9   : > { %v3478_v43 = vpack.c.bf16 %v3412_v33, %v3411_v0 }
 0x3ea   : > { %v4843_v28 = vpop.f32.mrb[40].mxu1 }
 0x3eb   : > { %v4844_v29 = vpop.f32.mrb[41].mxu1 }
 0x3ec   : > { %v8084_v52 = vadd.f32 %v4844_v29, %v4843_v28  ;;  %v4846_v37 = vpop.f32.mrb[42].mxu1  ;;  %v5962_v29 = vunpack.i.l.bf16 %v5961_v55 }
 0x3ed   : > { %v4847_v8 = vpop.f32.mrb[43].mxu1 }
 0x3ee   : > { %v8086_v59 = vadd.f32 %v4847_v8, %v4846_v37  ;;  %v3413_v63 = vsel %vm2584_vm4, %v8716_v22, %v5962_v29  ;;  %v8717_v37 = vld [vmem:[#allocation56_spill] sm:$0xff]  ;;  %v3444_v22 = vpack.c.bf16 %v7645_v13, %v7636_v4  ;;  %v3456_v4 = vpack.c.bf16 %v7667_v40, %v7664_v47 }
 0x3ef   : > { %4126 = vmatmul.mubr.bf16.gmra.mrb[148].mxu1 %v3474_v6  ;;  %v3414_v8 = vsel %vm2584_vm4, %v8717_v37, %v5963_v24 }
 0x3f0   : > { %4133 = vmatprep.mubr.bf16.mxu1 %v3479_v34  ;;  %v3482_v38 = vpack.c.bf16 %v3414_v8, %v3413_v63 }
 0x3f2   : > { %v4849_v17 = vpop.f32.mrb[44].mxu1 }
 0x3f3   : > { %v4850_v28 = vpop.f32.mrb[45].mxu1 }
 0x3f4   : > { %v8096_v20 = vadd.f32 %v4850_v28, %v4849_v17  ;;  %v4852_v61 = vpop.f32.mrb[46].mxu1  ;;  %v3432_v28 = vpack.c.bf16 %v7577_v2, %v7573_v48 }
 0x3f5   : > { %v4853_v46 = vpop.f32.mrb[47].mxu1 }
 0x3f6   : > { %v8098_v21 = vadd.f32 %v4853_v46, %v4852_v61 }
 0x3f7   : > { %4134 = vmatmul.mubr.bf16.gmra.mrb[152].mxu1 %v3478_v43  ;;  %v3436_v43 = vpack.c.bf16 %v7626_v3, %v7623_v39  ;;  %v3448_v3 = vpack.c.bf16 %v7633_v42, %v7629_v25 }
 0x3f8   : > { %4141 = vmatprep.mubr.bf16.mxu1 %v3483_v11 }
 0x3fa   : > { %v4855_v58 = vpop.f32.mrb[48].mxu1 }
 0x3fb   : > { %v4856_v6 = vpop.f32.mrb[49].mxu1 }
 0x3fc   : > { %v8104_v15 = vadd.f32 %v4856_v6, %v4855_v58  ;;  %v4858_v54 = vpop.f32.mrb[50].mxu1  ;;  %v3452_v6 = vpack.c.bf16 %v7675_v16, %v7672_v18  ;;  %v3464_v16 = vpack.c.bf16 %v7691_v56, %v7688_v30 }
 0x3fd   : > { %v4859_v32 = vpop.f32.mrb[51].mxu1 }
 0x3fe   : > { %v8106_v34 = vadd.f32 %v4859_v32, %v4858_v54 }
 0x3ff   : > { %4142 = vmatmul.mubr.bf16.gmra.mrb[156].mxu1 %v3482_v38 }
 0x400   : > { %5373 = vmatprep.mubr.msk.bf16.mxu1 %vm2584_vm4, %v3423_v44  ;;  %v3460_v44 = vpack.c.bf16 %v7697_v62, %v7694_v7  ;;  %v3472_v7 = vpack.c.bf16 %v7715_v50, %v7712_v49  ;;  %v8718_v62 = vld [vmem:[#allocation57_spill] sm:$0xff] }
 0x401   : > { %v8719_v50 = vld [vmem:[#allocation53_spill] sm:$0xff] }
 0x402   : > { %v4861_v26 = vpop.f32.mrb[52].mxu1 }
 0x403   : > { %v4862_v17 = vpop.f32.mrb[53].mxu1 }
 0x404   : > { %v8111_v41 = vadd.f32 %v4862_v17, %v4861_v26  ;;  %v4864_v0 = vpop.f32.mrb[54].mxu1 }
 0x405   : > { %v4865_v33 = vpop.f32.mrb[55].mxu1 }
 0x406   : > { %v8115_v55 = vadd.f32 %v4865_v33, %v4864_v0 }
 0x407   : > { %5374 = vmatmul.mubr.msk.bf16.vlgmr.msra.gmra.mrb[160].mxu1 %vm2584_vm4, %v3428_v10  ;;  %v3468_v10 = vpack.c.bf16 %v7724_v27, %v7721_v57  ;;  %v3311_v27 = vrot.slane %v7767_v36, 2 }
 0x408   : > { %5377 = vmatprep.mubr.msk.bf16.mxu1 %vm2584_vm4, %v3432_v28  ;;  %v3313_v28 = vrot.slane %v8718_v62, 2 }
 0x40a   : > { %v4867_v23 = vpop.f32.mrb[56].mxu1 }
 0x40b   : > { %v4868_v60 = vpop.f32.mrb[57].mxu1 }
 0x40c   : > { %v8121_v61 = vadd.f32 %v4868_v60, %v4867_v23  ;;  %v4870_v11 = vpop.f32.mrb[58].mxu1 }
 0x40d   : > { %v4871_v46 = vpop.f32.mrb[59].mxu1 }
 0x40e   : > { %v8125_v31 = vadd.f32 %v4871_v46, %v4870_v11  ;;  %v3310_v11 = vrot.slane %v7765_v12, 2  ;;  %v3476_v46 = vpack.c.bf16 %v8683_v9, %v7736_v51 }
 0x40f   : > { %5378 = vmatmul.mubr.msk.bf16.gmra.mrb[164].mxu1 %vm2584_vm4, %v3436_v43  ;;  %v8720_v43 = vld [vmem:[#allocation52_spill] sm:$0xff] }
 0x410   : > { %5381 = vmatprep.mubr.msk.bf16.mxu1 %vm2584_vm4, %v3440_v14  ;;  %v8721_v14 = vpack.c.bf16 %v8719_v50, %v8720_v43 }
 0x412   : > { %v4873_v48 = vpop.f32.mrb[60].mxu1 }
 0x413   : > { %v4874_v2 = vpop.f32.mrb[61].mxu1 }
 0x414   : > { %v8131_v24 = vadd.f32 %v4874_v2, %v4873_v48  ;;  %v4876_v29 = vpop.f32.mrb[62].mxu1  ;;  %v3312_v48 = vsel %vm906_vm1, %v3310_v11, %v3311_v27  ;;  %v3314_v2 = vsel %vm906_vm1, %v3311_v27, %v3313_v28 }
 0x415   : > { %v4877_v58 = vpop.f32.mrb[63].mxu1  ;;  %v3484_v36 = vpack.c.bf16 %v3314_v2, %v3312_v48 }
 0x416   : > { %v8135_v63 = vadd.f32 %v4877_v58, %v4876_v29 }
 0x417   : > { %5382 = vmatmul.mubr.msk.bf16.gmra.mrb[168].mxu1 %vm2584_vm4, %v3444_v22 }
 0x418   : > { %5385 = vmatprep.mubr.msk.bf16.mxu1 %vm2584_vm4, %v3448_v3 }
 0x41a   : > { %v4879_v39 = vpop.f32.mrb[64].mxu1 }
 0x41b   : > { %v4880_v45 = vpop.f32.mrb[65].mxu1 }
 0x41c   : > { %v8141_v1 = vadd.f32 %v4880_v45, %v4879_v39  ;;  %v4882_v37 = vpop.f32.mrb[66].mxu1 }
 0x41d   : > { %v4883_v8 = vpop.f32.mrb[67].mxu1 }
 0x41e   : > { %v8145_v54 = vadd.f32 %v4883_v8, %v4882_v37 }
 0x41f   : > { %5386 = vmatmul.mubr.msk.bf16.gmra.mrb[172].mxu1 %vm2584_vm4, %v3452_v6 }
 0x420   : > { %5389 = vmatprep.mubr.msk.bf16.mxu1 %vm2584_vm4, %v3456_v4 }
 0x422   : > { %v4885_v42 = vpop.f32.mrb[68].mxu1 }
 0x423   : > { %v4886_v25 = vpop.f32.mrb[69].mxu1 }
 0x424   : > { %v8151_v13 = vadd.f32 %v4886_v25, %v4885_v42  ;;  %v4888_v32 = vpop.f32.mrb[70].mxu1 }
 0x425   : > { %v4889_v38 = vpop.f32.mrb[71].mxu1 }
 0x426   : > { %v8155_v26 = vadd.f32 %v4889_v38, %v4888_v32 }
 0x427   : > { %5390 = vmatmul.mubr.msk.bf16.gmra.mrb[176].mxu1 %vm2584_vm4, %v3460_v44 }
 0x428   : > { %5393 = vmatprep.mubr.msk.bf16.mxu1 %vm2584_vm4, %v3464_v16 }
 0x42a   : > { %v4891_v47 = vpop.f32.mrb[72].mxu1 }
 0x42b   : > { %v4892_v40 = vpop.f32.mrb[73].mxu1 }
 0x42c   : > { %v8161_v18 = vadd.f32 %v4892_v40, %v4891_v47  ;;  %v4894_v17 = vpop.f32.mrb[74].mxu1 }
 0x42d   : > { %v4895_v0 = vpop.f32.mrb[75].mxu1 }
 0x42e   : > { %v8165_v33 = vadd.f32 %v4895_v0, %v4894_v17 }
 0x42f   : > { %5394 = vmatmul.mubr.msk.bf16.gmra.mrb[180].mxu1 %vm2584_vm4, %v3468_v10 }
 0x430   : > { %5397 = vmatprep.mubr.msk.bf16.mxu1 %vm2584_vm4, %v3472_v7  ;;  %v8207_v7 = vld [vmem:[%s8494_s4] ss:$0 sm:$0xff] }
 0x431   : > { %v3863_v62 = vadd.f32 %v8064_v53, %v8207_v7  ;;  %v3866_v27 = vadd.f32 %v8066_v5, %v8207_v7  ;;  %v3871_v48 = vadd.f32 %v8073_v19, %v8207_v7  ;;  %v3874_v53 = vadd.f32 %v8075_v35, %v8207_v7 }
 0x432   : > { %v4897_v30 = vpop.f32.mrb[76].mxu1  ;;  %v3882_v19 = vadd.f32 %v8086_v59, %v8207_v7 }
 0x433   : > { %v4898_v56 = vpop.f32.mrb[77].mxu1 }
 0x434   : > { %v8172_v23 = vadd.f32 %v4898_v56, %v4897_v30  ;;  %v4900_v60 = vpop.f32.mrb[78].mxu1 }
 0x435   : > { %v4901_v57 = vpop.f32.mrb[79].mxu1 }
 0x436   : > { %v8178_v49 = vadd.f32 %v4901_v57, %v4900_v60 }
 0x437   : > { %5398 = vmatmul.mubr.msk.bf16.gmra.mrb[184].mxu1 %vm2584_vm4, %v3476_v46 }
 0x438   : > { %5401 = vmatprep.mubr.msk.bf16.mxu1 %vm2584_vm4, %v8721_v14 }
 0x43a   : > { %v4903_v12 = vpop.f32.mrb[80].mxu1 }
 0x43b   : > { %v4904_v29 = vpop.f32.mrb[81].mxu1 }
 0x43c   : > { %v8187_v58 = vadd.f32 %v4904_v29, %v4903_v12  ;;  %v4906_v22 = vpop.f32.mrb[82].mxu1 }
 0x43d   : > { %v4907_v51 = vpop.f32.mrb[83].mxu1 }
 0x43e   : > { %v8189_v9 = vadd.f32 %v4907_v51, %v4906_v22 }
 0x43f   : > { %5402 = vmatmul.mubr.msk.bf16.gmra.mrb[188].mxu1 %vm2584_vm4, %v3484_v36 }
 0x442   : > { %v4909_v3 = vpop.f32.mrb[84].mxu1 }
 0x443   : > { %v4910_v39 = vpop.f32.mrb[85].mxu1 }
 0x444   : > { %v8192_v45 = vadd.f32 %v4910_v39, %v4909_v3  ;;  %v4912_v37 = vpop.f32.mrb[86].mxu1  ;;  %v3879_v39 = vadd.f32 %v8084_v52, %v8207_v7  ;;  %v3890_v52 = vadd.f32 %v8098_v21, %v8207_v7 }
 0x445   : > { %v4913_v8 = vpop.f32.mrb[87].mxu1 }
 0x446   : > { %v8194_v6 = vadd.f32 %v4913_v8, %v4912_v37 }
 0x44a   : > { %v4915_v4 = vpop.f32.mrb[88].mxu1 }
 0x44b   : > { %v4916_v42 = vpop.f32.mrb[89].mxu1 }
 0x44c   : > { %v8196_v25 = vadd.f32 %v4916_v42, %v4915_v4  ;;  %v4918_v32 = vpop.f32.mrb[90].mxu1 }
 0x44d   : > { %v4919_v38 = vpop.f32.mrb[91].mxu1 }
 0x44e   : > { %v8198_v44 = vadd.f32 %v4919_v38, %v4918_v32 }
 0x452   : > { %v4921_v16 = vpop.f32.mrb[92].mxu1 }
 0x453   : > { %v4922_v47 = vpop.f32.mrb[93].mxu1 }
 0x454   : > { %v8200_v40 = vadd.f32 %v4922_v47, %v4921_v16  ;;  %v4924_v17 = vpop.f32.mrb[94].mxu1  ;;  %v3887_v47 = vadd.f32 %v8096_v20, %v8207_v7  ;;  %v3898_v20 = vadd.f32 %v8106_v34, %v8207_v7 }
 0x455   : > { %v4925_v0 = vpop.f32.mrb[95].mxu1 }
 0x456   : > { %v8202_v10 = vadd.f32 %v4925_v0, %v4924_v17 }
 0x45a   : > { %v4943_v30 = vpop.f32.mrb[96].mxu1 }
 0x45b   : > { %v4944_v56 = vpop.f32.mrb[97].mxu1 }
 0x45c   : > { %v4945_v28 = vadd.f32 %v4944_v56, %v4943_v30  ;;  %v4946_v60 = vpop.f32.mrb[98].mxu1 }
 0x45d   : > { %v4947_v11 = vpop.f32.mrb[99].mxu1 }
 0x45e   : > { %v4948_v57 = vadd.f32 %v4947_v11, %v4946_v60  ;;  %v8213_v46 = vadd.f32 %v4945_v28, %v3863_v62  ;;  %v3895_v11 = vadd.f32 %v8104_v15, %v8207_v7  ;;  %v3906_v15 = vadd.f32 %v8115_v55, %v8207_v7 }
 0x460   : > { %v8215_v50 = vadd.f32 %v4948_v57, %v3866_v27 }
 0x462   : > { %v4949_v43 = vpop.f32.mrb[100].mxu1 }
 0x463   : > { %v4950_v14 = vpop.f32.mrb[101].mxu1 }
 0x464   : > { %v4951_v2 = vadd.f32 %v4950_v14, %v4949_v43  ;;  %v4952_v12 = vpop.f32.mrb[102].mxu1 }
 0x465   : > { %v4953_v29 = vpop.f32.mrb[103].mxu1 }
 0x466   : > { %v4954_v36 = vadd.f32 %v4953_v29, %v4952_v12  ;;  %v8221_v22 = vadd.f32 %v4951_v2, %v3871_v48  ;;  %v3903_v29 = vadd.f32 %v8111_v41, %v8207_v7  ;;  %v3914_v41 = vadd.f32 %v8125_v31, %v8207_v7 }
 0x468   : > { %v8223_v5 = vadd.f32 %v4954_v36, %v3874_v53 }
 0x46a   : > { %v4955_v51 = vpop.f32.mrb[104].mxu1 }
 0x46b   : > { %v4956_v3 = vpop.f32.mrb[105].mxu1 }
 0x46c   : > { %v4957_v37 = vadd.f32 %v4956_v3, %v4955_v51  ;;  %v4958_v8 = vpop.f32.mrb[106].mxu1 }
 0x46d   : > { %v4959_v4 = vpop.f32.mrb[107].mxu1 }
 0x46e   : > { %v4960_v42 = vadd.f32 %v4959_v4, %v4958_v8  ;;  %v8229_v32 = vadd.f32 %v4957_v37, %v3879_v39  ;;  %v3911_v4 = vadd.f32 %v8121_v61, %v8207_v7  ;;  %v3922_v61 = vadd.f32 %v8135_v63, %v8207_v7 }
 0x470   : > { %v8231_v35 = vadd.f32 %v4960_v42, %v3882_v19 }
 0x472   : > { %v4961_v38 = vpop.f32.mrb[108].mxu1 }
 0x473   : > { %v4962_v16 = vpop.f32.mrb[109].mxu1 }
 0x474   : > { %v4963_v17 = vadd.f32 %v4962_v16, %v4961_v38  ;;  %v4964_v0 = vpop.f32.mrb[110].mxu1 }
 0x475   : > { %v4965_v30 = vpop.f32.mrb[111].mxu1 }
 0x476   : > { %v4966_v56 = vadd.f32 %v4965_v30, %v4964_v0  ;;  %v8237_v62 = vadd.f32 %v4963_v17, %v3887_v47  ;;  %v3919_v30 = vadd.f32 %v8131_v24, %v8207_v7  ;;  %v3930_v24 = vadd.f32 %v8145_v54, %v8207_v7 }
 0x478   : > { %v8239_v59 = vadd.f32 %v4966_v56, %v3890_v52 }
 0x47a   : > { %v4967_v28 = vpop.f32.mrb[112].mxu1 }
 0x47b   : > { %v4968_v60 = vpop.f32.mrb[113].mxu1 }
 0x47c   : > { %v4969_v27 = vadd.f32 %v4968_v60, %v4967_v28  ;;  %v4970_v57 = vpop.f32.mrb[114].mxu1 }
 0x47d   : > { %v4971_v43 = vpop.f32.mrb[115].mxu1 }
 0x47e   : > { %v4972_v14 = vadd.f32 %v4971_v43, %v4970_v57  ;;  %v8245_v48 = vadd.f32 %v4969_v27, %v3895_v11  ;;  %v3927_v43 = vadd.f32 %v8141_v1, %v8207_v7  ;;  %v3938_v1 = vadd.f32 %v8155_v26, %v8207_v7 }
 0x480   : > { %v8247_v21 = vadd.f32 %v4972_v14, %v3898_v20 }
 0x482   : > { %v4973_v2 = vpop.f32.mrb[116].mxu1 }
 0x483   : > { %v4974_v12 = vpop.f32.mrb[117].mxu1 }
 0x484   : > { %v4975_v53 = vadd.f32 %v4974_v12, %v4973_v2  ;;  %v4976_v36 = vpop.f32.mrb[118].mxu1 }
 0x485   : > { %v4977_v51 = vpop.f32.mrb[119].mxu1 }
 0x486   : > { %v4978_v3 = vadd.f32 %v4977_v51, %v4976_v36  ;;  %v8253_v39 = vadd.f32 %v4975_v53, %v3903_v29  ;;  %v3935_v51 = vadd.f32 %v8151_v13, %v8207_v7  ;;  %v3946_v13 = vadd.f32 %v8165_v33, %v8207_v7 }
 0x488   : > { %v8255_v34 = vadd.f32 %v4978_v3, %v3906_v15 }
 0x48a   : > { %v4979_v37 = vpop.f32.mrb[120].mxu1 }
 0x48b   : > { %v4980_v8 = vpop.f32.mrb[121].mxu1 }
 0x48c   : > { %v4981_v19 = vadd.f32 %v4980_v8, %v4979_v37  ;;  %v4982_v42 = vpop.f32.mrb[122].mxu1 }
 0x48d   : > { %v4983_v38 = vpop.f32.mrb[123].mxu1 }
 0x48e   : > { %v4984_v16 = vadd.f32 %v4983_v38, %v4982_v42  ;;  %v8261_v47 = vadd.f32 %v4981_v19, %v3911_v4  ;;  %v3943_v38 = vadd.f32 %v8161_v18, %v8207_v7  ;;  %v3954_v18 = vadd.f32 %v8178_v49, %v8207_v7 }
 0x490   : > { %v8263_v55 = vadd.f32 %v4984_v16, %v3914_v41 }
 0x492   : > { %v4985_v17 = vpop.f32.mrb[124].mxu1 }
 0x493   : > { %v4986_v0 = vpop.f32.mrb[125].mxu1 }
 0x494   : > { %v4987_v52 = vadd.f32 %v4986_v0, %v4985_v17  ;;  %v4988_v56 = vpop.f32.mrb[126].mxu1 }
 0x495   : > { %v4989_v28 = vpop.f32.mrb[127].mxu1 }
 0x496   : > { %v4990_v60 = vadd.f32 %v4989_v28, %v4988_v56  ;;  %v8269_v11 = vadd.f32 %v4987_v52, %v3919_v30  ;;  %v3951_v28 = vadd.f32 %v8172_v23, %v8207_v7  ;;  %v3962_v23 = vadd.f32 %v8189_v9, %v8207_v7 }
 0x498   : > { %v8271_v31 = vadd.f32 %v4990_v60, %v3922_v61 }
 0x49a   : > { %v4991_v27 = vpop.f32.mrb[128].mxu1 }
 0x49b   : > { %v4992_v57 = vpop.f32.mrb[129].mxu1 }
 0x49c   : > { %v4993_v20 = vadd.f32 %v4992_v57, %v4991_v27  ;;  %v4994_v14 = vpop.f32.mrb[130].mxu1 }
 0x49d   : > { %v4995_v2 = vpop.f32.mrb[131].mxu1 }
 0x49e   : > { %v4996_v12 = vadd.f32 %v4995_v2, %v4994_v14  ;;  %v8277_v29 = vadd.f32 %v4993_v20, %v3927_v43  ;;  %v3959_v2 = vadd.f32 %v8187_v58, %v8207_v7  ;;  %v3970_v58 = vadd.f32 %v8194_v6, %v8207_v7 }
 0x4a0   : > { %v8279_v63 = vadd.f32 %v4996_v12, %v3930_v24 }
 0x4a2   : > { %v4997_v53 = vpop.f32.mrb[132].mxu1 }
 0x4a3   : > { %v4998_v36 = vpop.f32.mrb[133].mxu1 }
 0x4a4   : > { %v4999_v15 = vadd.f32 %v4998_v36, %v4997_v53  ;;  %v5000_v3 = vpop.f32.mrb[134].mxu1 }
 0x4a5   : > { %v5001_v37 = vpop.f32.mrb[135].mxu1 }
 0x4a6   : > { %v5002_v8 = vadd.f32 %v5001_v37, %v5000_v3  ;;  %v8285_v4 = vadd.f32 %v4999_v15, %v3935_v51  ;;  %v3967_v37 = vadd.f32 %v8192_v45, %v8207_v7 }
 0x4a8   : > { %v8287_v54 = vadd.f32 %v5002_v8, %v3938_v1 }
 0x4aa   : > { %v5003_v19 = vpop.f32.mrb[136].mxu1 }
 0x4ab   : > { %v5004_v42 = vpop.f32.mrb[137].mxu1 }
 0x4ac   : > { %v5005_v41 = vadd.f32 %v5004_v42, %v5003_v19  ;;  %v5006_v16 = vpop.f32.mrb[138].mxu1 }
 0x4ad   : > { %v5007_v17 = vpop.f32.mrb[139].mxu1 }
 0x4ae   : > { %v5008_v0 = vadd.f32 %v5007_v17, %v5006_v16  ;;  %v8293_v30 = vadd.f32 %v5005_v41, %v3943_v38  ;;  %v3975_v17 = vadd.f32 %v8196_v25, %v8207_v7 }
 0x4b0   : > { %v8295_v26 = vadd.f32 %v5008_v0, %v3946_v13 }
 0x4b2   : > { %v5009_v52 = vpop.f32.mrb[140].mxu1 }
 0x4b3   : > { %v5010_v56 = vpop.f32.mrb[141].mxu1 }
 0x4b4   : > { %v5011_v61 = vadd.f32 %v5010_v56, %v5009_v52  ;;  %v5012_v60 = vpop.f32.mrb[142].mxu1  ;;  %v3978_v52 = vadd.f32 %v8198_v44, %v8207_v7 }
 0x4b5   : > { %v5013_v27 = vpop.f32.mrb[143].mxu1 }
 0x4b6   : > { %v5014_v57 = vadd.f32 %v5013_v27, %v5012_v60  ;;  %v8301_v43 = vadd.f32 %v5011_v61, %v3951_v28  ;;  %v3983_v27 = vadd.f32 %v8200_v40, %v8207_v7 }
 0x4b8   : > { %v8303_v33 = vadd.f32 %v5014_v57, %v3954_v18 }
 0x4ba   : > { %v5015_v20 = vpop.f32.mrb[144].mxu1 }
 0x4bb   : > { %v5016_v14 = vpop.f32.mrb[145].mxu1 }
 0x4bc   : > { %v5017_v24 = vadd.f32 %v5016_v14, %v5015_v20  ;;  %v5018_v12 = vpop.f32.mrb[146].mxu1  ;;  %v3986_v20 = vadd.f32 %v8202_v10, %v8207_v7 }
 0x4bd   : > { %v5019_v53 = vpop.f32.mrb[147].mxu1 }
 0x4be   : > { %v5020_v36 = vadd.f32 %v5019_v53, %v5018_v12  ;;  %v8309_v51 = vadd.f32 %v5017_v24, %v3959_v2 }
 0x4c0   : > { %v8311_v49 = vadd.f32 %v5020_v36, %v3962_v23 }
 0x4c2   : > { %v5021_v15 = vpop.f32.mrb[148].mxu1 }
 0x4c3   : > { %v5022_v3 = vpop.f32.mrb[149].mxu1 }
 0x4c4   : > { %v5023_v1 = vadd.f32 %v5022_v3, %v5021_v15  ;;  %v5024_v8 = vpop.f32.mrb[150].mxu1 }
 0x4c5   : > { %v5025_v19 = vpop.f32.mrb[151].mxu1 }
 0x4c6   : > { %v5026_v42 = vadd.f32 %v5025_v19, %v5024_v8  ;;  %v8317_v38 = vadd.f32 %v5023_v1, %v3967_v37 }
 0x4c8   : > { %v8319_v9 = vadd.f32 %v5026_v42, %v3970_v58 }
 0x4ca   : > { %v5027_v41 = vpop.f32.mrb[152].mxu1 }
 0x4cb   : > { %v5028_v16 = vpop.f32.mrb[153].mxu1 }
 0x4cc   : > { %v5029_v13 = vadd.f32 %v5028_v16, %v5027_v41  ;;  %v5030_v0 = vpop.f32.mrb[154].mxu1 }
 0x4cd   : > { %v5031_v45 = vpop.f32.mrb[155].mxu1 }
 0x4ce   : > { %v5032_v56 = vadd.f32 %v5031_v45, %v5030_v0  ;;  %v8325_v6 = vadd.f32 %v5029_v13, %v3975_v17 }
 0x4d0   : > { %v8327_v28 = vadd.f32 %v5032_v56, %v3978_v52 }
 0x4d2   : > { %v5033_v61 = vpop.f32.mrb[156].mxu1 }
 0x4d3   : > { %v5034_v60 = vpop.f32.mrb[157].mxu1 }
 0x4d4   : > { %v5035_v18 = vadd.f32 %v5034_v60, %v5033_v61  ;;  %v5036_v25 = vpop.f32.mrb[158].mxu1 }
 0x4d5   : > { %v5037_v57 = vpop.f32.mrb[159].mxu1 }
 0x4d6   : > { %v5038_v14 = vadd.f32 %v5037_v57, %v5036_v25  ;;  %v8334_v2 = vadd.f32 %v5035_v18, %v3983_v27 }
 0x4d8   : > { %v8336_v44 = vadd.f32 %v5038_v14, %v3986_v20 }
 0x4da   : > { %v5375_v24 = vpop.f32.mrb[160].mxu1 }
 0x4db   : > { %v4193_v12 = vadd.f32 %v5375_v24, %v8221_v22  ;;  %v4184_v53 = vpop.f32.mrb[161].mxu1 }
 0x4dc   : > { %v4185_v40 = vadd.f32 %v4184_v53, %v8213_v46  ;;  %v5376_v23 = vpop.f32.mrb[162].mxu1 }
 0x4dd   : > { %v4313_v36 = vmax.f32 %v4193_v12, 0.0  ;;  %v4196_v15 = vadd.f32 %v5376_v23, %v8223_v5  ;;  %v4187_v10 = vpop.f32.mrb[163].mxu1 }
 0x4de   : > { %v4311_v7 = vmax.f32 %v4185_v40, 0.0  ;;  %v4188_v3 = vadd.f32 %v4187_v10, %v8215_v50 }
 0x4df   : > { %4346 = vst.msk [vmem:[%s8344_s11 + $0x10] sm:$0xff] %vm4343_vm7, %v4313_v36  ;;  %v4314_v22 = vmax.f32 %v4196_v15, 0.0 }
 0x4e0   : > { %4344 = vst.msk [vmem:[%s8344_s11] sm:$0xff] %vm4343_vm7, %v4311_v7  ;;  %v4312_v46 = vmax.f32 %v4188_v3, 0.0 }
 0x4e1   : > { %4347 = vst.msk [vmem:[%s8344_s11 + $0x18] sm:$0xff] %vm4343_vm7, %v4314_v22 }
 0x4e2   : > { %4345 = vst.msk [vmem:[%s8344_s11 + $0x8] sm:$0xff] %vm4343_vm7, %v4312_v46  ;;  %v5379_v50 = vpop.f32.mrb[164].mxu1 }
 0x4e3   : > { %v4209_v5 = vadd.f32 %v5379_v50, %v8237_v62  ;;  %v4200_v37 = vpop.f32.mrb[165].mxu1 }
 0x4e4   : > { %v4201_v1 = vadd.f32 %v4200_v37, %v8229_v32  ;;  %v5380_v8 = vpop.f32.mrb[166].mxu1 }
 0x4e5   : > { %v4317_v19 = vmax.f32 %v4209_v5, 0.0  ;;  %v4212_v58 = vadd.f32 %v5380_v8, %v8239_v59  ;;  %v4203_v42 = vpop.f32.mrb[167].mxu1 }
 0x4e6   : > { %v4315_v41 = vmax.f32 %v4201_v1, 0.0  ;;  %v4204_v16 = vadd.f32 %v4203_v42, %v8231_v35 }
 0x4e7   : > { %4350 = vst.msk [vmem:[%s8344_s11 + $0x30] sm:$0xff] %vm4343_vm7, %v4317_v19  ;;  %v4318_v17 = vmax.f32 %v4212_v58, 0.0 }
 0x4e8   : > { %4348 = vst.msk [vmem:[%s8344_s11 + $0x20] sm:$0xff] %vm4343_vm7, %v4315_v41  ;;  %v4316_v13 = vmax.f32 %v4204_v16, 0.0 }
 0x4e9   : > { %4351 = vst.msk [vmem:[%s8344_s11 + $0x38] sm:$0xff] %vm4343_vm7, %v4318_v17 }
 0x4ea   : > { %4349 = vst.msk [vmem:[%s8344_s11 + $0x28] sm:$0xff] %vm4343_vm7, %v4316_v13  ;;  %v5383_v32 = vpop.f32.mrb[168].mxu1 }
 0x4eb   : > { %v4225_v62 = vadd.f32 %v5383_v32, %v8253_v39  ;;  %v4216_v59 = vpop.f32.mrb[169].mxu1 }
 0x4ec   : > { %v4217_v35 = vadd.f32 %v4216_v59, %v8245_v48  ;;  %v5384_v0 = vpop.f32.mrb[170].mxu1 }
 0x4ed   : > { %v4321_v45 = vmax.f32 %v4225_v62, 0.0  ;;  %v4228_v52 = vadd.f32 %v5384_v0, %v8255_v34  ;;  %v4219_v56 = vpop.f32.mrb[171].mxu1 }
 0x4ee   : > { %v4319_v61 = vmax.f32 %v4217_v35, 0.0  ;;  %v4220_v60 = vadd.f32 %v4219_v56, %v8247_v21 }
 0x4ef   : > { %4354 = vst.msk [vmem:[%s8344_s11 + $0x50] sm:$0xff] %vm4343_vm7, %v4321_v45  ;;  %v4322_v27 = vmax.f32 %v4228_v52, 0.0 }
 0x4f0   : > { %4352 = vst.msk [vmem:[%s8344_s11 + $0x40] sm:$0xff] %vm4343_vm7, %v4319_v61  ;;  %v4320_v18 = vmax.f32 %v4220_v60, 0.0 }
 0x4f1   : > { %4355 = vst.msk [vmem:[%s8344_s11 + $0x58] sm:$0xff] %vm4343_vm7, %v4322_v27 }
 0x4f2   : > { %4353 = vst.msk [vmem:[%s8344_s11 + $0x48] sm:$0xff] %vm4343_vm7, %v4320_v18  ;;  %v5387_v48 = vpop.f32.mrb[172].mxu1 }
 0x4f3   : > { %v4241_v39 = vadd.f32 %v5387_v48, %v8269_v11  ;;  %v4232_v34 = vpop.f32.mrb[173].mxu1 }
 0x4f4   : > { %v4233_v21 = vadd.f32 %v4232_v34, %v8261_v47  ;;  %v5388_v25 = vpop.f32.mrb[174].mxu1 }
 0x4f5   : > { %v4325_v57 = vmax.f32 %v4241_v39, 0.0  ;;  %v4244_v20 = vadd.f32 %v5388_v25, %v8271_v31  ;;  %v4235_v14 = vpop.f32.mrb[175].mxu1 }
 0x4f6   : > { %v4323_v24 = vmax.f32 %v4233_v21, 0.0  ;;  %v4236_v12 = vadd.f32 %v4235_v14, %v8263_v55 }
 0x4f7   : > { %4358 = vst.msk [vmem:[%s8344_s11 + $0x70] sm:$0xff] %vm4343_vm7, %v4325_v57  ;;  %v4326_v53 = vmax.f32 %v4244_v20, 0.0 }
 0x4f8   : > { %4356 = vst.msk [vmem:[%s8344_s11 + $0x60] sm:$0xff] %vm4343_vm7, %v4323_v24  ;;  %v4324_v40 = vmax.f32 %v4236_v12, 0.0 }
 0x4f9   : > { %4359 = vst.msk [vmem:[%s8344_s11 + $0x78] sm:$0xff] %vm4343_vm7, %v4326_v53 }
 0x4fa   : > { %4357 = vst.msk [vmem:[%s8344_s11 + $0x68] sm:$0xff] %vm4343_vm7, %v4324_v40  ;;  %v5391_v47 = vpop.f32.mrb[176].mxu1 }
 0x4fb   : > { %v4257_v11 = vadd.f32 %v5391_v47, %v8285_v4  ;;  %v4248_v31 = vpop.f32.mrb[177].mxu1 }
 0x4fc   : > { %v4249_v55 = vadd.f32 %v4248_v31, %v8277_v29  ;;  %v5392_v23 = vpop.f32.mrb[178].mxu1 }
 0x4fd   : > { %v4329_v36 = vmax.f32 %v4257_v11, 0.0  ;;  %v4260_v15 = vadd.f32 %v5392_v23, %v8287_v54  ;;  %v4251_v10 = vpop.f32.mrb[179].mxu1 }
 0x4fe   : > { %v4327_v7 = vmax.f32 %v4249_v55, 0.0  ;;  %v4252_v3 = vadd.f32 %v4251_v10, %v8279_v63 }
 0x4ff   : > { %4362 = vst.msk [vmem:[%s8344_s11 + $0x90] sm:$0xff] %vm4343_vm7, %v4329_v36  ;;  %v4330_v22 = vmax.f32 %v4260_v15, 0.0 }
 0x500   : > { %4360 = vst.msk [vmem:[%s8344_s11 + $0x80] sm:$0xff] %vm4343_vm7, %v4327_v7  ;;  %v4328_v46 = vmax.f32 %v4252_v3, 0.0 }
 0x501   : > { %4363 = vst.msk [vmem:[%s8344_s11 + $0x98] sm:$0xff] %vm4343_vm7, %v4330_v22 }
 0x502   : > { %4361 = vst.msk [vmem:[%s8344_s11 + $0x88] sm:$0xff] %vm4343_vm7, %v4328_v46  ;;  %v5395_v29 = vpop.f32.mrb[180].mxu1 }
 0x503   : > { %v4273_v4 = vadd.f32 %v5395_v29, %v8301_v43  ;;  %v4264_v54 = vpop.f32.mrb[181].mxu1 }
 0x504   : > { %v4265_v63 = vadd.f32 %v4264_v54, %v8293_v30  ;;  %v5396_v50 = vpop.f32.mrb[182].mxu1 }
 0x505   : > { %v4333_v5 = vmax.f32 %v4273_v4, 0.0  ;;  %v4276_v37 = vadd.f32 %v5396_v50, %v8303_v33  ;;  %v4267_v1 = vpop.f32.mrb[183].mxu1 }
 0x506   : > { %v4331_v8 = vmax.f32 %v4265_v63, 0.0  ;;  %v4268_v19 = vadd.f32 %v4267_v1, %v8295_v26 }
 0x507   : > { %4366 = vst.msk [vmem:[%s8344_s11 + $0xb0] sm:$0xff] %vm4343_vm7, %v4333_v5  ;;  %v4334_v58 = vmax.f32 %v4276_v37, 0.0 }
 0x508   : > { %4364 = vst.msk [vmem:[%s8344_s11 + $0xa0] sm:$0xff] %vm4343_vm7, %v4331_v8  ;;  %v4332_v42 = vmax.f32 %v4268_v19, 0.0 }
 0x509   : > { %4367 = vst.msk [vmem:[%s8344_s11 + $0xb8] sm:$0xff] %vm4343_vm7, %v4334_v58 }
 0x50a   : > { %4365 = vst.msk [vmem:[%s8344_s11 + $0xa8] sm:$0xff] %vm4343_vm7, %v4332_v42  ;;  %v5399_v30 = vpop.f32.mrb[184].mxu1 }
 0x50b   : > { %v4289_v43 = vadd.f32 %v5399_v30, %v8317_v38  ;;  %v4280_v33 = vpop.f32.mrb[185].mxu1 }
 0x50c   : > { %v4281_v26 = vadd.f32 %v4280_v33, %v8309_v51  ;;  %v5400_v41 = vpop.f32.mrb[186].mxu1 }
 0x50d   : > { %v4337_v16 = vmax.f32 %v4289_v43, 0.0  ;;  %v4292_v17 = vadd.f32 %v5400_v41, %v8319_v9  ;;  %v4283_v13 = vpop.f32.mrb[187].mxu1 }
 0x50e   : > { %v4335_v32 = vmax.f32 %v4281_v26, 0.0  ;;  %v4284_v62 = vadd.f32 %v4283_v13, %v8311_v49 }
 0x50f   : > { %4370 = vst.msk [vmem:[%s8344_s11 + $0xd0] sm:$0xff] %vm4343_vm7, %v4337_v16  ;;  %v4338_v59 = vmax.f32 %v4292_v17, 0.0 }
 0x510   : > { %4368 = vst.msk [vmem:[%s8344_s11 + $0xc0] sm:$0xff] %vm4343_vm7, %v4335_v32  ;;  %v4336_v38 = vmax.f32 %v4284_v62, 0.0 }
 0x511   : > { %4371 = vst.msk [vmem:[%s8344_s11 + $0xd8] sm:$0xff] %vm4343_vm7, %v4338_v59 }
 0x512   : > { %4369 = vst.msk [vmem:[%s8344_s11 + $0xc8] sm:$0xff] %vm4343_vm7, %v4336_v38  ;;  %v5403_v51 = vpop.f32.mrb[188].mxu1 }
 0x513   : > { %v4305_v9 = vadd.f32 %v5403_v51, %v8334_v2  ;;  %v4296_v35 = vpop.f32.mrb[189].mxu1 }
 0x514   : > { %v4297_v0 = vadd.f32 %v4296_v35, %v8325_v6  ;;  %v5404_v49 = vpop.f32.mrb[190].mxu1 }
 0x515   : > { %v4341_v45 = vmax.f32 %v4305_v9, 0.0  ;;  %v4308_v52 = vadd.f32 %v5404_v49, %v8336_v44  ;;  %v4299_v56 = vpop.f32.mrb[191].mxu1 }
 0x516   : > { %v4339_v61 = vmax.f32 %v4297_v0, 0.0  ;;  %v4300_v60 = vadd.f32 %v4299_v56, %v8327_v28 }
 0x517   : > { %4374 = vst.msk [vmem:[%s8344_s11 + $0xf0] sm:$0xff] %vm4343_vm7, %v4341_v45  ;;  %v4342_v2 = vmax.f32 %v4308_v52, 0.0 }
 0x518   : > { %4372 = vst.msk [vmem:[%s8344_s11 + $0xe0] sm:$0xff] %vm4343_vm7, %v4339_v61  ;;  %v4340_v6 = vmax.f32 %v4300_v60, 0.0 }
 0x519   : > { %4375 = vst.msk [vmem:[%s8344_s11 + $0xf8] sm:$0xff] %vm4343_vm7, %v4342_v2 }
 0x51a   : > { %4373 = vst.msk [vmem:[%s8344_s11 + $0xe8] sm:$0xff] %vm4343_vm7, %v4340_v6 }
 0x51b   : > { %6015 = shalt.err (!%p6012_p3)
}
 0x51c   : > { %s6016_s30 = scalar_lea.hbm %s8437_s16, 4096  ;;  %s6020_s8 = scalar_lea.hbm %s8495_s5, 8192 }
 0x51d   : > { %p6017_p4 = scmp.ne.s32.totalorder %s8437_s16, %s6016_s30  ;;  %p6021_p9 = scmp.lt.u32.totalorder %s8437_s16, %s8495_s5 }
 0x51e   : > { %p6022_p10 = scmp.lt.u32.totalorder %s6020_s8, %s6016_s30  ;;  %p6024_p12 = scmp.lt.u32.totalorder %s6016_s30, %s8437_s16 }
 0x51f   : > { %p6018_p7 = pnand %p6017_p4, %p6139_p5 }
 0x520   : > { %p6023_p11 = por %p6022_p10, %p6021_p9 }
 0x521   : > { %p6019_p8 = pneg %p6018_p7 }
 0x522   : > { %p6025_p13 = por %p6024_p12, %p6023_p11 }
 0x524   : > { %p6026_p0 = pnand %p6025_p13, %p6019_p8 }
 0x526   : > { %6029 = shalt.err (!%p6026_p0)
}
 0x527   : > { %s6069_s11 = smov 128   ;;  %s6070_s12 = smov 8  }
 0x528   : > { %5671 = dma.vmem_to_hbm [thread:$0]  (%p6139_p5), %s8439_s13, 4096, %s8437_s16, %s8449_s22, %s6069_s11, %s6069_s11, %s6070_s12  }
 0x529 PF: > { %p5677_p1 = scmp.ge.s32.totalorder %s6064_s21, 2  ;;  %s4405_s14 = sand.u32 1, %s6052_s18  }
 0x52a   : > { %s4406_s15 = scalar_lea.sflag [#allocation4], %s4405_s14 }
 0x52b   : > { %p5674_p2 = pnand %p5677_p1, %p6143_p6 }
 0x52d   : > { %6047 = dma.done.wait (!%p5674_p2), %s4406_s15, 4096  }
 0x52e   : > { %6049 = vsyncadd (!%p5674_p2), %s4406_s15, 4294963200  ;;  %p15_p3 = scmp.ge.s32.totalorder %s6126_s24, 4   ;;  %s8722_s18 = smov %s6056_s19 }
 0x52f   : > { %s8723_s19 = smov %s6060_s20  ;;  %s8724_s20 = smov %s6137_s27 }
 0x530   : > { %s8725_s21 = smov %s6126_s24  ;;  %17 = sbr.rel (!%p15_p3) target bundleno = 3 (0x3), region = 77 }
 0x537   :  { %4411 = vsyncpa [#allocation4], 1 }
 0x538   :  { %4413 = vsyncpa [#allocation4 + $0x1], 1 }

</bundles_post_ra>
